<compile_context>
chip_gen: v6e
topology: v6e:2x2x1
jax: 0.10.0
libtpu: 0.0.40
codegen_flags: <defaults>
</compile_context>

<pallas_src>
import functools
import math

import jax
import jax.numpy as jnp
from jax.experimental import pallas as pl
from jax.experimental.pallas import tpu as pltpu

_LOG_EPS = math.log(1e-8)


def _pick_vmem_limit():
    """Generation-conditional scoped-VMEM budget (64 MiB on 128-MiB parts)."""
    try:
        cap = pltpu.get_tpu_info().vmem_capacity_bytes
        if cap >= 100 * 1024 * 1024:          # v5e / v6e: 128 MiB physical VMEM
            return 64 * 1024 * 1024
    except Exception:
        pass
    return 32 * 1024 * 1024                   # v7x (64 MiB physical) / unknown


_VMEM_LIMIT = _pick_vmem_limit()


# ---------------------------------------------------------------------------
# padding / tile planning
# ---------------------------------------------------------------------------
def _round_up(x, m):
    return ((x + m - 1) // m) * m


def _plan_dim(dim, pref):
    """Return (tile, padded_dim): dims <= pref use one full-dim block."""
    if dim <= pref:
        return dim, dim
    return pref, _round_up(dim, pref)


def _pad_to(x, shape):
    pads = tuple((0, t - s) for s, t in zip(x.shape, shape))
    if all(p == (0, 0) for p in pads):
        return x
    return jnp.pad(x, pads)                   # zero padding is exact for matmul


# ---------------------------------------------------------------------------
# Kernel 1: fused graph-propagation layer (one pass over adj per layer).
#   Per grid step (row-tile i, col-tile k):
#     acc        += adj_tile @ E_i_tile            (f32 scratch -> bf16 Z_u)
#     Z_i^T[k]   += E_u_tile^T @ adj_tile           (resident (nk, d, tk) out)
#     E_u_sum_new = E_u_sum + acc                   (fused epilogue at k==last)
# ---------------------------------------------------------------------------
def _prop_kernel(adj_ref, ei_ref, eu_ref, eusum_ref,
                 zu_ref, eusum_new_ref, zit_ref, acc_ref):
    i = pl.program_id(0)
    k = pl.program_id(1)

    @pl.when(k == 0)
    def _():
        acc_ref[...] = jnp.zeros_like(acc_ref)

    adj_t = adj_ref[...]

    # user-side partial: (tm, tk) @ (tk, d) -> (tm, d), f32 accumulation
    acc_ref[...] += jnp.dot(adj_t, ei_ref[...],
                            preferred_element_type=jnp.float32)

    # item-side partial: (tm, d)^T contracted with (tm, tk) -> (d, tk).
    # The big adj tile stays in the standard operand position; only the small
    # embedding tile could ever need a layout transpose.
    zit_part = jax.lax.dot_general(eu_ref[...], adj_t,
                                   (((0,), (0,)), ((), ())),
                                   preferred_element_type=jnp.float32)

    @pl.when(i == 0)
    def _():
        zit_ref[k] = zit_part

    @pl.when(i > 0)
    def _():
        zit_ref[k] = zit_ref[k] + zit_part

    @pl.when(k == pl.num_programs(1) - 1)
    def _():
        acc = acc_ref[...]
        zu_ref[...] = acc.astype(zu_ref.dtype)
        eusum_new_ref[...] = eusum_ref[...] + acc


def _propagate_layer_pallas(adj_p, ei_bf, eu_bf, eu_sum, *, tm, tk):
    Mp, Kp = adj_p.shape
    d = ei_bf.shape[1]
    nm, nk = Mp // tm, Kp // tk
    assert nm == 1 or tm % 8 == 0, "row tile must be sublane-aligned"
    assert nk == 1 or tk % 128 == 0, "col tile must be lane-aligned"

    zu_bf, eusum_new, zit3 = pl.pallas_call(
        _prop_kernel,
        out_shape=(jax.ShapeDtypeStruct((Mp, d), jnp.bfloat16),    # Z_u
                   jax.ShapeDtypeStruct((Mp, d), jnp.float32),     # E_u_sum + Z_u
                   jax.ShapeDtypeStruct((nk, d, tk), jnp.float32)),  # Z_i^T slabs
        grid_spec=pltpu.PrefetchScalarGridSpec(
            num_scalar_prefetch=0,
            grid=(nm, nk),
            in_specs=[
                pl.BlockSpec((tm, tk), lambda i, k: (i, k)),        # adj (bf16)
                pl.BlockSpec((tk, d), lambda i, k: (k, 0)),         # E_i (bf16)
                pl.BlockSpec((tm, d), lambda i, k: (i, 0)),         # E_u (bf16)
                pl.BlockSpec((tm, d), lambda i, k: (i, 0)),         # E_u_sum (f32)
            ],
            out_specs=[
                pl.BlockSpec((tm, d), lambda i, k: (i, 0)),
                pl.BlockSpec((tm, d), lambda i, k: (i, 0)),
                pl.BlockSpec((nk, d, tk), lambda i, k: (0, 0, 0)),  # resident
            ],
            scratch_shapes=[pltpu.VMEM((tm, d), jnp.float32)]),
        compiler_params=pltpu.CompilerParams(
            # both grid axes carry an accumulation (k -> Z_u, i -> Z_i^T)
            dimension_semantics=("arbitrary", "arbitrary"),
            vmem_limit_bytes=_VMEM_LIMIT),
    )(adj_p, ei_bf, eu_bf, eu_sum)

    zi = zit3.transpose(0, 2, 1).reshape(Kp, d)   # tiny (n_i x d) relayout in XLA
    return zu_bf, eusum_new, zi


def propagate_layer(adj_p, ei_bf, eu_bf, eu_sum, *, tm, tk, use_pallas=None):
    """One LightGCL propagation layer on padded operands.

    Returns (Z_u as bf16, E_u_sum + Z_u as f32, Z_i as f32)."""
    Mp, Kp = adj_p.shape
    if use_pallas is None:
        use_pallas = (Mp // tm) * (Kp // tk) > 1    # single grid step -> XLA
    if not use_pallas:
        zu = jnp.dot(adj_p, ei_bf, preferred_element_type=jnp.float32)
        zit = jax.lax.dot_general(eu_bf, adj_p, (((0,), (0,)), ((), ())),
                                  preferred_element_type=jnp.float32)
        return zu.astype(jnp.bfloat16), eu_sum + zu, zit.T
    return _propagate_layer_pallas(adj_p, ei_bf, eu_bf, eu_sum, tm=tm, tk=tk)


# ---------------------------------------------------------------------------
# Kernel 2: fused contrastive negative score (stable flash-style LSE)
#   out[b] = log( sum_j exp( (A[b] . E[j]) / temp ) + 1e-8 )
# Grid: (batch tiles [parallel], N tiles [arbitrary reduction]).
# ---------------------------------------------------------------------------
def _neg_score_kernel(a_ref, e_ref, o_ref, m_ref, acc_ref, *,
                      inv_temp, n_valid, tn, needs_mask):
    j = pl.program_id(1)

    @pl.when(j == 0)
    def _():
        m_ref[...] = jnp.full_like(m_ref, -jnp.inf)
        acc_ref[...] = jnp.zeros_like(acc_ref)

    # fold 1/temp into the small query tile; bf16 x bf16 -> f32 on the MXU
    q = (a_ref[...] * inv_temp).astype(jnp.bfloat16)
    s = jax.lax.dot_general(q, e_ref[...], (((1,), (1,)), ((), ())),
                            preferred_element_type=jnp.float32)
    if needs_mask:
        col = j * tn + jax.lax.broadcasted_iota(jnp.int32, s.shape, 1)
        s = jnp.where(col < n_valid, s, -jnp.inf)

    m_new = jnp.maximum(m_ref[...], jnp.max(s, axis=-1, keepdims=True))
    acc_ref[...] = (jnp.exp(m_ref[...] - m_new) * acc_ref[...]
                    + jnp.sum(jnp.exp(s - m_new), axis=-1, keepdims=True))
    m_ref[...] = m_new

    @pl.when(j == pl.num_programs(1) - 1)
    def _():
        # log(sum exp(s) + 1e-8) == logaddexp(m + log(acc), log(1e-8))
        lse = m_ref[...] + jnp.log(acc_ref[...])
        hi = jnp.maximum(lse, _LOG_EPS)
        o_ref[...] = hi + jnp.log(jnp.exp(lse - hi) + jnp.exp(_LOG_EPS - hi))


def neg_score(a, e, temp, *, tb_pref=512, tn_pref=2048, use_pallas=None):
    """out[b] = log( sum_j exp((a[b] . e[j]) / temp) + 1e-8 )."""
    B, d = a.shape
    N, d2 = e.shape
    assert d == d2
    inv_temp = 1.0 / temp
    tb, Bp = _plan_dim(B, tb_pref)
    tn, Np = _plan_dim(N, tn_pref)
    if use_pallas is None:
        use_pallas = (Bp // tb) * (Np // tn) > 1
    if not use_pallas:
        # small-problem bypass with identical dtype choices
        q = (a.astype(jnp.float32) * inv_temp).astype(jnp.bfloat16)
        s = jax.lax.dot_general(q, e.astype(jnp.bfloat16),
                                (((1,), (1,)), ((), ())),
                                preferred_element_type=jnp.float32)
        m = jnp.max(s, axis=-1, keepdims=True)
        lse = m[:, 0] + jnp.log(jnp.sum(jnp.exp(s - m), axis=-1))
        return jnp.logaddexp(lse, _LOG_EPS)

    assert (Bp // tb) == 1 or tb % 8 == 0
    assert (Np // tn) == 1 or tn % 8 == 0

    a_p = _pad_to(a.astype(jnp.float32), (Bp, d))
    e_p = _pad_to(e.astype(jnp.bfloat16), (Np, d))     # bf16 halves table reads

    kern = functools.partial(_neg_score_kernel, inv_temp=inv_temp,
                             n_valid=N, tn=tn, needs_mask=(Np != N))
    out = pl.pallas_call(
        kern,
        out_shape=jax.ShapeDtypeStruct((Bp, 1), jnp.float32),
        grid_spec=pltpu.PrefetchScalarGridSpec(
            num_scalar_prefetch=0,
            grid=(Bp // tb, Np // tn),
            in_specs=[
                pl.BlockSpec((tb, d), lambda i, j: (i, 0)),
                pl.BlockSpec((tn, d), lambda i, j: (j, 0)),
            ],
            out_specs=pl.BlockSpec((tb, 1), lambda i, j: (i, 0)),
            scratch_shapes=[
                pltpu.VMEM((tb, 1), jnp.float32),   # running max
                pltpu.VMEM((tb, 1), jnp.float32),   # running sum of exps
            ]),
        compiler_params=pltpu.CompilerParams(
            # batch axis "parallel" -> v7x megacore can shard it across TCs
            dimension_semantics=("parallel", "arbitrary"),
            vmem_limit_bytes=_VMEM_LIMIT),
    )(a_p, e_p)
    return out[:B, 0]


# ---------------------------------------------------------------------------
# LightGCL forward (training branch, test=False)
# ---------------------------------------------------------------------------
def lightgcl_forward(params, uids, iids, pos, neg, *, l, temp, lambda_1,
                     lambda_2, use_pallas=None, prop_tiles=(1024, 1024),
                     neg_tiles=(512, 2048)):
    E_u_0 = params["E_u_0"].astype(jnp.float32)      # (n_u, d)
    E_i_0 = params["E_i_0"].astype(jnp.float32)      # (n_i, d)
    adj = params["adj_norm"]                         # (n_u, n_i) dense stand-in
    u_mul_s = params["u_mul_s"]                      # (n_u, q)
    v_mul_s = params["v_mul_s"]                      # (n_i, q)
    ut = params["ut"]                                # (q, n_u)
    vt = params["vt"]                                # (q, n_i)

    n_u, d = E_u_0.shape
    n_i = E_i_0.shape[0]

    tm, Mp = _plan_dim(n_u, prop_tiles[0])
    tk, Kp = _plan_dim(n_i, prop_tiles[1])

    # --- pad ONCE, keep padded through all l layers, crop once at the end ---
    adj_p = _pad_to(adj.astype(jnp.bfloat16), (Mp, Kp))
    Eu0_p = _pad_to(E_u_0, (Mp, d))
    Ei0_p = _pad_to(E_i_0, (Kp, d))

    eu_cur_bf = Eu0_p.astype(jnp.bfloat16)   # E_u_list[layer-1] matmul operand
    ei_cur_bf = Ei0_p.astype(jnp.bfloat16)
    eu_sum = Eu0_p                           # running sum of E_u_list[0..layer]
    ei_sum = Ei0_p
    s_u, s_i = Eu0_p, Ei0_p                  # sum of E_*_list[0..l-1] (SVD path)

    for layer in range(1, l + 1):
        if layer == l:
            s_u, s_i = eu_sum, ei_sum
        zu_bf, eu_sum, zi = propagate_layer(
            adj_p, ei_cur_bf, eu_cur_bf, eu_sum, tm=tm, tk=tk,
            use_pallas=use_pallas)
        ei_sum = ei_sum + zi                 # tiny (n_i x d) XLA add
        eu_cur_bf = zu_bf
        ei_cur_bf = zi.astype(jnp.bfloat16)

    E_u = eu_sum[:n_u]
    E_i = ei_sum[:n_i]

    # --- low-rank SVD path, collapsed across layers and left to XLA ---------
    # G_u = E_u_0 + u_mul_s @ (vt @ sum_{j<l} E_i_list[j])  (distributivity)
    T_u = jnp.dot(vt, s_i[:n_i], preferred_element_type=jnp.float32)        # (q, d)
    G_u = E_u_0 + jnp.dot(u_mul_s, T_u, preferred_element_type=jnp.float32)
    T_i = jnp.dot(ut, s_u[:n_u], preferred_element_type=jnp.float32)        # (q, d)
    G_i = E_i_0 + jnp.dot(v_mul_s, T_i, preferred_element_type=jnp.float32)

    # --- contrastive loss ----------------------------------------------------
    Gu_b = jnp.take(G_u, uids, axis=0)
    Eu_b = jnp.take(E_u, uids, axis=0)
    Gi_b = jnp.take(G_i, iids, axis=0)
    Ei_b = jnp.take(E_i, iids, axis=0)

    neg_u = neg_score(Gu_b, E_u, temp, tb_pref=neg_tiles[0],
                      tn_pref=neg_tiles[1], use_pallas=use_pallas)
    neg_i = neg_score(Gi_b, E_i, temp, tb_pref=neg_tiles[0],
                      tn_pref=neg_tiles[1], use_pallas=use_pallas)
    neg_sc = jnp.mean(neg_u) + jnp.mean(neg_i)

    # tiny per-row dots: leave to XLA so they fuse with the gathers
    pos_u = jnp.clip(jnp.sum(Gu_b * Eu_b, axis=-1) / temp, -5.0, 5.0)
    pos_i = jnp.clip(jnp.sum(Gi_b * Ei_b, axis=-1) / temp, -5.0, 5.0)
    pos_sc = jnp.mean(pos_u) + jnp.mean(pos_i)
    loss_s = -pos_sc + neg_sc

    # --- BPR loss -------------------------------------------------------------
    u_emb = Eu_b                                   # == E_u[uids]
    pos_emb = jnp.take(E_i, pos, axis=0)
    neg_emb = jnp.take(E_i, neg, axis=0)
    pos_scores = jnp.sum(u_emb * pos_emb, axis=-1)
    neg_scores = jnp.sum(u_emb * neg_emb, axis=-1)
    loss_r = -jnp.mean(jax.nn.log_sigmoid(pos_scores - neg_scores))

    # --- L2 regularization on the parameters (E_u_0, E_i_0) -------------------
    loss_reg = lambda_2 * (jnp.sum(E_u_0 * E_u_0) + jnp.sum(E_i_0 * E_i_0))

    loss = loss_r + lambda_1 * loss_s + loss_reg
    return loss, loss_r, lambda_1 * loss_s


# ---------------------------------------------------------------------------
# Deterministic demo / self-check
# ---------------------------------------------------------------------------
def xavier_uniform(key, shape):
    fan_in, fan_out = shape
    bound = (6.0 / (fan_in + fan_out)) ** 0.5
    return jax.random.uniform(key, shape, jnp.float32, -bound, bound)


if __name__ == "__main__":
    # Small but multi-tile shapes (with the demo tile overrides below) so the
    # Pallas kernels, their padding and their masking paths are all exercised.
    n_u, n_i, d, q = 384, 600, 32, 16
    l, temp, lambda_1, lambda_2 = 2, 0.5, 0.2, 1e-4
    B = 256

    key = jax.random.PRNGKey(0)
    keys = jax.random.split(key, 11)

    params = {
        "E_u_0": xavier_uniform(keys[0], (n_u, d)),
        "E_i_0": xavier_uniform(keys[1], (n_i, d)),
        # dense bf16 stand-in for the normalized sparse adjacency
        "adj_norm": (jax.random.uniform(keys[2], (n_u, n_i), jnp.float32) / n_i
                     ).astype(jnp.bfloat16),
        "u_mul_s": 0.1 * jax.random.normal(keys[3], (n_u, q), jnp.float32),
        "v_mul_s": 0.1 * jax.random.normal(keys[4], (n_i, q), jnp.float32),
        "ut": 0.1 * jax.random.normal(keys[5], (q, n_u), jnp.float32),
        "vt": 0.1 * jax.random.normal(keys[6], (q, n_i), jnp.float32),
    }

    uids = jax.random.randint(keys[7], (B,), 0, n_u)
    iids = jax.random.randint(keys[8], (B,), 0, n_i)
    pos_ids = jax.random.randint(keys[9], (B,), 0, n_i)
    neg_ids = jax.random.randint(keys[10], (B,), 0, n_i)

    common = dict(l=l, temp=temp, lambda_1=lambda_1, lambda_2=lambda_2)
    # Pallas path: small tile overrides force multi-tile grids at this scale.
    fwd_pallas = jax.jit(functools.partial(
        lightgcl_forward, use_pallas=True, prop_tiles=(128, 128),
        neg_tiles=(128, 256), **common))
    # Reference / small-problem bypass path: identical math & dtypes, pure jnp.
    fwd_ref = jax.jit(functools.partial(
        lightgcl_forward, use_pallas=False, **common))

    out_p = fwd_pallas(params, uids, iids, pos_ids, neg_ids)
    out_r = fwd_ref(params, uids, iids, pos_ids, neg_ids)
    jax.block_until_ready((out_p, out_r))

    names = ("loss", "loss_r", "lambda_1*loss_s")
    ok = True
    for name, a, b in zip(names, out_p, out_r):
        a, b = float(a), float(b)
        if not (math.isfinite(a) and abs(a - b) <= 2e-2 + 2e-2 * abs(b)):
            ok = False
            print(f"MISMATCH {name}: pallas={a} ref={b}")
    if not ok:
        raise SystemExit(1)
    print("KERNEL_OK")
</pallas_src>

<mosaic_0001>
module attributes {stable_mosaic.version = 11 : i64} {
  func.func @_prop_kernel(%arg0: i32, %arg1: i32, %arg2: memref<128x128xbf16, #tpu.memory_space<vmem>>, %arg3: memref<128x32xbf16, #tpu.memory_space<vmem>>, %arg4: memref<128x32xbf16, #tpu.memory_space<vmem>>, %arg5: memref<128x32xf32, #tpu.memory_space<vmem>>, %arg6: memref<128x32xbf16, #tpu.memory_space<vmem>>, %arg7: memref<128x32xf32, #tpu.memory_space<vmem>>, %arg8: memref<5x32x128xf32, #tpu.memory_space<vmem>>, %arg9: memref<128x32xf32, #tpu.memory_space<vmem>>) attributes {dimension_semantics = [#tpu.dimension_semantics<arbitrary>, #tpu.dimension_semantics<arbitrary>], iteration_bounds = array<i64: 3, 5>, scalar_prefetch = 0 : i64, scratch_operands = 1 : i64, tpu.core_type = #tpu.core_type<tc>, window_params = [{transform_indices = @transform_0, window_bounds = array<i64: 128, 128>}, {transform_indices = @transform_1, window_bounds = array<i64: 128, 32>}, {transform_indices = @transform_2, window_bounds = array<i64: 128, 32>}, {transform_indices = @transform_3, window_bounds = array<i64: 128, 32>}, {transform_indices = @transform_4, window_bounds = array<i64: 128, 32>}, {transform_indices = @transform_5, window_bounds = array<i64: 128, 32>}, {pipeline_mode = #tpu.pipeline_mode<synchronous>, transform_indices = @transform_6, window_bounds = array<i64: 5, 32, 128>}]} {
    %c0_i32 = arith.constant 0 : i32
    %0 = arith.cmpi eq, %arg1, %c0_i32 : i32
    %1 = arith.extui %0 : i1 to i32
    %c0_i32_0 = arith.constant 0 : i32
    %2 = arith.cmpi ne, %1, %c0_i32_0 : i32
    scf.if %2 {
      %cst_16 = arith.constant 0.000000e+00 : f32
      %20 = vector.broadcast %cst_16 : f32 to vector<128x32xf32>
      %c0_17 = arith.constant 0 : index
      %c0_18 = arith.constant 0 : index
      %21 = vector.load %arg9[%c0_17, %c0_18] : memref<128x32xf32, #tpu.memory_space<vmem>>, vector<128x32xf32>
      tpu.vector_store %arg9[%c0_17, %c0_18], %20 {strides = array<i32>} : memref<128x32xf32, #tpu.memory_space<vmem>>, vector<128x32xf32>,
    } else {
    }
    %c0 = arith.constant 0 : index
    %c0_1 = arith.constant 0 : index
    %3 = vector.load %arg2[%c0, %c0_1] : memref<128x128xbf16, #tpu.memory_space<vmem>>, vector<128x128xbf16>
    %c0_2 = arith.constant 0 : index
    %c0_3 = arith.constant 0 : index
    %4 = vector.load %arg9[%c0_2, %c0_3] : memref<128x32xf32, #tpu.memory_space<vmem>>, vector<128x32xf32>
    %c0_4 = arith.constant 0 : index
    %c0_5 = arith.constant 0 : index
    %5 = vector.load %arg3[%c0_4, %c0_5] : memref<128x32xbf16, #tpu.memory_space<vmem>>, vector<128x32xbf16>
    %cst = arith.constant dense<0.000000e+00> : vector<128x32xf32>
    %6 = tpu.matmul %3, %5, %cst {dimension_numbers = #tpu.dot_dimension_numbers<[1], [0], [0], [1], [0, 0, 1, 1], [], []>} : vector<128x128xbf16>, vector<128x32xbf16>, vector<128x32xf32> -> vector<128x32xf32>
    %7 = arith.addf %4, %6 : vector<128x32xf32>
    %c0_6 = arith.constant 0 : index
    %c0_7 = arith.constant 0 : index
    %8 = vector.load %arg9[%c0_6, %c0_7] : memref<128x32xf32, #tpu.memory_space<vmem>>, vector<128x32xf32>
    tpu.vector_store %arg9[%c0_6, %c0_7], %7 {strides = array<i32>} : memref<128x32xf32, #tpu.memory_space<vmem>>, vector<128x32xf32>,
    %c0_8 = arith.constant 0 : index
    %c0_9 = arith.constant 0 : index
    %9 = vector.load %arg4[%c0_8, %c0_9] : memref<128x32xbf16, #tpu.memory_space<vmem>>, vector<128x32xbf16>
    %cst_10 = arith.constant dense<0.000000e+00> : vector<32x128xf32>
    %10 = tpu.matmul %9, %3, %cst_10 {dimension_numbers = #tpu.dot_dimension_numbers<[0], [0], [1], [1], [0, 1, 1, 1], [], []>} : vector<128x32xbf16>, vector<128x128xbf16>, vector<32x128xf32> -> vector<32x128xf32>
    %c0_i32_11 = arith.constant 0 : i32
    %11 = arith.cmpi eq, %arg0, %c0_i32_11 : i32
    %12 = arith.extui %11 : i1 to i32
    %c0_i32_12 = arith.constant 0 : i32
    %13 = arith.cmpi ne, %12, %c0_i32_12 : i32
    scf.if %13 {
      %20 = arith.index_cast %arg1 : i32 to index
      %c0_16 = arith.constant 0 : index
      %c0_17 = arith.constant 0 : index
      %21 = vector.load %arg8[%20, %c0_16, %c0_17] : memref<5x32x128xf32, #tpu.memory_space<vmem>>, vector<1x32x128xf32>
      %22 = vector.shape_cast %21 : vector<1x32x128xf32> to vector<32x128xf32>
      %23 = vector.shape_cast %10 : vector<32x128xf32> to vector<1x32x128xf32>
      tpu.vector_store %arg8[%20, %c0_16, %c0_17], %23 {strides = array<i32>} : memref<5x32x128xf32, #tpu.memory_space<vmem>>, vector<1x32x128xf32>,
    } else {
    }
    %c0_i32_13 = arith.constant 0 : i32
    %14 = arith.cmpi sgt, %arg0, %c0_i32_13 : i32
    %15 = arith.extui %14 : i1 to i32
    %c0_i32_14 = arith.constant 0 : i32
    %16 = arith.cmpi ne, %15, %c0_i32_14 : i32
    scf.if %16 {
      %20 = arith.index_cast %arg1 : i32 to index
      %c0_16 = arith.constant 0 : index
      %c0_17 = arith.constant 0 : index
      %21 = vector.load %arg8[%20, %c0_16, %c0_17] : memref<5x32x128xf32, #tpu.memory_space<vmem>>, vector<1x32x128xf32>
      %22 = vector.shape_cast %21 : vector<1x32x128xf32> to vector<32x128xf32>
      %23 = arith.addf %22, %10 : vector<32x128xf32>
      %24 = arith.index_cast %arg1 : i32 to index
      %c0_18 = arith.constant 0 : index
      %c0_19 = arith.constant 0 : index
      %25 = vector.load %arg8[%24, %c0_18, %c0_19] : memref<5x32x128xf32, #tpu.memory_space<vmem>>, vector<1x32x128xf32>
      %26 = vector.shape_cast %25 : vector<1x32x128xf32> to vector<32x128xf32>
      %27 = vector.shape_cast %23 : vector<32x128xf32> to vector<1x32x128xf32>
      tpu.vector_store %arg8[%24, %c0_18, %c0_19], %27 {strides = array<i32>} : memref<5x32x128xf32, #tpu.memory_space<vmem>>, vector<1x32x128xf32>,
    } else {
    }
    %c4_i32 = arith.constant 4 : i32
    %17 = arith.cmpi eq, %arg1, %c4_i32 : i32
    %18 = arith.extui %17 : i1 to i32
    %c0_i32_15 = arith.constant 0 : i32
    %19 = arith.cmpi ne, %18, %c0_i32_15 : i32
    scf.if %19 {
      %c0_16 = arith.constant 0 : index
      %c0_17 = arith.constant 0 : index
      %20 = vector.load %arg9[%c0_16, %c0_17] : memref<128x32xf32, #tpu.memory_space<vmem>>, vector<128x32xf32>
      %21 = arith.truncf %20 : vector<128x32xf32> to vector<128x32xbf16>
      %c0_18 = arith.constant 0 : index
      %c0_19 = arith.constant 0 : index
      %22 = vector.load %arg6[%c0_18, %c0_19] : memref<128x32xbf16, #tpu.memory_space<vmem>>, vector<128x32xbf16>
      tpu.vector_store %arg6[%c0_18, %c0_19], %21 {strides = array<i32>} : memref<128x32xbf16, #tpu.memory_space<vmem>>, vector<128x32xbf16>,
      %c0_20 = arith.constant 0 : index
      %c0_21 = arith.constant 0 : index
      %23 = vector.load %arg5[%c0_20, %c0_21] : memref<128x32xf32, #tpu.memory_space<vmem>>, vector<128x32xf32>
      %24 = arith.addf %23, %20 : vector<128x32xf32>
      %c0_22 = arith.constant 0 : index
      %c0_23 = arith.constant 0 : index
      %25 = vector.load %arg7[%c0_22, %c0_23] : memref<128x32xf32, #tpu.memory_space<vmem>>, vector<128x32xf32>
      tpu.vector_store %arg7[%c0_22, %c0_23], %24 {strides = array<i32>} : memref<128x32xf32, #tpu.memory_space<vmem>>, vector<128x32xf32>,
    } else {
    }
    return
  }
  func.func @transform_0(%arg0: i32, %arg1: i32) -> (i32, i32) {
    %c0_i32 = arith.constant 0 : i32
    return %arg0, %arg1 : i32, i32
  }
  func.func @transform_1(%arg0: i32, %arg1: i32) -> (i32, i32) {
    %c0_i32 = arith.constant 0 : i32
    %c0_i32_0 = arith.constant 0 : i32
    return %arg1, %c0_i32 : i32, i32
  }
  func.func @transform_2(%arg0: i32, %arg1: i32) -> (i32, i32) {
    %c0_i32 = arith.constant 0 : i32
    %c0_i32_0 = arith.constant 0 : i32
    return %arg0, %c0_i32 : i32, i32
  }
  func.func @transform_3(%arg0: i32, %arg1: i32) -> (i32, i32) {
    %c0_i32 = arith.constant 0 : i32
    %c0_i32_0 = arith.constant 0 : i32
    return %arg0, %c0_i32 : i32, i32
  }
  func.func @transform_4(%arg0: i32, %arg1: i32) -> (i32, i32) {
    %c0_i32 = arith.constant 0 : i32
    %c0_i32_0 = arith.constant 0 : i32
    return %arg0, %c0_i32 : i32, i32
  }
  func.func @transform_5(%arg0: i32, %arg1: i32) -> (i32, i32) {
    %c0_i32 = arith.constant 0 : i32
    %c0_i32_0 = arith.constant 0 : i32
    return %arg0, %c0_i32 : i32, i32
  }
  func.func @transform_6(%arg0: i32, %arg1: i32) -> (i32, i32, i32) {
    %c0_i32 = arith.constant 0 : i32
    %c0_i32_0 = arith.constant 0 : i32
    %c0_i32_1 = arith.constant 0 : i32
    %c0_i32_2 = arith.constant 0 : i32
    return %c0_i32, %c0_i32_0, %c0_i32_1 : i32, i32, i32
  }
}

module attributes {stable_mosaic.version = 11 : i64} {
  func.func @_prop_kernel(%arg0: i32, %arg1: i32, %arg2: memref<128x128xbf16, #tpu.memory_space<vmem>>, %arg3: memref<128x32xbf16, #tpu.memory_space<vmem>>, %arg4: memref<128x32xbf16, #tpu.memory_space<vmem>>, %arg5: memref<128x32xf32, #tpu.memory_space<vmem>>, %arg6: memref<128x32xbf16, #tpu.memory_space<vmem>>, %arg7: memref<128x32xf32, #tpu.memory_space<vmem>>, %arg8: memref<5x32x128xf32, #tpu.memory_space<vmem>>, %arg9: memref<128x32xf32, #tpu.memory_space<vmem>>) attributes {dimension_semantics = [#tpu.dimension_semantics<arbitrary>, #tpu.dimension_semantics<arbitrary>], iteration_bounds = array<i64: 3, 5>, scalar_prefetch = 0 : i64, scratch_operands = 1 : i64, tpu.core_type = #tpu.core_type<tc>, window_params = [{transform_indices = @transform_0, window_bounds = array<i64: 128, 128>}, {transform_indices = @transform_1, window_bounds = array<i64: 128, 32>}, {transform_indices = @transform_2, window_bounds = array<i64: 128, 32>}, {transform_indices = @transform_3, window_bounds = array<i64: 128, 32>}, {transform_indices = @transform_4, window_bounds = array<i64: 128, 32>}, {transform_indices = @transform_5, window_bounds = array<i64: 128, 32>}, {pipeline_mode = #tpu.pipeline_mode<synchronous>, transform_indices = @transform_6, window_bounds = array<i64: 5, 32, 128>}]} {
    %c0_i32 = arith.constant 0 : i32
    %0 = arith.cmpi eq, %arg1, %c0_i32 : i32
    %1 = arith.extui %0 : i1 to i32
    %c0_i32_0 = arith.constant 0 : i32
    %2 = arith.cmpi ne, %1, %c0_i32_0 : i32
    scf.if %2 {
      %cst_16 = arith.constant 0.000000e+00 : f32
      %20 = vector.broadcast %cst_16 : f32 to vector<128x32xf32>
      %c0_17 = arith.constant 0 : index
      %c0_18 = arith.constant 0 : index
      %21 = vector.load %arg9[%c0_17, %c0_18] : memref<128x32xf32, #tpu.memory_space<vmem>>, vector<128x32xf32>
      tpu.vector_store %arg9[%c0_17, %c0_18], %20 {strides = array<i32>} : memref<128x32xf32, #tpu.memory_space<vmem>>, vector<128x32xf32>,
    } else {
    }
    %c0 = arith.constant 0 : index
    %c0_1 = arith.constant 0 : index
    %3 = vector.load %arg2[%c0, %c0_1] : memref<128x128xbf16, #tpu.memory_space<vmem>>, vector<128x128xbf16>
    %c0_2 = arith.constant 0 : index
    %c0_3 = arith.constant 0 : index
    %4 = vector.load %arg9[%c0_2, %c0_3] : memref<128x32xf32, #tpu.memory_space<vmem>>, vector<128x32xf32>
    %c0_4 = arith.constant 0 : index
    %c0_5 = arith.constant 0 : index
    %5 = vector.load %arg3[%c0_4, %c0_5] : memref<128x32xbf16, #tpu.memory_space<vmem>>, vector<128x32xbf16>
    %cst = arith.constant dense<0.000000e+00> : vector<128x32xf32>
    %6 = tpu.matmul %3, %5, %cst {dimension_numbers = #tpu.dot_dimension_numbers<[1], [0], [0], [1], [0, 0, 1, 1], [], []>} : vector<128x128xbf16>, vector<128x32xbf16>, vector<128x32xf32> -> vector<128x32xf32>
    %7 = arith.addf %4, %6 : vector<128x32xf32>
    %c0_6 = arith.constant 0 : index
    %c0_7 = arith.constant 0 : index
    %8 = vector.load %arg9[%c0_6, %c0_7] : memref<128x32xf32, #tpu.memory_space<vmem>>, vector<128x32xf32>
    tpu.vector_store %arg9[%c0_6, %c0_7], %7 {strides = array<i32>} : memref<128x32xf32, #tpu.memory_space<vmem>>, vector<128x32xf32>,
    %c0_8 = arith.constant 0 : index
    %c0_9 = arith.constant 0 : index
    %9 = vector.load %arg4[%c0_8, %c0_9] : memref<128x32xbf16, #tpu.memory_space<vmem>>, vector<128x32xbf16>
    %cst_10 = arith.constant dense<0.000000e+00> : vector<32x128xf32>
    %10 = tpu.matmul %9, %3, %cst_10 {dimension_numbers = #tpu.dot_dimension_numbers<[0], [0], [1], [1], [0, 1, 1, 1], [], []>} : vector<128x32xbf16>, vector<128x128xbf16>, vector<32x128xf32> -> vector<32x128xf32>
    %c0_i32_11 = arith.constant 0 : i32
    %11 = arith.cmpi eq, %arg0, %c0_i32_11 : i32
    %12 = arith.extui %11 : i1 to i32
    %c0_i32_12 = arith.constant 0 : i32
    %13 = arith.cmpi ne, %12, %c0_i32_12 : i32
    scf.if %13 {
      %20 = arith.index_cast %arg1 : i32 to index
      %c0_16 = arith.constant 0 : index
      %c0_17 = arith.constant 0 : index
      %21 = vector.load %arg8[%20, %c0_16, %c0_17] : memref<5x32x128xf32, #tpu.memory_space<vmem>>, vector<1x32x128xf32>
      %22 = vector.shape_cast %21 : vector<1x32x128xf32> to vector<32x128xf32>
      %23 = vector.shape_cast %10 : vector<32x128xf32> to vector<1x32x128xf32>
      tpu.vector_store %arg8[%20, %c0_16, %c0_17], %23 {strides = array<i32>} : memref<5x32x128xf32, #tpu.memory_space<vmem>>, vector<1x32x128xf32>,
    } else {
    }
    %c0_i32_13 = arith.constant 0 : i32
    %14 = arith.cmpi sgt, %arg0, %c0_i32_13 : i32
    %15 = arith.extui %14 : i1 to i32
    %c0_i32_14 = arith.constant 0 : i32
    %16 = arith.cmpi ne, %15, %c0_i32_14 : i32
    scf.if %16 {
      %20 = arith.index_cast %arg1 : i32 to index
      %c0_16 = arith.constant 0 : index
      %c0_17 = arith.constant 0 : index
      %21 = vector.load %arg8[%20, %c0_16, %c0_17] : memref<5x32x128xf32, #tpu.memory_space<vmem>>, vector<1x32x128xf32>
      %22 = vector.shape_cast %21 : vector<1x32x128xf32> to vector<32x128xf32>
      %23 = arith.addf %22, %10 : vector<32x128xf32>
      %24 = arith.index_cast %arg1 : i32 to index
      %c0_18 = arith.constant 0 : index
      %c0_19 = arith.constant 0 : index
      %25 = vector.load %arg8[%24, %c0_18, %c0_19] : memref<5x32x128xf32, #tpu.memory_space<vmem>>, vector<1x32x128xf32>
      %26 = vector.shape_cast %25 : vector<1x32x128xf32> to vector<32x128xf32>
      %27 = vector.shape_cast %23 : vector<32x128xf32> to vector<1x32x128xf32>
      tpu.vector_store %arg8[%24, %c0_18, %c0_19], %27 {strides = array<i32>} : memref<5x32x128xf32, #tpu.memory_space<vmem>>, vector<1x32x128xf32>,
    } else {
    }
    %c4_i32 = arith.constant 4 : i32
    %17 = arith.cmpi eq, %arg1, %c4_i32 : i32
    %18 = arith.extui %17 : i1 to i32
    %c0_i32_15 = arith.constant 0 : i32
    %19 = arith.cmpi ne, %18, %c0_i32_15 : i32
    scf.if %19 {
      %c0_16 = arith.constant 0 : index
      %c0_17 = arith.constant 0 : index
      %20 = vector.load %arg9[%c0_16, %c0_17] : memref<128x32xf32, #tpu.memory_space<vmem>>, vector<128x32xf32>
      %21 = arith.truncf %20 : vector<128x32xf32> to vector<128x32xbf16>
      %c0_18 = arith.constant 0 : index
      %c0_19 = arith.constant 0 : index
      %22 = vector.load %arg6[%c0_18, %c0_19] : memref<128x32xbf16, #tpu.memory_space<vmem>>, vector<128x32xbf16>
      tpu.vector_store %arg6[%c0_18, %c0_19], %21 {strides = array<i32>} : memref<128x32xbf16, #tpu.memory_space<vmem>>, vector<128x32xbf16>,
      %c0_20 = arith.constant 0 : index
      %c0_21 = arith.constant 0 : index
      %23 = vector.load %arg5[%c0_20, %c0_21] : memref<128x32xf32, #tpu.memory_space<vmem>>, vector<128x32xf32>
      %24 = arith.addf %23, %20 : vector<128x32xf32>
      %c0_22 = arith.constant 0 : index
      %c0_23 = arith.constant 0 : index
      %25 = vector.load %arg7[%c0_22, %c0_23] : memref<128x32xf32, #tpu.memory_space<vmem>>, vector<128x32xf32>
      tpu.vector_store %arg7[%c0_22, %c0_23], %24 {strides = array<i32>} : memref<128x32xf32, #tpu.memory_space<vmem>>, vector<128x32xf32>,
    } else {
    }
    return
  }
  func.func @transform_0(%arg0: i32, %arg1: i32) -> (i32, i32) {
    %c0_i32 = arith.constant 0 : i32
    return %arg0, %arg1 : i32, i32
  }
  func.func @transform_1(%arg0: i32, %arg1: i32) -> (i32, i32) {
    %c0_i32 = arith.constant 0 : i32
    %c0_i32_0 = arith.constant 0 : i32
    return %arg1, %c0_i32 : i32, i32
  }
  func.func @transform_2(%arg0: i32, %arg1: i32) -> (i32, i32) {
    %c0_i32 = arith.constant 0 : i32
    %c0_i32_0 = arith.constant 0 : i32
    return %arg0, %c0_i32 : i32, i32
  }
  func.func @transform_3(%arg0: i32, %arg1: i32) -> (i32, i32) {
    %c0_i32 = arith.constant 0 : i32
    %c0_i32_0 = arith.constant 0 : i32
    return %arg0, %c0_i32 : i32, i32
  }
  func.func @transform_4(%arg0: i32, %arg1: i32) -> (i32, i32) {
    %c0_i32 = arith.constant 0 : i32
    %c0_i32_0 = arith.constant 0 : i32
    return %arg0, %c0_i32 : i32, i32
  }
  func.func @transform_5(%arg0: i32, %arg1: i32) -> (i32, i32) {
    %c0_i32 = arith.constant 0 : i32
    %c0_i32_0 = arith.constant 0 : i32
    return %arg0, %c0_i32 : i32, i32
  }
  func.func @transform_6(%arg0: i32, %arg1: i32) -> (i32, i32, i32) {
    %c0_i32 = arith.constant 0 : i32
    %c0_i32_0 = arith.constant 0 : i32
    %c0_i32_1 = arith.constant 0 : i32
    %c0_i32_2 = arith.constant 0 : i32
    return %c0_i32, %c0_i32_0, %c0_i32_1 : i32, i32, i32
  }
}

module attributes {stable_mosaic.version = 11 : i64} {
  func.func @_neg_score_kernel(%arg0: i32, %arg1: i32, %arg2: memref<128x32xf32, #tpu.memory_space<vmem>>, %arg3: memref<256x32xbf16, #tpu.memory_space<vmem>>, %arg4: memref<128x1xf32, #tpu.memory_space<vmem>>, %arg5: memref<128x1xf32, #tpu.memory_space<vmem>>, %arg6: memref<128x1xf32, #tpu.memory_space<vmem>>) attributes {dimension_semantics = [#tpu.dimension_semantics<parallel>, #tpu.dimension_semantics<arbitrary>], iteration_bounds = array<i64: 2, 3>, scalar_prefetch = 0 : i64, scratch_operands = 2 : i64, tpu.core_type = #tpu.core_type<tc>, window_params = [{transform_indices = @transform_0, window_bounds = array<i64: 128, 32>}, {transform_indices = @transform_1, window_bounds = array<i64: 256, 32>}, {transform_indices = @transform_2, window_bounds = array<i64: 128, 1>}]} {
    %c0_i32 = arith.constant 0 : i32
    %0 = arith.cmpi eq, %arg1, %c0_i32 : i32
    %1 = arith.extui %0 : i1 to i32
    %c0_i32_0 = arith.constant 0 : i32
    %2 = arith.cmpi ne, %1, %c0_i32_0 : i32
    scf.if %2 {
      %cst_19 = arith.constant 0xFF800000 : f32
      %37 = vector.broadcast %cst_19 : f32 to vector<128x1xf32>
      %c0_20 = arith.constant 0 : index
      %c0_21 = arith.constant 0 : index
      %38 = vector.load %arg5[%c0_20, %c0_21] : memref<128x1xf32, #tpu.memory_space<vmem>>, vector<128x1xf32>
      tpu.vector_store %arg5[%c0_20, %c0_21], %37 {strides = array<i32>} : memref<128x1xf32, #tpu.memory_space<vmem>>, vector<128x1xf32>,
      %cst_22 = arith.constant 0.000000e+00 : f32
      %39 = vector.broadcast %cst_22 : f32 to vector<128x1xf32>
      %c0_23 = arith.constant 0 : index
      %c0_24 = arith.constant 0 : index
      %40 = vector.load %arg6[%c0_23, %c0_24] : memref<128x1xf32, #tpu.memory_space<vmem>>, vector<128x1xf32>
      tpu.vector_store %arg6[%c0_23, %c0_24], %39 {strides = array<i32>} : memref<128x1xf32, #tpu.memory_space<vmem>>, vector<128x1xf32>,
    } else {
    }
    %c0 = arith.constant 0 : index
    %c0_1 = arith.constant 0 : index
    %3 = vector.load %arg2[%c0, %c0_1] : memref<128x32xf32, #tpu.memory_space<vmem>>, vector<128x32xf32>
    %cst = arith.constant 2.000000e+00 : f32
    %4 = vector.broadcast %cst : f32 to vector<128x32xf32>
    %5 = arith.mulf %3, %4 : vector<128x32xf32>
    %6 = arith.truncf %5 : vector<128x32xf32> to vector<128x32xbf16>
    %c0_2 = arith.constant 0 : index
    %c0_3 = arith.constant 0 : index
    %7 = vector.load %arg3[%c0_2, %c0_3] : memref<256x32xbf16, #tpu.memory_space<vmem>>, vector<256x32xbf16>
    %cst_4 = arith.constant dense<0.000000e+00> : vector<128x256xf32>
    %8 = tpu.matmul %6, %7, %cst_4 {dimension_numbers = #tpu.dot_dimension_numbers<[1], [1], [0], [0], [0, 0, 1, 0], [], []>} : vector<128x32xbf16>, vector<256x32xbf16>, vector<128x256xf32> -> vector<128x256xf32>
    %c256_i32 = arith.constant 256 : i32
    %9 = arith.muli %arg1, %c256_i32 : i32
    %10 = tpu.iota {dimensions = array<i32: 1>} : vector<128x256xi32>
    %11 = vector.broadcast %9 : i32 to vector<128x256xi32>
    %12 = arith.addi %11, %10 : vector<128x256xi32>
    %c600_i32 = arith.constant 600 : i32
    %13 = vector.broadcast %c600_i32 : i32 to vector<128x256xi32>
    %14 = arith.cmpi slt, %12, %13 : vector<128x256xi32>
    %cst_5 = arith.constant 0xFF800000 : f32
    %15 = vector.broadcast %cst_5 : f32 to vector<128x256xf32>
    %16 = arith.select %14, %8, %15 : vector<128x256xi1>, vector<128x256xf32>
    %c0_6 = arith.constant 0 : index
    %c0_7 = arith.constant 0 : index
    %17 = vector.load %arg5[%c0_6, %c0_7] : memref<128x1xf32, #tpu.memory_space<vmem>>, vector<128x1xf32>
    %cst_8 = arith.constant dense<0xFF800000> : vector<128xf32>
    %18 = vector.multi_reduction <maximumf>, %16, %cst_8 [1] : vector<128x256xf32> to vector<128xf32>
    %19 = vector.shape_cast %18 : vector<128xf32> to vector<128x1xf32>
    %20 = arith.maximumf %17, %19 : vector<128x1xf32>
    %c0_9 = arith.constant 0 : index
    %c0_10 = arith.constant 0 : index
    %21 = vector.load %arg5[%c0_9, %c0_10] : memref<128x1xf32, #tpu.memory_space<vmem>>, vector<128x1xf32>
    %22 = arith.subf %21, %20 : vector<128x1xf32>
    %23 = math.exp %22 : vector<128x1xf32>
    %c0_11 = arith.constant 0 : index
    %c0_12 = arith.constant 0 : index
    %24 = vector.load %arg6[%c0_11, %c0_12] : memref<128x1xf32, #tpu.memory_space<vmem>>, vector<128x1xf32>
    %25 = arith.mulf %23, %24 : vector<128x1xf32>
    %26 = vector.broadcast %20 : vector<128x1xf32> to vector<128x256xf32>
    %27 = arith.subf %16, %26 : vector<128x256xf32>
    %28 = math.exp %27 : vector<128x256xf32>
    %cst_13 = arith.constant dense<0.000000e+00> : vector<128xf32>
    %29 = vector.multi_reduction <add>, %28, %cst_13 [1] : vector<128x256xf32> to vector<128xf32>
    %30 = vector.shape_cast %29 : vector<128xf32> to vector<128x1xf32>
    %31 = arith.addf %25, %30 : vector<128x1xf32>
    %c0_14 = arith.constant 0 : index
    %c0_15 = arith.constant 0 : index
    %32 = vector.load %arg6[%c0_14, %c0_15] : memref<128x1xf32, #tpu.memory_space<vmem>>, vector<128x1xf32>
    tpu.vector_store %arg6[%c0_14, %c0_15], %31 {strides = array<i32>} : memref<128x1xf32, #tpu.memory_space<vmem>>, vector<128x1xf32>,
    %c0_16 = arith.constant 0 : index
    %c0_17 = arith.constant 0 : index
    %33 = vector.load %arg5[%c0_16, %c0_17] : memref<128x1xf32, #tpu.memory_space<vmem>>, vector<128x1xf32>
    tpu.vector_store %arg5[%c0_16, %c0_17], %20 {strides = array<i32>} : memref<128x1xf32, #tpu.memory_space<vmem>>, vector<128x1xf32>,
    %c2_i32 = arith.constant 2 : i32
    %34 = arith.cmpi eq, %arg1, %c2_i32 : i32
    %35 = arith.extui %34 : i1 to i32
    %c0_i32_18 = arith.constant 0 : i32
    %36 = arith.cmpi ne, %35, %c0_i32_18 : i32
    scf.if %36 {
      %c0_19 = arith.constant 0 : index
      %c0_20 = arith.constant 0 : index
      %37 = vector.load %arg5[%c0_19, %c0_20] : memref<128x1xf32, #tpu.memory_space<vmem>>, vector<128x1xf32>
      %c0_21 = arith.constant 0 : index
      %c0_22 = arith.constant 0 : index
      %38 = vector.load %arg6[%c0_21, %c0_22] : memref<128x1xf32, #tpu.memory_space<vmem>>, vector<128x1xf32>
      %39 = math.log %38 : vector<128x1xf32>
      %40 = arith.addf %37, %39 : vector<128x1xf32>
      %cst_23 = arith.constant -18.420681 : f32
      %41 = vector.broadcast %cst_23 : f32 to vector<128x1xf32>
      %42 = arith.maximumf %40, %41 : vector<128x1xf32>
      %43 = arith.subf %40, %42 : vector<128x1xf32>
      %44 = math.exp %43 : vector<128x1xf32>
      %cst_24 = arith.constant -18.420681 : f32
      %45 = vector.broadcast %cst_24 : f32 to vector<128x1xf32>
      %46 = arith.subf %45, %42 : vector<128x1xf32>
      %47 = math.exp %46 : vector<128x1xf32>
      %48 = arith.addf %44, %47 : vector<128x1xf32>
      %49 = math.log %48 : vector<128x1xf32>
      %50 = arith.addf %42, %49 : vector<128x1xf32>
      %c0_25 = arith.constant 0 : index
      %c0_26 = arith.constant 0 : index
      %51 = vector.load %arg4[%c0_25, %c0_26] : memref<128x1xf32, #tpu.memory_space<vmem>>, vector<128x1xf32>
      tpu.vector_store %arg4[%c0_25, %c0_26], %50 {strides = array<i32>} : memref<128x1xf32, #tpu.memory_space<vmem>>, vector<128x1xf32>,
    } else {
    }
    return
  }
  func.func @transform_0(%arg0: i32, %arg1: i32) -> (i32, i32) {
    %c0_i32 = arith.constant 0 : i32
    %c0_i32_0 = arith.constant 0 : i32
    return %arg0, %c0_i32 : i32, i32
  }
  func.func @transform_1(%arg0: i32, %arg1: i32) -> (i32, i32) {
    %c0_i32 = arith.constant 0 : i32
    %c0_i32_0 = arith.constant 0 : i32
    return %arg1, %c0_i32 : i32, i32
  }
  func.func @transform_2(%arg0: i32, %arg1: i32) -> (i32, i32) {
    %c0_i32 = arith.constant 0 : i32
    %c0_i32_0 = arith.constant 0 : i32
    return %arg0, %c0_i32 : i32, i32
  }
}

module attributes {stable_mosaic.version = 11 : i64} {
  func.func @_neg_score_kernel(%arg0: i32, %arg1: i32, %arg2: memref<128x32xf32, #tpu.memory_space<vmem>>, %arg3: memref<256x32xbf16, #tpu.memory_space<vmem>>, %arg4: memref<128x1xf32, #tpu.memory_space<vmem>>, %arg5: memref<128x1xf32, #tpu.memory_space<vmem>>, %arg6: memref<128x1xf32, #tpu.memory_space<vmem>>) attributes {dimension_semantics = [#tpu.dimension_semantics<parallel>, #tpu.dimension_semantics<arbitrary>], iteration_bounds = array<i64: 2, 2>, scalar_prefetch = 0 : i64, scratch_operands = 2 : i64, tpu.core_type = #tpu.core_type<tc>, window_params = [{transform_indices = @transform_0, window_bounds = array<i64: 128, 32>}, {transform_indices = @transform_1, window_bounds = array<i64: 256, 32>}, {transform_indices = @transform_2, window_bounds = array<i64: 128, 1>}]} {
    %c0_i32 = arith.constant 0 : i32
    %0 = arith.cmpi eq, %arg1, %c0_i32 : i32
    %1 = arith.extui %0 : i1 to i32
    %c0_i32_0 = arith.constant 0 : i32
    %2 = arith.cmpi ne, %1, %c0_i32_0 : i32
    scf.if %2 {
      %cst_19 = arith.constant 0xFF800000 : f32
      %37 = vector.broadcast %cst_19 : f32 to vector<128x1xf32>
      %c0_20 = arith.constant 0 : index
      %c0_21 = arith.constant 0 : index
      %38 = vector.load %arg5[%c0_20, %c0_21] : memref<128x1xf32, #tpu.memory_space<vmem>>, vector<128x1xf32>
      tpu.vector_store %arg5[%c0_20, %c0_21], %37 {strides = array<i32>} : memref<128x1xf32, #tpu.memory_space<vmem>>, vector<128x1xf32>,
      %cst_22 = arith.constant 0.000000e+00 : f32
      %39 = vector.broadcast %cst_22 : f32 to vector<128x1xf32>
      %c0_23 = arith.constant 0 : index
      %c0_24 = arith.constant 0 : index
      %40 = vector.load %arg6[%c0_23, %c0_24] : memref<128x1xf32, #tpu.memory_space<vmem>>, vector<128x1xf32>
      tpu.vector_store %arg6[%c0_23, %c0_24], %39 {strides = array<i32>} : memref<128x1xf32, #tpu.memory_space<vmem>>, vector<128x1xf32>,
    } else {
    }
    %c0 = arith.constant 0 : index
    %c0_1 = arith.constant 0 : index
    %3 = vector.load %arg2[%c0, %c0_1] : memref<128x32xf32, #tpu.memory_space<vmem>>, vector<128x32xf32>
    %cst = arith.constant 2.000000e+00 : f32
    %4 = vector.broadcast %cst : f32 to vector<128x32xf32>
    %5 = arith.mulf %3, %4 : vector<128x32xf32>
    %6 = arith.truncf %5 : vector<128x32xf32> to vector<128x32xbf16>
    %c0_2 = arith.constant 0 : index
    %c0_3 = arith.constant 0 : index
    %7 = vector.load %arg3[%c0_2, %c0_3] : memref<256x32xbf16, #tpu.memory_space<vmem>>, vector<256x32xbf16>
    %cst_4 = arith.constant dense<0.000000e+00> : vector<128x256xf32>
    %8 = tpu.matmul %6, %7, %cst_4 {dimension_numbers = #tpu.dot_dimension_numbers<[1], [1], [0], [0], [0, 0, 1, 0], [], []>} : vector<128x32xbf16>, vector<256x32xbf16>, vector<128x256xf32> -> vector<128x256xf32>
    %c256_i32 = arith.constant 256 : i32
    %9 = arith.muli %arg1, %c256_i32 : i32
    %10 = tpu.iota {dimensions = array<i32: 1>} : vector<128x256xi32>
    %11 = vector.broadcast %9 : i32 to vector<128x256xi32>
    %12 = arith.addi %11, %10 : vector<128x256xi32>
    %c384_i32 = arith.constant 384 : i32
    %13 = vector.broadcast %c384_i32 : i32 to vector<128x256xi32>
    %14 = arith.cmpi slt, %12, %13 : vector<128x256xi32>
    %cst_5 = arith.constant 0xFF800000 : f32
    %15 = vector.broadcast %cst_5 : f32 to vector<128x256xf32>
    %16 = arith.select %14, %8, %15 : vector<128x256xi1>, vector<128x256xf32>
    %c0_6 = arith.constant 0 : index
    %c0_7 = arith.constant 0 : index
    %17 = vector.load %arg5[%c0_6, %c0_7] : memref<128x1xf32, #tpu.memory_space<vmem>>, vector<128x1xf32>
    %cst_8 = arith.constant dense<0xFF800000> : vector<128xf32>
    %18 = vector.multi_reduction <maximumf>, %16, %cst_8 [1] : vector<128x256xf32> to vector<128xf32>
    %19 = vector.shape_cast %18 : vector<128xf32> to vector<128x1xf32>
    %20 = arith.maximumf %17, %19 : vector<128x1xf32>
    %c0_9 = arith.constant 0 : index
    %c0_10 = arith.constant 0 : index
    %21 = vector.load %arg5[%c0_9, %c0_10] : memref<128x1xf32, #tpu.memory_space<vmem>>, vector<128x1xf32>
    %22 = arith.subf %21, %20 : vector<128x1xf32>
    %23 = math.exp %22 : vector<128x1xf32>
    %c0_11 = arith.constant 0 : index
    %c0_12 = arith.constant 0 : index
    %24 = vector.load %arg6[%c0_11, %c0_12] : memref<128x1xf32, #tpu.memory_space<vmem>>, vector<128x1xf32>
    %25 = arith.mulf %23, %24 : vector<128x1xf32>
    %26 = vector.broadcast %20 : vector<128x1xf32> to vector<128x256xf32>
    %27 = arith.subf %16, %26 : vector<128x256xf32>
    %28 = math.exp %27 : vector<128x256xf32>
    %cst_13 = arith.constant dense<0.000000e+00> : vector<128xf32>
    %29 = vector.multi_reduction <add>, %28, %cst_13 [1] : vector<128x256xf32> to vector<128xf32>
    %30 = vector.shape_cast %29 : vector<128xf32> to vector<128x1xf32>
    %31 = arith.addf %25, %30 : vector<128x1xf32>
    %c0_14 = arith.constant 0 : index
    %c0_15 = arith.constant 0 : index
    %32 = vector.load %arg6[%c0_14, %c0_15] : memref<128x1xf32, #tpu.memory_space<vmem>>, vector<128x1xf32>
    tpu.vector_store %arg6[%c0_14, %c0_15], %31 {strides = array<i32>} : memref<128x1xf32, #tpu.memory_space<vmem>>, vector<128x1xf32>,
    %c0_16 = arith.constant 0 : index
    %c0_17 = arith.constant 0 : index
    %33 = vector.load %arg5[%c0_16, %c0_17] : memref<128x1xf32, #tpu.memory_space<vmem>>, vector<128x1xf32>
    tpu.vector_store %arg5[%c0_16, %c0_17], %20 {strides = array<i32>} : memref<128x1xf32, #tpu.memory_space<vmem>>, vector<128x1xf32>,
    %c1_i32 = arith.constant 1 : i32
    %34 = arith.cmpi eq, %arg1, %c1_i32 : i32
    %35 = arith.extui %34 : i1 to i32
    %c0_i32_18 = arith.constant 0 : i32
    %36 = arith.cmpi ne, %35, %c0_i32_18 : i32
    scf.if %36 {
      %c0_19 = arith.constant 0 : index
      %c0_20 = arith.constant 0 : index
      %37 = vector.load %arg5[%c0_19, %c0_20] : memref<128x1xf32, #tpu.memory_space<vmem>>, vector<128x1xf32>
      %c0_21 = arith.constant 0 : index
      %c0_22 = arith.constant 0 : index
      %38 = vector.load %arg6[%c0_21, %c0_22] : memref<128x1xf32, #tpu.memory_space<vmem>>, vector<128x1xf32>
      %39 = math.log %38 : vector<128x1xf32>
      %40 = arith.addf %37, %39 : vector<128x1xf32>
      %cst_23 = arith.constant -18.420681 : f32
      %41 = vector.broadcast %cst_23 : f32 to vector<128x1xf32>
      %42 = arith.maximumf %40, %41 : vector<128x1xf32>
      %43 = arith.subf %40, %42 : vector<128x1xf32>
      %44 = math.exp %43 : vector<128x1xf32>
      %cst_24 = arith.constant -18.420681 : f32
      %45 = vector.broadcast %cst_24 : f32 to vector<128x1xf32>
      %46 = arith.subf %45, %42 : vector<128x1xf32>
      %47 = math.exp %46 : vector<128x1xf32>
      %48 = arith.addf %44, %47 : vector<128x1xf32>
      %49 = math.log %48 : vector<128x1xf32>
      %50 = arith.addf %42, %49 : vector<128x1xf32>
      %c0_25 = arith.constant 0 : index
      %c0_26 = arith.constant 0 : index
      %51 = vector.load %arg4[%c0_25, %c0_26] : memref<128x1xf32, #tpu.memory_space<vmem>>, vector<128x1xf32>
      tpu.vector_store %arg4[%c0_25, %c0_26], %50 {strides = array<i32>} : memref<128x1xf32, #tpu.memory_space<vmem>>, vector<128x1xf32>,
    } else {
    }
    return
  }
  func.func @transform_0(%arg0: i32, %arg1: i32) -> (i32, i32) {
    %c0_i32 = arith.constant 0 : i32
    %c0_i32_0 = arith.constant 0 : i32
    return %arg0, %c0_i32 : i32, i32
  }
  func.func @transform_1(%arg0: i32, %arg1: i32) -> (i32, i32) {
    %c0_i32 = arith.constant 0 : i32
    %c0_i32_0 = arith.constant 0 : i32
    return %arg1, %c0_i32 : i32, i32
  }
  func.func @transform_2(%arg0: i32, %arg1: i32) -> (i32, i32) {
    %c0_i32 = arith.constant 0 : i32
    %c0_i32_0 = arith.constant 0 : i32
    return %arg0, %c0_i32 : i32, i32
  }
}

</mosaic_0001>

<bundles_post_ra>
// kernel: lightgcl_forward.4
= control target key start
LH: loop header
LB: loop body
LE: loop exit
PB: predicated region body
PF: predicated region fallthrough
CT: control target
= control target key end

     0   :  { %s1824_s0 = inlined_call_operand.vmem [shape: bf16[384,640], index: 0, kind: input, shape index: {}]   ;;  %s1825_s1 = inlined_call_operand.vmem [shape: bf16[640,32], index: 1, kind: input, shape index: {}]   ;;  %s1826_s2 = inlined_call_operand.vmem [shape: bf16[384,32], index: 2, kind: input, shape index: {}]   ;;  %s1827_s3 = inlined_call_operand.vmem [shape: f32[384,32], index: 3, kind: input, shape index: {}]   ;;  %s1828_s4 = inlined_call_operand.vmem [shape: bf16[384,32], index: 4, kind: output, shape index: {0}]   ;;  %s1829_s5 = inlined_call_operand.vmem [shape: f32[384,32], index: 5, kind: output, shape index: {1}]   ;;  %s1830_s6 = inlined_call_operand.vmem [shape: f32[5,32,128], index: 6, kind: output, shape index: {2}]  }
   0x1   :  { %1832 = sst [smem:[#allocation5_spill]] %s1824_s0 }
   0x2   :  { %s1545_s21 = smov 0   ;;  %s1547_s22 = smov 0  }
   0x3   :  { %s1549_s23 = smov 0   ;;  %s1551_s24 = smov 0  }
   0x4   :  { %s1553_s25 = smov 0   ;;  %s1555_s26 = smov 0  }
   0x5   :  { %s1557_s27 = smov 0  }
   0x6 LB: > { %s26_s28 = sadd.s32 1, %s1499_s25  ;;  %s29_s29 = sadd.s32 1, %s1503_s26  ;;  %s1507_s27 = sphi %s1557_s27, %s17_s27   ;;  %s1503_s26 = sphi %s1555_s26, %s1841_s26   ;;  %s1499_s25 = sphi %s1553_s25, %s1840_s25   ;;  %s1495_s24 = sphi %s1551_s24, %s1839_s24   ;;  %s1491_s23 = sphi %s1549_s23, %s1838_s23   ;;  %s1487_s22 = sphi %s1547_s22, %s1837_s22   ;;  %s1483_s21 = sphi %s1545_s21, %s1836_s21  }
   0x7   : > { %p27_p0 = scmp.ge.s32.totalorder %s26_s28, 5  ;;  %p45_p1 = scmp.ne.s32.totalorder %s1487_s22, %s1483_s21 }
   0x8   : > { %p46_p2 = scmp.eq.s32.totalorder %s1507_s27, 0  ;;  %s38_s9 = sadd.s32 1, %s1487_s22 }
   0x9   : > { %s1843_s28 = smov (%p27_p0, %s26_s28), 0  ;;  %s1845_s29 = smov (!%p27_p0, %s29_s29), %s1503_s26 }
   0xa   : > { %p47_p3 = por %p46_p2, %p45_p1  ;;  %p31_p4 = scmp.ge.s32.totalorder %s1845_s29, 3 }
   0xb   : > { %s34_s30 = ssub.s32 %s1499_s25, %s1843_s28  ;;  %p1212_p6 = scmp.ge.s32.totalorder %s1507_s27, 15 }
   0xc   : > { %s1847_s29 = smov (%p31_p4, %s1845_s29), 0 }
   0xd   : > { %1833 = sst [smem:[#allocation4_spill]] %s1847_s29  ;;  %s33_s7 = ssub.s32 %s1503_s26, %s1847_s29 }
   0xe   : > { %s35_s8 = sor.u32 %s34_s30, %s33_s7  ;;  %222 = sbr.rel (%p1212_p6) target bundleno = 39 (0x27), region = 16 }
   0xf   : > { %p36_p5 = scmp.eq.s32.totalorder %s35_s8, 0 }
  0x11   : > { %s1596_s10 = scalar_select %p36_p5, %s1487_s22, %s38_s9  }
  0x13   : > { %225 = sbr.rel (!%p47_p3) target bundleno = 39 (0x27), region = 20  ;;  %s227_s11 = sand.u32 (%p47_p3), 1, %s1487_s22  }
  0x14   : > { %s1371_s12 = smul.u32 (%p47_p3), 80, %s1503_s26  ;;  %s1213_s13 = sshll.u32 (%p47_p3), %s227_s11, 6 }
  0x15   : > { %s1834_s0 = sld [smem:[#allocation5_spill]] (%p47_p3)  ;;  %s229_s19 = scalar_lea.vmem (%p47_p3), [#allocation3], %s1213_s13 }
  0x16   : > { %s232_s14 = sadd.s32 (%p47_p3), %s1499_s25, %s1371_s12 }
  0x17   : > { %s1216_s15 = sshll.u32 (%p47_p3), %s232_s14, 2 }
  0x1b   : > { %s1605_s18 = scalar_lea.vmem %s1834_s0, %s1216_s15 }
  0x1c   : > { %v251_v0 = vld [vmem:[%s1605_s18] sm:$0xf]  ;;  %v253_v1 = vld [vmem:[%s1605_s18 + $0x14] sm:$0xf]  ;;  %v255_v2 = vld [vmem:[%s1605_s18 + $0x28] sm:$0xf] }
  0x1d   : > { %252 = vst [vmem:[%s229_s19] sm:$0xf] %v251_v0  ;;  %254 = vst [vmem:[%s229_s19 + $0x4] sm:$0xf] %v253_v1  ;;  %v257_v3 = vld [vmem:[%s1605_s18 + $0x3c] sm:$0xf] }
  0x1e   : > { %256 = vst [vmem:[%s229_s19 + $0x8] sm:$0xf] %v255_v2  ;;  %v259_v4 = vld [vmem:[%s1605_s18 + $0x50] sm:$0xf]  ;;  %v261_v5 = vld [vmem:[%s1605_s18 + $0x64] sm:$0xf] }
  0x1f   : > { %258 = vst [vmem:[%s229_s19 + $0xc] sm:$0xf] %v257_v3  ;;  %260 = vst [vmem:[%s229_s19 + $0x10] sm:$0xf] %v259_v4  ;;  %v263_v6 = vld [vmem:[%s1605_s18 + $0x78] sm:$0xf] }
  0x20   : > { %262 = vst [vmem:[%s229_s19 + $0x14] sm:$0xf] %v261_v5  ;;  %v265_v7 = vld [vmem:[%s1605_s18 + $0x8c] sm:$0xf]  ;;  %v267_v8 = vld [vmem:[%s1605_s18 + $0xa0] sm:$0xf] }
  0x21   : > { %264 = vst [vmem:[%s229_s19 + $0x18] sm:$0xf] %v263_v6  ;;  %266 = vst [vmem:[%s229_s19 + $0x1c] sm:$0xf] %v265_v7  ;;  %v269_v9 = vld [vmem:[%s1605_s18 + $0xb4] sm:$0xf] }
  0x22   : > { %268 = vst [vmem:[%s229_s19 + $0x20] sm:$0xf] %v267_v8  ;;  %v271_v10 = vld [vmem:[%s1605_s18 + $0xc8] sm:$0xf]  ;;  %v273_v11 = vld [vmem:[%s1605_s18 + $0xdc] sm:$0xf] }
  0x23   : > { %270 = vst [vmem:[%s229_s19 + $0x24] sm:$0xf] %v269_v9  ;;  %272 = vst [vmem:[%s229_s19 + $0x28] sm:$0xf] %v271_v10  ;;  %v275_v12 = vld [vmem:[%s1605_s18 + $0xf0] sm:$0xf] }
  0x24   : > { %274 = vst [vmem:[%s229_s19 + $0x2c] sm:$0xf] %v273_v11  ;;  %v277_v13 = vld [vmem:[%s1605_s18 + $0x104] sm:$0xf]  ;;  %v279_v14 = vld [vmem:[%s1605_s18 + $0x118] sm:$0xf] }
  0x25   : > { %276 = vst [vmem:[%s229_s19 + $0x30] sm:$0xf] %v275_v12  ;;  %278 = vst [vmem:[%s229_s19 + $0x34] sm:$0xf] %v277_v13  ;;  %v281_v15 = vld [vmem:[%s1605_s18 + $0x12c] sm:$0xf] }
  0x26   : > { %280 = vst [vmem:[%s229_s19 + $0x38] sm:$0xf] %v279_v14  ;;  %282 = vst [vmem:[%s229_s19 + $0x3c] sm:$0xf] %v281_v15 }
  0x27 PF: > { %p1217_p7 = scmp.ge.s32.totalorder %s1507_s27, 1  ;;  %p364_p8 = scmp.lt.s32.totalorder %s1507_s27, 16 }
  0x29   : > { %p365_p9 = pnand %p1217_p7, %p364_p8 }
  0x2a   : > { %s371_s20 = sand.u32 (!%p365_p9), 1, %s1483_s21   ;;  %s1219_s30 = sshll.u32 (!%p365_p9), %s1491_s23, 4 }
  0x2b   : > { %368 = sbr.rel (%p365_p9) target bundleno = 410 (0x19a), region = 73  ;;  %s1218_s7 = sshll.u32 (!%p365_p9), %s371_s20, 6 }
  0x2c   : > { %p422_p10 = scmp.lt.s32.totalorder (!%p365_p9), %s1219_s30, 79  ;;  %s1221_s8 = sshll.u32 (!%p365_p9), %s1495_s24, 4 }
  0x2d   : > { %p428_p11 = scmp.lt.s32.totalorder (!%p365_p9), %s1221_s8, 47  ;;  %p1229_p12 = scmp.ne.s32.totalorder (!%p365_p9), %s1491_s23, 0 }
  0x30   : > { %s1849_s30 = smov (!%p422_p10, %s1219_s30), 79  ;;  %s1851_s8 = smov (!%p428_p11, %s1221_s8), 47 }
  0x31   : > { %s1220_s9 = sshll.u32 %s1849_s30, 2  ;;  %s1222_s14 = sshll.u32 %s1851_s8, 2 }
  0x32   : > { %s1631_s13 = scalar_lea.vmem %s1825_s1, %s1220_s9  ;;  %s1224_s15 = sshll.u32 %s1851_s8, 3 }
  0x33   : > { %s1636_s18 = scalar_lea.vmem %s1826_s2, %s1222_s14  ;;  %s1641_s20 = scalar_lea.vmem %s1827_s3, %s1224_s15 }
  0x34   : > { %s1646_s29 = scalar_lea.vmem %s1828_s4, %s1222_s14  ;;  %s1651_s12 = scalar_lea.vmem %s1829_s5, %s1224_s15 }
  0x35   : > { %s1653_s8 = scalar_lea.vmem [#allocation3], %s1218_s7  ;;  %455 = sbr.rel (%p1229_p12) target bundleno = 67 (0x43), region = 81 }
  0x3a   : > { %vm456_vm0 = vcmask 261120   ;;  %v1509_v16 = vmov 0.0  }
  0x3b   : > { %457 = vst.msk [vmem:[#allocation2] sm:$0xff] %vm456_vm0, %v1509_v16  ;;  %458 = vst.msk [vmem:[#allocation2 + $0x8] sm:$0xff] %vm456_vm0, %v1509_v16 }
  0x3c   : > { %459 = vst.msk [vmem:[#allocation2 + $0x10] sm:$0xff] %vm456_vm0, %v1509_v16  ;;  %460 = vst.msk [vmem:[#allocation2 + $0x18] sm:$0xff] %vm456_vm0, %v1509_v16 }
  0x3d   : > { %461 = vst.msk [vmem:[#allocation2 + $0x20] sm:$0xff] %vm456_vm0, %v1509_v16  ;;  %462 = vst.msk [vmem:[#allocation2 + $0x28] sm:$0xff] %vm456_vm0, %v1509_v16 }
  0x3e   : > { %463 = vst.msk [vmem:[#allocation2 + $0x30] sm:$0xff] %vm456_vm0, %v1509_v16  ;;  %464 = vst.msk [vmem:[#allocation2 + $0x38] sm:$0xff] %vm456_vm0, %v1509_v16 }
  0x3f   : > { %465 = vst.msk [vmem:[#allocation2 + $0x40] sm:$0xff] %vm456_vm0, %v1509_v16  ;;  %466 = vst.msk [vmem:[#allocation2 + $0x48] sm:$0xff] %vm456_vm0, %v1509_v16 }
  0x40   : > { %467 = vst.msk [vmem:[#allocation2 + $0x50] sm:$0xff] %vm456_vm0, %v1509_v16  ;;  %468 = vst.msk [vmem:[#allocation2 + $0x58] sm:$0xff] %vm456_vm0, %v1509_v16 }
  0x41   : > { %469 = vst.msk [vmem:[#allocation2 + $0x60] sm:$0xff] %vm456_vm0, %v1509_v16  ;;  %470 = vst.msk [vmem:[#allocation2 + $0x68] sm:$0xff] %vm456_vm0, %v1509_v16 }
  0x42   : > { %471 = vst.msk [vmem:[#allocation2 + $0x70] sm:$0xff] %vm456_vm0, %v1509_v16  ;;  %472 = vst.msk [vmem:[#allocation2 + $0x78] sm:$0xff] %vm456_vm0, %v1509_v16 }
  0x43 PF: > { %v1429_v17 = vld [vmem:[%s1636_s18] sm:$0xff]   ;;  %v1430_v18 = vld [vmem:[%s1636_s18 + $0x8] sm:$0xff]   ;;  %v1431_v19 = vld [vmem:[%s1636_s18 + $0x10] sm:$0xff]   ;;  %vm730_vm1 = vcmask 261120   ;;  %p1254_p13 = scmp.ne.s32.totalorder %s1495_s24, 0 }
  0x44   : > { %811 = vxpose.xlu0.c.b16.start [1/8] (narrow) %v1429_v17, 32  ;;  %v1437_v20 = vld [vmem:[%s1631_s13 + $0x38] sm:$0xff]   ;;  %v1438_v21 = vld [vmem:[%s1631_s13 + $0x30] sm:$0xff]   ;;  %v1439_v23 = vld [vmem:[%s1631_s13 + $0x28] sm:$0xff]   ;;  %s1255_s0 = sshll.u32 (!%p1254_p13), %s1491_s23, 5 }
  0x45   : > { %v1432_v22 = vld [vmem:[%s1636_s18 + $0x18] sm:$0xff]   ;;  %1319 = vmatprep.subr.bf16.mxu0 %v1437_v20  ;;  %v1433_v24 = vld [vmem:[%s1636_s18 + $0x20] sm:$0xff]   ;;  %v1434_v27 = vld [vmem:[%s1636_s18 + $0x28] sm:$0xff]   ;;  %s881_s14 = scalar_lea.vmem (!%p1254_p13), %s1830_s6, %s1255_s0 }
  0x46   : > { %1320 = vmatpush3.bf16.msra.mxu0 %v1437_v20  ;;  %v1440_v25 = vld [vmem:[%s1631_s13 + $0x20] sm:$0xff]   ;;  %v1447_v28 = vld [vmem:[%s1653_s8 + $0x38] sm:$0xff]   ;;  %v1448_v29 = vld [vmem:[%s1653_s8 + $0x30] sm:$0xff]  }
  0x47   : > { %1321 = vmatprep.subr.bf16.mxu0 %v1438_v21  ;;  %v1445_v26 = vld [vmem:[%s1653_s8] sm:$0xff]   ;;  %v1441_v30 = vld [vmem:[%s1631_s13 + $0x18] sm:$0xff]   ;;  %1351 = vmatprep.subr.bf16.mxu1 %v1447_v28  ;;  %v1435_v31 = vld [vmem:[%s1636_s18 + $0x30] sm:$0xff]  }
  0x48   : > { %812 = vxpose.xlu0.c.b16.cont [2/8] (narrow) %v1430_v18, 32  ;;  %1335 = vmatprep.mubr.bf16.mxu0 %v1445_v26  ;;  %v1451_v32 = vld [vmem:[%s1653_s8 + $0x28] sm:$0xff]   ;;  %v1442_v33 = vld [vmem:[%s1631_s13 + $0x10] sm:$0xff]   ;;  %v1436_v34 = vld [vmem:[%s1636_s18 + $0x38] sm:$0xff]  }
  0x49   : > { %1352 = vmatpush3.bf16.msra.mxu1 %v1447_v28  ;;  %v1452_v35 = vld [vmem:[%s1653_s8 + $0x20] sm:$0xff]   ;;  %v1443_v36 = vld [vmem:[%s1631_s13 + $0x8] sm:$0xff]   ;;  %v1450_v38 = vld [vmem:[%s1653_s8 + $0x18] sm:$0xff]  }
  0x4a   : > { %1322 = vmatpush3.bf16.msra.mxu0 %v1438_v21  ;;  %1353 = vmatprep.subr.bf16.mxu1 %v1448_v29  ;;  %v1444_v37 = vld [vmem:[%s1631_s13] sm:$0xff]   ;;  %v1449_v39 = vld [vmem:[%s1653_s8 + $0x10] sm:$0xff]   ;;  %v1446_v40 = vld [vmem:[%s1653_s8 + $0x8] sm:$0xff]  }
  0x4b   : > { %1323 = vmatprep.subr.bf16.mxu0 %v1439_v23  ;;  %v491_v43 = vld [vmem:[#allocation2 + $0x10] sm:$0xff]  ;;  %v489_v45 = vld [vmem:[#allocation2] sm:$0xff]  ;;  %v492_v48 = vld [vmem:[#allocation2 + $0x18] sm:$0xff] }
  0x4c   : > { %813 = vxpose.xlu0.c.b16.cont [3/8] (narrow) %v1431_v19, 32  ;;  %v490_v51 = vld [vmem:[#allocation2 + $0x8] sm:$0xff]  ;;  %v495_v54 = vld [vmem:[#allocation2 + $0x30] sm:$0xff]  ;;  %v493_v57 = vld [vmem:[#allocation2 + $0x20] sm:$0xff] }
  0x4d   : > { %1354 = vmatpush3.bf16.msra.mxu1 %v1448_v29  ;;  %v496_v60 = vld [vmem:[#allocation2 + $0x38] sm:$0xff]  ;;  %v494_v63 = vld [vmem:[#allocation2 + $0x28] sm:$0xff]  ;;  %v499_v2 = vld [vmem:[#allocation2 + $0x50] sm:$0xff] }
  0x4e   : > { %1324 = vmatpush3.bf16.msra.mxu0 %v1439_v23  ;;  %1355 = vmatprep.subr.bf16.mxu1 %v1451_v32  ;;  %v497_v5 = vld [vmem:[#allocation2 + $0x40] sm:$0xff]  ;;  %v500_v8 = vld [vmem:[#allocation2 + $0x58] sm:$0xff]  ;;  %v498_v11 = vld [vmem:[#allocation2 + $0x48] sm:$0xff] }
  0x4f   : > { %1325 = vmatprep.subr.bf16.mxu0 %v1440_v25  ;;  %v503_v14 = vld [vmem:[#allocation2 + $0x70] sm:$0xff]  ;;  %v501_v17 = vld [vmem:[#allocation2 + $0x60] sm:$0xff]  ;;  %v504_v20 = vld [vmem:[#allocation2 + $0x78] sm:$0xff] }
  0x50   : > { %814 = vxpose.xlu0.c.b16.cont [4/8] (narrow) %v1432_v22, 32  ;;  %v502_v23 = vld [vmem:[#allocation2 + $0x68] sm:$0xff] }
  0x51   : > { %1356 = vmatpush3.bf16.msra.mxu1 %v1451_v32 }
  0x52   : > { %1326 = vmatpush3.bf16.msra.mxu0 %v1440_v25  ;;  %1357 = vmatprep.subr.bf16.mxu1 %v1452_v35 }
  0x53   : > { %1327 = vmatprep.subr.bf16.mxu0 %v1441_v30 }
  0x54   : > { %815 = vxpose.xlu0.c.b16.cont [5/8] (narrow) %v1433_v24, 32 }
  0x55   : > { %1358 = vmatpush3.bf16.msra.mxu1 %v1452_v35 }
  0x56   : > { %1328 = vmatpush3.bf16.msra.mxu0 %v1441_v30  ;;  %1359 = vmatprep.subr.bf16.mxu1 %v1450_v38 }
  0x57   : > { %1329 = vmatprep.subr.bf16.mxu0 %v1442_v33 }
  0x58   : > { %816 = vxpose.xlu0.c.b16.cont [6/8] (narrow) %v1434_v27, 32 }
  0x59   : > { %1360 = vmatpush3.bf16.msra.mxu1 %v1450_v38 }
  0x5a   : > { %1330 = vmatpush3.bf16.msra.mxu0 %v1442_v33  ;;  %1361 = vmatprep.subr.bf16.mxu1 %v1449_v39 }
  0x5b   : > { %1331 = vmatprep.subr.bf16.mxu0 %v1443_v36 }
  0x5c   : > { %817 = vxpose.xlu0.c.b16.cont [7/8] (narrow) %v1435_v31, 32 }
  0x5d   : > { %1362 = vmatpush3.bf16.msra.mxu1 %v1449_v39 }
  0x5e   : > { %1332 = vmatpush3.bf16.msra.mxu0 %v1443_v36  ;;  %1363 = vmatprep.subr.bf16.mxu1 %v1446_v40 }
  0x5f   : > { %1333 = vmatprep.subr.bf16.mxu0 %v1444_v37 }
  0x60   : > { %818 = vxpose.xlu0.c.b16.end [8/8] (narrow) %v1436_v34, 32 }
  0x61   : > { %1364 = vmatpush3.bf16.msra.mxu1 %v1446_v40 }
  0x62   : > { %1334 = vmatpush3.bf16.msra.mxu0 %v1444_v37  ;;  %1365 = vmatprep.subr.bf16.mxu1 %v1445_v26 }
  0x65   : > { %1336 = vmatmul.mubr.bf16.vlgmr.msra.gmra.mxu0 %v1446_v40  ;;  %1366 = vmatpush3.bf16.msra.mxu1 %v1445_v26 }
  0x66   : > { %1339 = vmatprep.mubr.bf16.mxu0 %v1449_v39 }
  0x6d   : > { %1340 = vmatmul.mubr.bf16.gmra.mxu0 %v1450_v38 }
  0x6e   : > { %1343 = vmatprep.mubr.bf16.mxu0 %v1452_v35 }
  0x75   : > { %1344 = vmatmul.mubr.bf16.gmra.mxu0 %v1451_v32 }
  0x76   : > { %1347 = vmatprep.mubr.bf16.mxu0 %v1448_v29 }
  0x7d   : > { %1348 = vmatmul.mubr.bf16.gmra.mxu0 %v1447_v28 }
  0xa6   : > { %v819_v41 = vpop.trf.xlu0 }
  0xa7   : > { %1367 = vmatprep.mubr.bf16.mxu1 %v819_v41 }
  0xaa   : > { %v820_v42 = vpop.trf.xlu0 }
  0xab   : > { %1368 = vmatmul.mubr.bf16.vlgmr.msra.gmra.mxu1 %v820_v42 }
 0x125   : > { %v1337_v44 = vpop.f32.mrf.mxu0 }
 0x126   : > { %v716_v46 = vadd.f32 %v1337_v44, %v491_v43 }
 0x127   : > { %v651_v47 = vpop.f32.mrf.mxu0 }
 0x128   : > { %733 = vst.msk [vmem:[#allocation2 + $0x10] sm:$0xff] %vm730_vm1, %v716_v46  ;;  %v714_v49 = vadd.f32 %v651_v47, %v489_v45 }
 0x129   : > { %v1338_v50 = vpop.f32.mrf.mxu0 }
 0x12a   : > { %731 = vst.msk [vmem:[#allocation2] sm:$0xff] %vm730_vm1, %v714_v49  ;;  %v717_v52 = vadd.f32 %v1338_v50, %v492_v48 }
 0x12b   : > { %v654_v53 = vpop.f32.mrf.mxu0 }
 0x12c   : > { %734 = vst.msk [vmem:[#allocation2 + $0x18] sm:$0xff] %vm730_vm1, %v717_v52  ;;  %v715_v55 = vadd.f32 %v654_v53, %v490_v51 }
 0x12d   : > { %v1341_v56 = vpop.f32.mrf.mxu0 }
 0x12e   : > { %732 = vst.msk [vmem:[#allocation2 + $0x8] sm:$0xff] %vm730_vm1, %v715_v55  ;;  %v720_v58 = vadd.f32 %v1341_v56, %v495_v54 }
 0x12f   : > { %v667_v59 = vpop.f32.mrf.mxu0 }
 0x130   : > { %737 = vst.msk [vmem:[#allocation2 + $0x30] sm:$0xff] %vm730_vm1, %v720_v58  ;;  %v718_v61 = vadd.f32 %v667_v59, %v493_v57 }
 0x131   : > { %v1342_v62 = vpop.f32.mrf.mxu0 }
 0x132   : > { %735 = vst.msk [vmem:[#allocation2 + $0x20] sm:$0xff] %vm730_vm1, %v718_v61  ;;  %v721_v0 = vadd.f32 %v1342_v62, %v496_v60 }
 0x133   : > { %v670_v1 = vpop.f32.mrf.mxu0 }
 0x134   : > { %738 = vst.msk [vmem:[#allocation2 + $0x38] sm:$0xff] %vm730_vm1, %v721_v0  ;;  %v719_v3 = vadd.f32 %v670_v1, %v494_v63 }
 0x135   : > { %v1345_v4 = vpop.f32.mrf.mxu0 }
 0x136   : > { %736 = vst.msk [vmem:[#allocation2 + $0x28] sm:$0xff] %vm730_vm1, %v719_v3  ;;  %v724_v6 = vadd.f32 %v1345_v4, %v499_v2 }
 0x137   : > { %v683_v7 = vpop.f32.mrf.mxu0 }
 0x138   : > { %741 = vst.msk [vmem:[#allocation2 + $0x50] sm:$0xff] %vm730_vm1, %v724_v6  ;;  %v722_v9 = vadd.f32 %v683_v7, %v497_v5 }
 0x139   : > { %v1346_v10 = vpop.f32.mrf.mxu0 }
 0x13a   : > { %739 = vst.msk [vmem:[#allocation2 + $0x40] sm:$0xff] %vm730_vm1, %v722_v9  ;;  %v725_v12 = vadd.f32 %v1346_v10, %v500_v8 }
 0x13b   : > { %v686_v13 = vpop.f32.mrf.mxu0 }
 0x13c   : > { %742 = vst.msk [vmem:[#allocation2 + $0x58] sm:$0xff] %vm730_vm1, %v725_v12  ;;  %v723_v15 = vadd.f32 %v686_v13, %v498_v11 }
 0x13d   : > { %v1349_v16 = vpop.f32.mrf.mxu0 }
 0x13e   : > { %740 = vst.msk [vmem:[#allocation2 + $0x48] sm:$0xff] %vm730_vm1, %v723_v15  ;;  %v728_v18 = vadd.f32 %v1349_v16, %v503_v14 }
 0x13f   : > { %v699_v19 = vpop.f32.mrf.mxu0 }
 0x140   : > { %745 = vst.msk [vmem:[#allocation2 + $0x70] sm:$0xff] %vm730_vm1, %v728_v18  ;;  %v726_v21 = vadd.f32 %v699_v19, %v501_v17 }
 0x141   : > { %v1350_v22 = vpop.f32.mrf.mxu0 }
 0x142   : > { %743 = vst.msk [vmem:[#allocation2 + $0x60] sm:$0xff] %vm730_vm1, %v726_v21  ;;  %v729_v24 = vadd.f32 %v1350_v22, %v504_v20 }
 0x143   : > { %v702_v25 = vpop.f32.mrf.mxu0 }
 0x144   : > { %746 = vst.msk [vmem:[#allocation2 + $0x78] sm:$0xff] %vm730_vm1, %v729_v24  ;;  %v727_v26 = vadd.f32 %v702_v25, %v502_v23 }
 0x146   : > { %744 = vst.msk [vmem:[#allocation2 + $0x68] sm:$0xff] %vm730_vm1, %v727_v26 }
 0x16b   : > { %v1369_v27 = vpop.f32.mrf.mxu1 }
 0x16d   : > { %v861_v28 = vpop.f32.mrf.mxu1  ;;  %879 = sbr.rel (%p1254_p13) target bundleno = 372 (0x174), region = 85 }
 0x16f   : > { %v1370_v29 = vpop.f32.mrf.mxu1 }
 0x171   : > { %v864_v30 = vpop.f32.mrf.mxu1 }
 0x172   : > { %882 = vst [vmem:[%s881_s14] sm:$0xff] %v861_v28  ;;  %883 = vst [vmem:[%s881_s14 + $0x8] sm:$0xff] %v864_v30 }
 0x173   : > { %884 = vst [vmem:[%s881_s14 + $0x10] sm:$0xff] %v1369_v27  ;;  %885 = vst [vmem:[%s881_s14 + $0x18] sm:$0xff] %v1370_v29 }
 0x174 PF: > { %p1256_p0 = scmp.le.s32.totalorder %s1495_s24, 0 }
 0x175   : > { %s1257_s15 = sshll.u32 (!%p1256_p0), %s1491_s23, 5 }
 0x176   : > { %889 = sbr.rel (%p1256_p0) target bundleno = 384 (0x180), region = 89  ;;  %s891_s18 = scalar_lea.vmem (!%p1256_p0), %s1830_s6, %s1257_s15 }
 0x17b   : > { %v892_v31 = vld [vmem:[%s891_s18] sm:$0xff]  ;;  %v893_v32 = vld [vmem:[%s891_s18 + $0x8] sm:$0xff]  ;;  %v894_v33 = vld [vmem:[%s891_s18 + $0x10] sm:$0xff] }
 0x17c   : > { %v896_v34 = vadd.f32 %v892_v31, %v861_v28  ;;  %v897_v35 = vadd.f32 %v893_v32, %v864_v30  ;;  %v898_v36 = vadd.f32 %v1369_v27, %v894_v33  ;;  %v895_v37 = vld [vmem:[%s891_s18 + $0x18] sm:$0xff] }
 0x17d   : > { %v899_v38 = vadd.f32 %v1370_v29, %v895_v37 }
 0x17e   : > { %900 = vst [vmem:[%s891_s18] sm:$0xff] %v896_v34  ;;  %901 = vst [vmem:[%s891_s18 + $0x8] sm:$0xff] %v897_v35 }
 0x17f   : > { %902 = vst [vmem:[%s891_s18 + $0x10] sm:$0xff] %v898_v36  ;;  %903 = vst [vmem:[%s891_s18 + $0x18] sm:$0xff] %v899_v38 }
 0x180 PF: > { %p1258_p1 = scmp.ne.s32.totalorder %s1491_s23, 4 }
 0x182   : > { %907 = sbr.rel (%p1258_p1) target bundleno = 410 (0x19a), region = 93 }
 0x187   : > { %v908_v39 = vld [vmem:[#allocation2] sm:$0xff]  ;;  %vm988_vm2 = vcmask 257024   ;;  %v909_v40 = vld [vmem:[#allocation2 + $0x8] sm:$0xff]  ;;  %v910_v41 = vld [vmem:[#allocation2 + $0x10] sm:$0xff] }
 0x188   : > { %v1277_v42 = vpack.c.bf16 %v908_v39, %v908_v39  ;;  %v1278_v43 = vpack.c.bf16 %v909_v40, %v909_v40  ;;  %v1279_v44 = vpack.c.bf16 %v910_v41, %v910_v41  ;;  %v911_v45 = vld [vmem:[#allocation2 + $0x18] sm:$0xff]  ;;  %v912_v46 = vld [vmem:[#allocation2 + $0x20] sm:$0xff]  ;;  %v913_v47 = vld [vmem:[#allocation2 + $0x28] sm:$0xff] }
 0x189   : > { %v1280_v48 = vpack.c.bf16 %v911_v45, %v911_v45  ;;  %v1281_v49 = vpack.c.bf16 %v912_v46, %v912_v46  ;;  %v1282_v50 = vpack.c.bf16 %v913_v47, %v913_v47  ;;  %v914_v51 = vld [vmem:[#allocation2 + $0x30] sm:$0xff]  ;;  %v915_v52 = vld [vmem:[#allocation2 + $0x38] sm:$0xff]  ;;  %v916_v53 = vld [vmem:[#allocation2 + $0x40] sm:$0xff] }
 0x18a   : > { %989 = vst.msk [vmem:[%s1646_s29] sm:$0xf] %vm988_vm2, %v1277_v42  ;;  %990 = vst.msk [vmem:[%s1646_s29 + $0x4] sm:$0xf] %vm988_vm2, %v1278_v43  ;;  %v1283_v54 = vpack.c.bf16 %v914_v51, %v914_v51  ;;  %v1284_v55 = vpack.c.bf16 %v915_v52, %v915_v52  ;;  %v1285_v56 = vpack.c.bf16 %v916_v53, %v916_v53  ;;  %v917_v57 = vld [vmem:[#allocation2 + $0x48] sm:$0xff]  ;;  %v918_v58 = vld [vmem:[#allocation2 + $0x50] sm:$0xff] }
 0x18b   : > { %991 = vst.msk [vmem:[%s1646_s29 + $0x8] sm:$0xf] %vm988_vm2, %v1279_v44  ;;  %v919_v59 = vld [vmem:[#allocation2 + $0x58] sm:$0xff]  ;;  %992 = vst.msk [vmem:[%s1646_s29 + $0xc] sm:$0xf] %vm988_vm2, %v1280_v48  ;;  %v1286_v60 = vpack.c.bf16 %v917_v57, %v917_v57  ;;  %v1287_v61 = vpack.c.bf16 %v918_v58, %v918_v58  ;;  %v920_v63 = vld [vmem:[#allocation2 + $0x60] sm:$0xff] }
 0x18c   : > { %993 = vst.msk [vmem:[%s1646_s29 + $0x10] sm:$0xf] %vm988_vm2, %v1281_v49  ;;  %994 = vst.msk [vmem:[%s1646_s29 + $0x14] sm:$0xf] %vm988_vm2, %v1282_v50  ;;  %v1288_v62 = vpack.c.bf16 %v919_v59, %v919_v59  ;;  %v921_v0 = vld [vmem:[#allocation2 + $0x68] sm:$0xff]  ;;  %v922_v1 = vld [vmem:[#allocation2 + $0x70] sm:$0xff]  ;;  %v1289_v2 = vpack.c.bf16 %v920_v63, %v920_v63 }
 0x18d   : > { %995 = vst.msk [vmem:[%s1646_s29 + $0x18] sm:$0xf] %vm988_vm2, %v1283_v54  ;;  %996 = vst.msk [vmem:[%s1646_s29 + $0x1c] sm:$0xf] %vm988_vm2, %v1284_v55  ;;  %v1290_v3 = vpack.c.bf16 %v921_v0, %v921_v0  ;;  %v1291_v4 = vpack.c.bf16 %v922_v1, %v922_v1  ;;  %v923_v5 = vld [vmem:[#allocation2 + $0x78] sm:$0xff]  ;;  %v1005_v6 = vld [vmem:[%s1641_s20] sm:$0xff] }
 0x18e   : > { %997 = vst.msk [vmem:[%s1646_s29 + $0x20] sm:$0xf] %vm988_vm2, %v1285_v56  ;;  %v1006_v7 = vld [vmem:[%s1641_s20 + $0x8] sm:$0xff]  ;;  %998 = vst.msk [vmem:[%s1646_s29 + $0x24] sm:$0xf] %vm988_vm2, %v1286_v60  ;;  %v1292_v8 = vpack.c.bf16 %v923_v5, %v923_v5  ;;  %v1021_v9 = vadd.f32 %v1005_v6, %v908_v39  ;;  %v1007_v11 = vld [vmem:[%s1641_s20 + $0x10] sm:$0xff] }
 0x18f   : > { %999 = vst.msk [vmem:[%s1646_s29 + $0x28] sm:$0xf] %vm988_vm2, %v1287_v61  ;;  %1000 = vst.msk [vmem:[%s1646_s29 + $0x2c] sm:$0xf] %vm988_vm2, %v1288_v62  ;;  %v1022_v10 = vadd.f32 %v1006_v7, %v909_v40  ;;  %v1008_v12 = vld [vmem:[%s1641_s20 + $0x18] sm:$0xff]  ;;  %v1009_v13 = vld [vmem:[%s1641_s20 + $0x20] sm:$0xff]  ;;  %v1023_v14 = vadd.f32 %v1007_v11, %v910_v41 }
 0x190   : > { %1001 = vst.msk [vmem:[%s1646_s29 + $0x30] sm:$0xf] %vm988_vm2, %v1289_v2  ;;  %1002 = vst.msk [vmem:[%s1646_s29 + $0x34] sm:$0xf] %vm988_vm2, %v1290_v3  ;;  %v1024_v15 = vadd.f32 %v1008_v12, %v911_v45  ;;  %v1025_v16 = vadd.f32 %v1009_v13, %v912_v46  ;;  %v1010_v17 = vld [vmem:[%s1641_s20 + $0x28] sm:$0xff]  ;;  %v1011_v18 = vld [vmem:[%s1641_s20 + $0x30] sm:$0xff] }
 0x191   : > { %1003 = vst.msk [vmem:[%s1646_s29 + $0x38] sm:$0xf] %vm988_vm2, %v1291_v4  ;;  %v1012_v19 = vld [vmem:[%s1641_s20 + $0x38] sm:$0xff]  ;;  %1004 = vst.msk [vmem:[%s1646_s29 + $0x3c] sm:$0xf] %vm988_vm2, %v1292_v8  ;;  %v1026_v20 = vadd.f32 %v1010_v17, %v913_v47  ;;  %v1027_v21 = vadd.f32 %v1011_v18, %v914_v51  ;;  %v1013_v23 = vld [vmem:[%s1641_s20 + $0x40] sm:$0xff] }
 0x192   : > { %1037 = vst.msk [vmem:[%s1651_s12] sm:$0xff] %vm730_vm1, %v1021_v9  ;;  %1038 = vst.msk [vmem:[%s1651_s12 + $0x8] sm:$0xff] %vm730_vm1, %v1022_v10  ;;  %v1028_v22 = vadd.f32 %v1012_v19, %v915_v52  ;;  %v1014_v24 = vld [vmem:[%s1641_s20 + $0x48] sm:$0xff]  ;;  %v1015_v25 = vld [vmem:[%s1641_s20 + $0x50] sm:$0xff]  ;;  %v1029_v26 = vadd.f32 %v1013_v23, %v916_v53 }
 0x193   : > { %1039 = vst.msk [vmem:[%s1651_s12 + $0x10] sm:$0xff] %vm730_vm1, %v1023_v14  ;;  %1040 = vst.msk [vmem:[%s1651_s12 + $0x18] sm:$0xff] %vm730_vm1, %v1024_v15  ;;  %v1030_v27 = vadd.f32 %v1014_v24, %v917_v57  ;;  %v1031_v28 = vadd.f32 %v1015_v25, %v918_v58  ;;  %v1016_v29 = vld [vmem:[%s1641_s20 + $0x58] sm:$0xff]  ;;  %v1017_v30 = vld [vmem:[%s1641_s20 + $0x60] sm:$0xff] }
 0x194   : > { %1041 = vst.msk [vmem:[%s1651_s12 + $0x20] sm:$0xff] %vm730_vm1, %v1025_v16  ;;  %v1018_v31 = vld [vmem:[%s1641_s20 + $0x68] sm:$0xff]  ;;  %1042 = vst.msk [vmem:[%s1651_s12 + $0x28] sm:$0xff] %vm730_vm1, %v1026_v20  ;;  %v1032_v32 = vadd.f32 %v1016_v29, %v919_v59  ;;  %v1033_v33 = vadd.f32 %v1017_v30, %v920_v63  ;;  %v1019_v35 = vld [vmem:[%s1641_s20 + $0x70] sm:$0xff] }
 0x195   : > { %1043 = vst.msk [vmem:[%s1651_s12 + $0x30] sm:$0xff] %vm730_vm1, %v1027_v21  ;;  %1044 = vst.msk [vmem:[%s1651_s12 + $0x38] sm:$0xff] %vm730_vm1, %v1028_v22  ;;  %v1034_v34 = vadd.f32 %v1018_v31, %v921_v0  ;;  %v1020_v36 = vld [vmem:[%s1641_s20 + $0x78] sm:$0xff]  ;;  %v1035_v37 = vadd.f32 %v1019_v35, %v922_v1 }
 0x196   : > { %1045 = vst.msk [vmem:[%s1651_s12 + $0x40] sm:$0xff] %vm730_vm1, %v1029_v26  ;;  %1046 = vst.msk [vmem:[%s1651_s12 + $0x48] sm:$0xff] %vm730_vm1, %v1030_v27  ;;  %v1036_v38 = vadd.f32 %v1020_v36, %v923_v5 }
 0x197   : > { %1047 = vst.msk [vmem:[%s1651_s12 + $0x50] sm:$0xff] %vm730_vm1, %v1031_v28  ;;  %1048 = vst.msk [vmem:[%s1651_s12 + $0x58] sm:$0xff] %vm730_vm1, %v1032_v32 }
 0x198   : > { %1049 = vst.msk [vmem:[%s1651_s12 + $0x60] sm:$0xff] %vm730_vm1, %v1033_v33  ;;  %1050 = vst.msk [vmem:[%s1651_s12 + $0x68] sm:$0xff] %vm730_vm1, %v1034_v34 }
 0x199   : > { %1051 = vst.msk [vmem:[%s1651_s12 + $0x70] sm:$0xff] %vm730_vm1, %v1035_v37  ;;  %1052 = vst.msk [vmem:[%s1651_s12 + $0x78] sm:$0xff] %vm730_vm1, %v1036_v38 }
 0x19a PF: > { %s17_s27 = sadd.s32 1, %s1507_s27   ;;  %s1835_s29 = sld [smem:[#allocation4_spill]] }
 0x19b   : > { %p14_p2 = scmp.ge.s32.totalorder %s17_s27, 17   ;;  %s1836_s21 = smov %s1487_s22 }
 0x19c   : > { %s1837_s22 = smov %s1596_s10  ;;  %s1838_s23 = smov %s1499_s25 }
 0x19d   : > { %s1839_s24 = smov %s1503_s26  ;;  %s1840_s25 = smov %s1843_s28 }
 0x19e   :  { %16 = sbr.rel (!%p14_p2) target bundleno = 6 (0x6), region = 159 }
 0x1a0   : > { %s1841_s26 = smov %s1835_s29 }

// kernel: lightgcl_forward.5
= control target key start
LH: loop header
LB: loop body
LE: loop exit
PB: predicated region body
PF: predicated region fallthrough
CT: control target
= control target key end

     0   :  { %s2020_s0 = inlined_call_operand.vmem [shape: bf16[384,640], index: 0, kind: input, shape index: {}]   ;;  %s2021_s1 = inlined_call_operand.vmem [shape: bf16[640,32], index: 1, kind: input, shape index: {}]   ;;  %s2022_s2 = inlined_call_operand.vmem [shape: bf16[384,32], index: 2, kind: input, shape index: {}]   ;;  %s2023_s3 = inlined_call_operand.vmem [shape: f32[384,32], index: 3, kind: input, shape index: {}]   ;;  %s2024_s4 = inlined_call_operand.hbm [shape: bf16[384,32], index: 4, kind: output, shape index: {0}]   ;;  %s2025_s5 = inlined_call_operand.vmem [shape: f32[384,32], index: 5, kind: output, shape index: {1}]   ;;  %s2026_s6 = inlined_call_operand.vmem [shape: f32[5,32,128], index: 6, kind: output, shape index: {2}]  }
   0x1   :  { %2034 = sst [smem:[#allocation15_spill]] %s2020_s0 }
   0x2   :  { %12 = vsyncpa [#allocation5], 0 }
   0x3   :  { %14 = vsyncpa [#allocation5 + $0x1], 0  ;;  %s1655_s21 = smov 0   ;;  %s1657_s22 = smov 0  }
   0x4   :  { %s1659_s23 = smov 0   ;;  %s1661_s24 = smov 0  }
   0x5   :  { %s1663_s25 = smov 0   ;;  %s1665_s26 = smov 0  }
   0x6   :  { %s1667_s27 = smov 0   ;;  %s1669_s28 = smov 0  }
   0x7   :  { %s1671_s29 = smov 0   ;;  %s1673_s30 = smov 0  }
   0x8 LB: > { %2035 = sst [smem:[#allocation7_spill]] %s1586_s23  ;;  %s1226_s7 = sadd.s32 4294967295, %s1614_s30   ;;  %s1614_s30 = sphi %s1673_s30, %s20_s30   ;;  %s1610_s29 = sphi %s1671_s29, %s2055_s29   ;;  %s1606_s28 = sphi %s1669_s28, %s2054_s28   ;;  %s1602_s27 = sphi %s1667_s27, %s2053_s27   ;;  %s1598_s26 = sphi %s1665_s26, %s2058_s26   ;;  %s1594_s25 = sphi %s1663_s25, %s2051_s25   ;;  %s1590_s24 = sphi %s1661_s24, %s2050_s24   ;;  %s1586_s23 = sphi %s1659_s23, %s2049_s23   ;;  %s1582_s22 = sphi %s1657_s22, %s2057_s22   ;;  %s1578_s21 = sphi %s1655_s21, %s2056_s21  }
   0x9   : > { %2036 = sst [smem:[#allocation8_spill]] %s1594_s25  ;;  %s1227_s8 = sadd.s32 4294967294, %s1614_s30  }
   0xa   : > { %2037 = sst [smem:[#allocation9_spill]] %s1606_s28  ;;  %s29_s9 = sadd.s32 1, %s1606_s28 }
   0xb   : > { %2038 = sst [smem:[#allocation10_spill]] %s1610_s29  ;;  %s32_s10 = sadd.s32 1, %s1610_s29 }
   0xc   : > { %p30_p0 = scmp.ge.s32.totalorder %s29_s9, 5  ;;  %s41_s11 = sadd.s32 1, %s1594_s25 }
   0xd   : > { %p48_p1 = scmp.ne.s32.totalorder %s1594_s25, %s1590_s24  ;;  %p49_p2 = scmp.eq.s32.totalorder %s1614_s30, 0 }
   0xe   : > { %s2060_s9 = smov (%p30_p0, %s29_s9), 0  ;;  %s2062_s10 = smov (!%p30_p0, %s32_s10), %s1610_s29 }
   0xf   : > { %2039 = sst [smem:[#allocation11_spill]] %s2060_s9  ;;  %s37_s12 = ssub.s32 %s1606_s28, %s2060_s9 }
  0x10   : > { %p1718_p3 = por %p49_p2, %p48_p1  ;;  %p34_p4 = scmp.ge.s32.totalorder %s2062_s10, 3 }
  0x11   : > { %s145_s14 = sadd.s32 1, %s1586_s23  ;;  %p155_p5 = scmp.ne.s32.totalorder %s1586_s23, %s1582_s22 }
  0x12   : > { %p156_p6 = scmp.eq.s32.totalorder %s1226_s7, 14  ;;  %s2064_s10 = smov (%p34_p4, %s2062_s10), 0 }
  0x13   : > { %2041 = sst [smem:[#allocation12_spill]] %s2064_s10  ;;  %p161_p8 = scmp.ne.s32.totalorder %s1582_s22, %s1578_s21 }
  0x14   : > { %p1727_p7 = por %p156_p6, %p155_p5  ;;  %s36_s16 = ssub.s32 %s1610_s29, %s2064_s10 }
  0x15   : > { %p162_p9 = scmp.eq.s32.totalorder %s1227_s8, 14  ;;  %s38_s17 = sor.u32 %s37_s12, %s36_s16 }
  0x16   : > { %p143_p10 = scmp.eq.s32.totalorder %s36_s16, 0  ;;  %p39_p11 = scmp.eq.s32.totalorder %s38_s17, 0 }
  0x17   : > { %p1735_p12 = por %p162_p9, %p161_p8  ;;  %p1229_p13 = scmp.ge.s32.totalorder %s1614_s30, 15 }
  0x18   : > { %s1740_s19 = scalar_select %p143_p10, %s1586_s23, %s145_s14  }
  0x19   : > { %s1743_s20 = scalar_select %p39_p11, %s1594_s25, %s41_s11  }
  0x1a   : > { %2044 = sst [smem:[#allocation13_spill]] %s1740_s19  ;;  %225 = sbr.rel (%p1229_p13) target bundleno = 51 (0x33), region = 16 }
  0x1b   : > { %2045 = sst [smem:[#allocation14_spill]] %s1743_s20 }
  0x1f   : > { %228 = sbr.rel (!%p1718_p3) target bundleno = 51 (0x33), region = 20  ;;  %s230_s7 = sand.u32 (%p1718_p3), 1, %s1594_s25  }
  0x20   : > { %s1391_s8 = smul.u32 (%p1718_p3), 80, %s1610_s29  ;;  %s1230_s12 = sshll.u32 (%p1718_p3), %s230_s7, 6 }
  0x21   : > { %s2046_s0 = sld [smem:[#allocation15_spill]] (%p1718_p3)  ;;  %s232_s11 = scalar_lea.vmem (%p1718_p3), [#allocation3], %s1230_s12 }
  0x22   : > { %s235_s16 = sadd.s32 (%p1718_p3), %s1606_s28, %s1391_s8 }
  0x23   : > { %s1233_s17 = sshll.u32 (%p1718_p3), %s235_s16, 2 }
  0x27   : > { %s1754_s14 = scalar_lea.vmem %s2046_s0, %s1233_s17 }
  0x28   : > { %v254_v0 = vld [vmem:[%s1754_s14] sm:$0xf]  ;;  %v256_v1 = vld [vmem:[%s1754_s14 + $0x14] sm:$0xf]  ;;  %v258_v2 = vld [vmem:[%s1754_s14 + $0x28] sm:$0xf] }
  0x29   : > { %255 = vst [vmem:[%s232_s11] sm:$0xf] %v254_v0  ;;  %257 = vst [vmem:[%s232_s11 + $0x4] sm:$0xf] %v256_v1  ;;  %v260_v3 = vld [vmem:[%s1754_s14 + $0x3c] sm:$0xf] }
  0x2a   : > { %259 = vst [vmem:[%s232_s11 + $0x8] sm:$0xf] %v258_v2  ;;  %v262_v4 = vld [vmem:[%s1754_s14 + $0x50] sm:$0xf]  ;;  %v264_v5 = vld [vmem:[%s1754_s14 + $0x64] sm:$0xf] }
  0x2b   : > { %261 = vst [vmem:[%s232_s11 + $0xc] sm:$0xf] %v260_v3  ;;  %263 = vst [vmem:[%s232_s11 + $0x10] sm:$0xf] %v262_v4  ;;  %v266_v6 = vld [vmem:[%s1754_s14 + $0x78] sm:$0xf] }
  0x2c   : > { %265 = vst [vmem:[%s232_s11 + $0x14] sm:$0xf] %v264_v5  ;;  %v268_v7 = vld [vmem:[%s1754_s14 + $0x8c] sm:$0xf]  ;;  %v270_v8 = vld [vmem:[%s1754_s14 + $0xa0] sm:$0xf] }
  0x2d   : > { %267 = vst [vmem:[%s232_s11 + $0x18] sm:$0xf] %v266_v6  ;;  %269 = vst [vmem:[%s232_s11 + $0x1c] sm:$0xf] %v268_v7  ;;  %v272_v9 = vld [vmem:[%s1754_s14 + $0xb4] sm:$0xf] }
  0x2e   : > { %271 = vst [vmem:[%s232_s11 + $0x20] sm:$0xf] %v270_v8  ;;  %v274_v10 = vld [vmem:[%s1754_s14 + $0xc8] sm:$0xf]  ;;  %v276_v11 = vld [vmem:[%s1754_s14 + $0xdc] sm:$0xf] }
  0x2f   : > { %273 = vst [vmem:[%s232_s11 + $0x24] sm:$0xf] %v272_v9  ;;  %275 = vst [vmem:[%s232_s11 + $0x28] sm:$0xf] %v274_v10  ;;  %v278_v12 = vld [vmem:[%s1754_s14 + $0xf0] sm:$0xf] }
  0x30   : > { %277 = vst [vmem:[%s232_s11 + $0x2c] sm:$0xf] %v276_v11  ;;  %v280_v13 = vld [vmem:[%s1754_s14 + $0x104] sm:$0xf]  ;;  %v282_v14 = vld [vmem:[%s1754_s14 + $0x118] sm:$0xf] }
  0x31   : > { %279 = vst [vmem:[%s232_s11 + $0x30] sm:$0xf] %v278_v12  ;;  %281 = vst [vmem:[%s232_s11 + $0x34] sm:$0xf] %v280_v13  ;;  %v284_v15 = vld [vmem:[%s1754_s14 + $0x12c] sm:$0xf] }
  0x32   : > { %283 = vst [vmem:[%s232_s11 + $0x38] sm:$0xf] %v282_v14  ;;  %285 = vst [vmem:[%s232_s11 + $0x3c] sm:$0xf] %v284_v15 }
  0x33 PF: > { %p1234_p0 = scmp.ge.s32.totalorder %s1614_s30, 1  ;;  %p367_p1 = scmp.lt.s32.totalorder %s1614_s30, 16 }
  0x35   : > { %p368_p2 = pnand %p1234_p0, %p367_p1 }
  0x36   : > { %s374_s9 = sand.u32 (!%p368_p2), 1, %s1590_s24   ;;  %s2031_s10 = sand.u32 (!%p368_p2), 1, %s1582_s22  }
  0x37   : > { %371 = sbr.rel (%p368_p2) target bundleno = 447 (0x1bf), region = 73  ;;  %s1235_s13 = sshll.u32 (!%p368_p2), %s374_s9, 6 }
  0x38   : > { %s1236_s7 = sshll.u32 (!%p368_p2), %s2031_s10, 6  ;;  %s1237_s8 = sshll.u32 (!%p368_p2), %s1598_s26, 4 }
  0x39   : > { %s1239_s12 = sshll.u32 (!%p368_p2), %s1602_s27, 4  ;;  %p425_p3 = scmp.lt.s32.totalorder (!%p368_p2), %s1237_s8, 79 }
  0x3a   : > { %p431_p4 = scmp.lt.s32.totalorder (!%p368_p2), %s1239_s12, 47  ;;  %s1800_s17 = scalar_lea.vmem (!%p368_p2), [#allocation3], %s1235_s13 }
  0x3b   : > { %p1245_p5 = scmp.ne.s32.totalorder (!%p368_p2), %s1598_s26, 0 }
  0x3c   : > { %s2066_s8 = smov (!%p425_p3, %s1237_s8), 79  ;;  %s2068_s12 = smov (!%p431_p4, %s1239_s12), 47 }
  0x3d   : > { %s1238_s16 = sshll.u32 %s2066_s8, 2  ;;  %s1240_s0 = sshll.u32 %s2068_s12, 2 }
  0x3e   : > { %s1783_s11 = scalar_lea.vmem %s2021_s1, %s1238_s16  ;;  %s1788_s24 = scalar_lea.vmem %s2022_s2, %s1240_s0 }
  0x3f   : > { %s1242_s9 = sshll.u32 %s2068_s12, 3  ;;  %s1802_s16 = scalar_lea.vmem [#allocation4], %s1236_s7 }
  0x40   : > { %s1793_s25 = scalar_lea.vmem %s2023_s3, %s1242_s9  ;;  %s1798_s8 = scalar_lea.vmem %s2025_s5, %s1242_s9 }
  0x41   : > { %453 = sbr.rel (%p1245_p5) target bundleno = 79 (0x4f), region = 81 }
  0x46   : > { %vm454_vm0 = vcmask 261120   ;;  %v1616_v16 = vmov 0.0  }
  0x47   : > { %455 = vst.msk [vmem:[#allocation2] sm:$0xff] %vm454_vm0, %v1616_v16  ;;  %456 = vst.msk [vmem:[#allocation2 + $0x8] sm:$0xff] %vm454_vm0, %v1616_v16 }
  0x48   : > { %457 = vst.msk [vmem:[#allocation2 + $0x10] sm:$0xff] %vm454_vm0, %v1616_v16  ;;  %458 = vst.msk [vmem:[#allocation2 + $0x18] sm:$0xff] %vm454_vm0, %v1616_v16 }
  0x49   : > { %459 = vst.msk [vmem:[#allocation2 + $0x20] sm:$0xff] %vm454_vm0, %v1616_v16  ;;  %460 = vst.msk [vmem:[#allocation2 + $0x28] sm:$0xff] %vm454_vm0, %v1616_v16 }
  0x4a   : > { %461 = vst.msk [vmem:[#allocation2 + $0x30] sm:$0xff] %vm454_vm0, %v1616_v16  ;;  %462 = vst.msk [vmem:[#allocation2 + $0x38] sm:$0xff] %vm454_vm0, %v1616_v16 }
  0x4b   : > { %463 = vst.msk [vmem:[#allocation2 + $0x40] sm:$0xff] %vm454_vm0, %v1616_v16  ;;  %464 = vst.msk [vmem:[#allocation2 + $0x48] sm:$0xff] %vm454_vm0, %v1616_v16 }
  0x4c   : > { %465 = vst.msk [vmem:[#allocation2 + $0x50] sm:$0xff] %vm454_vm0, %v1616_v16  ;;  %466 = vst.msk [vmem:[#allocation2 + $0x58] sm:$0xff] %vm454_vm0, %v1616_v16 }
  0x4d   : > { %467 = vst.msk [vmem:[#allocation2 + $0x60] sm:$0xff] %vm454_vm0, %v1616_v16  ;;  %468 = vst.msk [vmem:[#allocation2 + $0x68] sm:$0xff] %vm454_vm0, %v1616_v16 }
  0x4e   : > { %469 = vst.msk [vmem:[#allocation2 + $0x70] sm:$0xff] %vm454_vm0, %v1616_v16  ;;  %470 = vst.msk [vmem:[#allocation2 + $0x78] sm:$0xff] %vm454_vm0, %v1616_v16 }
  0x4f PF: > { %v1482_v17 = vld [vmem:[%s1788_s24] sm:$0xff]   ;;  %v1483_v18 = vld [vmem:[%s1788_s24 + $0x8] sm:$0xff]   ;;  %v1484_v19 = vld [vmem:[%s1788_s24 + $0x10] sm:$0xff]   ;;  %vm728_vm1 = vcmask 261120   ;;  %p1270_p6 = scmp.ne.s32.totalorder %s1602_s27, 0 }
  0x50   : > { %809 = vxpose.xlu0.c.b16.start [1/8] (narrow) %v1482_v17, 32  ;;  %v1490_v20 = vld [vmem:[%s1783_s11 + $0x38] sm:$0xff]   ;;  %v1491_v21 = vld [vmem:[%s1783_s11 + $0x30] sm:$0xff]   ;;  %v1492_v23 = vld [vmem:[%s1783_s11 + $0x28] sm:$0xff]   ;;  %s1271_s0 = sshll.u32 (!%p1270_p6), %s1598_s26, 5 }
  0x51   : > { %v1485_v22 = vld [vmem:[%s1788_s24 + $0x18] sm:$0xff]   ;;  %1339 = vmatprep.subr.bf16.mxu0 %v1490_v20  ;;  %v1486_v24 = vld [vmem:[%s1788_s24 + $0x20] sm:$0xff]   ;;  %v1487_v27 = vld [vmem:[%s1788_s24 + $0x28] sm:$0xff]   ;;  %s879_s29 = scalar_lea.vmem (!%p1270_p6), %s2026_s6, %s1271_s0 }
  0x52   : > { %1340 = vmatpush3.bf16.msra.mxu0 %v1490_v20  ;;  %v1493_v25 = vld [vmem:[%s1783_s11 + $0x20] sm:$0xff]   ;;  %v1500_v28 = vld [vmem:[%s1800_s17 + $0x38] sm:$0xff]   ;;  %v1501_v29 = vld [vmem:[%s1800_s17 + $0x30] sm:$0xff]  }
  0x53   : > { %1341 = vmatprep.subr.bf16.mxu0 %v1491_v21  ;;  %v1498_v26 = vld [vmem:[%s1800_s17] sm:$0xff]   ;;  %v1494_v30 = vld [vmem:[%s1783_s11 + $0x18] sm:$0xff]   ;;  %1371 = vmatprep.subr.bf16.mxu1 %v1500_v28  ;;  %v1488_v31 = vld [vmem:[%s1788_s24 + $0x30] sm:$0xff]  }
  0x54   : > { %810 = vxpose.xlu0.c.b16.cont [2/8] (narrow) %v1483_v18, 32  ;;  %1355 = vmatprep.mubr.bf16.mxu0 %v1498_v26  ;;  %v1504_v32 = vld [vmem:[%s1800_s17 + $0x28] sm:$0xff]   ;;  %v1495_v33 = vld [vmem:[%s1783_s11 + $0x10] sm:$0xff]   ;;  %v1489_v34 = vld [vmem:[%s1788_s24 + $0x38] sm:$0xff]  }
  0x55   : > { %1372 = vmatpush3.bf16.msra.mxu1 %v1500_v28  ;;  %v1505_v35 = vld [vmem:[%s1800_s17 + $0x20] sm:$0xff]   ;;  %v1496_v36 = vld [vmem:[%s1783_s11 + $0x8] sm:$0xff]   ;;  %v1503_v38 = vld [vmem:[%s1800_s17 + $0x18] sm:$0xff]  }
  0x56   : > { %1342 = vmatpush3.bf16.msra.mxu0 %v1491_v21  ;;  %1373 = vmatprep.subr.bf16.mxu1 %v1501_v29  ;;  %v1497_v37 = vld [vmem:[%s1783_s11] sm:$0xff]   ;;  %v1502_v39 = vld [vmem:[%s1800_s17 + $0x10] sm:$0xff]   ;;  %v1499_v40 = vld [vmem:[%s1800_s17 + $0x8] sm:$0xff]  }
  0x57   : > { %1343 = vmatprep.subr.bf16.mxu0 %v1492_v23  ;;  %v489_v43 = vld [vmem:[#allocation2 + $0x10] sm:$0xff]  ;;  %v487_v45 = vld [vmem:[#allocation2] sm:$0xff]  ;;  %v490_v48 = vld [vmem:[#allocation2 + $0x18] sm:$0xff] }
  0x58   : > { %811 = vxpose.xlu0.c.b16.cont [3/8] (narrow) %v1484_v19, 32  ;;  %v488_v51 = vld [vmem:[#allocation2 + $0x8] sm:$0xff]  ;;  %v493_v54 = vld [vmem:[#allocation2 + $0x30] sm:$0xff]  ;;  %v491_v57 = vld [vmem:[#allocation2 + $0x20] sm:$0xff] }
  0x59   : > { %1374 = vmatpush3.bf16.msra.mxu1 %v1501_v29  ;;  %v494_v60 = vld [vmem:[#allocation2 + $0x38] sm:$0xff]  ;;  %v492_v63 = vld [vmem:[#allocation2 + $0x28] sm:$0xff]  ;;  %v497_v2 = vld [vmem:[#allocation2 + $0x50] sm:$0xff] }
  0x5a   : > { %1344 = vmatpush3.bf16.msra.mxu0 %v1492_v23  ;;  %1375 = vmatprep.subr.bf16.mxu1 %v1504_v32  ;;  %v495_v5 = vld [vmem:[#allocation2 + $0x40] sm:$0xff]  ;;  %v498_v8 = vld [vmem:[#allocation2 + $0x58] sm:$0xff]  ;;  %v496_v11 = vld [vmem:[#allocation2 + $0x48] sm:$0xff] }
  0x5b   : > { %1345 = vmatprep.subr.bf16.mxu0 %v1493_v25  ;;  %v501_v14 = vld [vmem:[#allocation2 + $0x70] sm:$0xff]  ;;  %v499_v17 = vld [vmem:[#allocation2 + $0x60] sm:$0xff]  ;;  %v502_v20 = vld [vmem:[#allocation2 + $0x78] sm:$0xff] }
  0x5c   : > { %812 = vxpose.xlu0.c.b16.cont [4/8] (narrow) %v1485_v22, 32  ;;  %v500_v23 = vld [vmem:[#allocation2 + $0x68] sm:$0xff] }
  0x5d   : > { %1376 = vmatpush3.bf16.msra.mxu1 %v1504_v32 }
  0x5e   : > { %1346 = vmatpush3.bf16.msra.mxu0 %v1493_v25  ;;  %1377 = vmatprep.subr.bf16.mxu1 %v1505_v35 }
  0x5f   : > { %1347 = vmatprep.subr.bf16.mxu0 %v1494_v30 }
  0x60   : > { %813 = vxpose.xlu0.c.b16.cont [5/8] (narrow) %v1486_v24, 32 }
  0x61   : > { %1378 = vmatpush3.bf16.msra.mxu1 %v1505_v35 }
  0x62   : > { %1348 = vmatpush3.bf16.msra.mxu0 %v1494_v30  ;;  %1379 = vmatprep.subr.bf16.mxu1 %v1503_v38 }
  0x63   : > { %1349 = vmatprep.subr.bf16.mxu0 %v1495_v33 }
  0x64   : > { %814 = vxpose.xlu0.c.b16.cont [6/8] (narrow) %v1487_v27, 32 }
  0x65   : > { %1380 = vmatpush3.bf16.msra.mxu1 %v1503_v38 }
  0x66   : > { %1350 = vmatpush3.bf16.msra.mxu0 %v1495_v33  ;;  %1381 = vmatprep.subr.bf16.mxu1 %v1502_v39 }
  0x67   : > { %1351 = vmatprep.subr.bf16.mxu0 %v1496_v36 }
  0x68   : > { %815 = vxpose.xlu0.c.b16.cont [7/8] (narrow) %v1488_v31, 32 }
  0x69   : > { %1382 = vmatpush3.bf16.msra.mxu1 %v1502_v39 }
  0x6a   : > { %1352 = vmatpush3.bf16.msra.mxu0 %v1496_v36  ;;  %1383 = vmatprep.subr.bf16.mxu1 %v1499_v40 }
  0x6b   : > { %1353 = vmatprep.subr.bf16.mxu0 %v1497_v37 }
  0x6c   : > { %816 = vxpose.xlu0.c.b16.end [8/8] (narrow) %v1489_v34, 32 }
  0x6d   : > { %1384 = vmatpush3.bf16.msra.mxu1 %v1499_v40 }
  0x6e   : > { %1354 = vmatpush3.bf16.msra.mxu0 %v1497_v37  ;;  %1385 = vmatprep.subr.bf16.mxu1 %v1498_v26 }
  0x71   : > { %1356 = vmatmul.mubr.bf16.vlgmr.msra.gmra.mxu0 %v1499_v40  ;;  %1386 = vmatpush3.bf16.msra.mxu1 %v1498_v26 }
  0x72   : > { %1359 = vmatprep.mubr.bf16.mxu0 %v1502_v39 }
  0x79   : > { %1360 = vmatmul.mubr.bf16.gmra.mxu0 %v1503_v38 }
  0x7a   : > { %1363 = vmatprep.mubr.bf16.mxu0 %v1505_v35 }
  0x81   : > { %1364 = vmatmul.mubr.bf16.gmra.mxu0 %v1504_v32 }
  0x82   : > { %1367 = vmatprep.mubr.bf16.mxu0 %v1501_v29 }
  0x89   : > { %1368 = vmatmul.mubr.bf16.gmra.mxu0 %v1500_v28 }
  0xb2   : > { %v817_v41 = vpop.trf.xlu0 }
  0xb3   : > { %1387 = vmatprep.mubr.bf16.mxu1 %v817_v41 }
  0xb6   : > { %v818_v42 = vpop.trf.xlu0 }
  0xb7   : > { %1388 = vmatmul.mubr.bf16.vlgmr.msra.gmra.mxu1 %v818_v42 }
 0x131   : > { %v1357_v44 = vpop.f32.mrf.mxu0 }
 0x132   : > { %v714_v46 = vadd.f32 %v1357_v44, %v489_v43 }
 0x133   : > { %v649_v47 = vpop.f32.mrf.mxu0 }
 0x134   : > { %731 = vst.msk [vmem:[#allocation2 + $0x10] sm:$0xff] %vm728_vm1, %v714_v46  ;;  %v712_v49 = vadd.f32 %v649_v47, %v487_v45 }
 0x135   : > { %v1358_v50 = vpop.f32.mrf.mxu0 }
 0x136   : > { %729 = vst.msk [vmem:[#allocation2] sm:$0xff] %vm728_vm1, %v712_v49  ;;  %v715_v52 = vadd.f32 %v1358_v50, %v490_v48 }
 0x137   : > { %v652_v53 = vpop.f32.mrf.mxu0 }
 0x138   : > { %732 = vst.msk [vmem:[#allocation2 + $0x18] sm:$0xff] %vm728_vm1, %v715_v52  ;;  %v713_v55 = vadd.f32 %v652_v53, %v488_v51 }
 0x139   : > { %v1361_v56 = vpop.f32.mrf.mxu0 }
 0x13a   : > { %730 = vst.msk [vmem:[#allocation2 + $0x8] sm:$0xff] %vm728_vm1, %v713_v55  ;;  %v718_v58 = vadd.f32 %v1361_v56, %v493_v54 }
 0x13b   : > { %v665_v59 = vpop.f32.mrf.mxu0 }
 0x13c   : > { %735 = vst.msk [vmem:[#allocation2 + $0x30] sm:$0xff] %vm728_vm1, %v718_v58  ;;  %v716_v61 = vadd.f32 %v665_v59, %v491_v57 }
 0x13d   : > { %v1362_v62 = vpop.f32.mrf.mxu0 }
 0x13e   : > { %733 = vst.msk [vmem:[#allocation2 + $0x20] sm:$0xff] %vm728_vm1, %v716_v61  ;;  %v719_v0 = vadd.f32 %v1362_v62, %v494_v60 }
 0x13f   : > { %v668_v1 = vpop.f32.mrf.mxu0 }
 0x140   : > { %736 = vst.msk [vmem:[#allocation2 + $0x38] sm:$0xff] %vm728_vm1, %v719_v0  ;;  %v717_v3 = vadd.f32 %v668_v1, %v492_v63 }
 0x141   : > { %v1365_v4 = vpop.f32.mrf.mxu0 }
 0x142   : > { %734 = vst.msk [vmem:[#allocation2 + $0x28] sm:$0xff] %vm728_vm1, %v717_v3  ;;  %v722_v6 = vadd.f32 %v1365_v4, %v497_v2 }
 0x143   : > { %v681_v7 = vpop.f32.mrf.mxu0 }
 0x144   : > { %739 = vst.msk [vmem:[#allocation2 + $0x50] sm:$0xff] %vm728_vm1, %v722_v6  ;;  %v720_v9 = vadd.f32 %v681_v7, %v495_v5 }
 0x145   : > { %v1366_v10 = vpop.f32.mrf.mxu0 }
 0x146   : > { %737 = vst.msk [vmem:[#allocation2 + $0x40] sm:$0xff] %vm728_vm1, %v720_v9  ;;  %v723_v12 = vadd.f32 %v1366_v10, %v498_v8 }
 0x147   : > { %v684_v13 = vpop.f32.mrf.mxu0 }
 0x148   : > { %740 = vst.msk [vmem:[#allocation2 + $0x58] sm:$0xff] %vm728_vm1, %v723_v12  ;;  %v721_v15 = vadd.f32 %v684_v13, %v496_v11 }
 0x149   : > { %v1369_v16 = vpop.f32.mrf.mxu0 }
 0x14a   : > { %738 = vst.msk [vmem:[#allocation2 + $0x48] sm:$0xff] %vm728_vm1, %v721_v15  ;;  %v726_v18 = vadd.f32 %v1369_v16, %v501_v14 }
 0x14b   : > { %v697_v19 = vpop.f32.mrf.mxu0 }
 0x14c   : > { %743 = vst.msk [vmem:[#allocation2 + $0x70] sm:$0xff] %vm728_vm1, %v726_v18  ;;  %v724_v21 = vadd.f32 %v697_v19, %v499_v17 }
 0x14d   : > { %v1370_v22 = vpop.f32.mrf.mxu0 }
 0x14e   : > { %741 = vst.msk [vmem:[#allocation2 + $0x60] sm:$0xff] %vm728_vm1, %v724_v21  ;;  %v727_v24 = vadd.f32 %v1370_v22, %v502_v20 }
 0x14f   : > { %v700_v25 = vpop.f32.mrf.mxu0 }
 0x150   : > { %744 = vst.msk [vmem:[#allocation2 + $0x78] sm:$0xff] %vm728_vm1, %v727_v24  ;;  %v725_v26 = vadd.f32 %v700_v25, %v500_v23 }
 0x152   : > { %742 = vst.msk [vmem:[#allocation2 + $0x68] sm:$0xff] %vm728_vm1, %v725_v26 }
 0x177   : > { %v1389_v27 = vpop.f32.mrf.mxu1 }
 0x179   : > { %v859_v28 = vpop.f32.mrf.mxu1  ;;  %877 = sbr.rel (%p1270_p6) target bundleno = 384 (0x180), region = 85 }
 0x17b   : > { %v1390_v29 = vpop.f32.mrf.mxu1 }
 0x17d   : > { %v862_v30 = vpop.f32.mrf.mxu1 }
 0x17e   : > { %880 = vst [vmem:[%s879_s29] sm:$0xff] %v859_v28  ;;  %881 = vst [vmem:[%s879_s29 + $0x8] sm:$0xff] %v862_v30 }
 0x17f   : > { %882 = vst [vmem:[%s879_s29 + $0x10] sm:$0xff] %v1389_v27  ;;  %883 = vst [vmem:[%s879_s29 + $0x18] sm:$0xff] %v1390_v29 }
 0x180 PF: > { %p1272_p8 = scmp.le.s32.totalorder %s1602_s27, 0 }
 0x181   : > { %s1273_s19 = sshll.u32 (!%p1272_p8), %s1598_s26, 5 }
 0x182   : > { %887 = sbr.rel (%p1272_p8) target bundleno = 396 (0x18c), region = 89  ;;  %s889_s13 = scalar_lea.vmem (!%p1272_p8), %s2026_s6, %s1273_s19 }
 0x187   : > { %v890_v31 = vld [vmem:[%s889_s13] sm:$0xff]  ;;  %v891_v32 = vld [vmem:[%s889_s13 + $0x8] sm:$0xff]  ;;  %v892_v33 = vld [vmem:[%s889_s13 + $0x10] sm:$0xff] }
 0x188   : > { %v894_v34 = vadd.f32 %v890_v31, %v859_v28  ;;  %v895_v35 = vadd.f32 %v891_v32, %v862_v30  ;;  %v896_v36 = vadd.f32 %v1389_v27, %v892_v33  ;;  %v893_v37 = vld [vmem:[%s889_s13 + $0x18] sm:$0xff] }
 0x189   : > { %v897_v38 = vadd.f32 %v1390_v29, %v893_v37 }
 0x18a   : > { %898 = vst [vmem:[%s889_s13] sm:$0xff] %v894_v34  ;;  %899 = vst [vmem:[%s889_s13 + $0x8] sm:$0xff] %v895_v35 }
 0x18b   : > { %900 = vst [vmem:[%s889_s13 + $0x10] sm:$0xff] %v896_v36  ;;  %901 = vst [vmem:[%s889_s13 + $0x18] sm:$0xff] %v897_v38 }
 0x18c PF: > { %p1274_p9 = scmp.ne.s32.totalorder %s1598_s26, 4 }
 0x18e   : > { %905 = sbr.rel (%p1274_p9) target bundleno = 422 (0x1a6), region = 93 }
 0x193   : > { %v906_v39 = vld [vmem:[#allocation2] sm:$0xff]  ;;  %vm986_vm2 = vcmask 257024   ;;  %v907_v40 = vld [vmem:[#allocation2 + $0x8] sm:$0xff]  ;;  %v908_v41 = vld [vmem:[#allocation2 + $0x10] sm:$0xff] }
 0x194   : > { %v1296_v42 = vpack.c.bf16 %v906_v39, %v906_v39  ;;  %v1297_v43 = vpack.c.bf16 %v907_v40, %v907_v40  ;;  %v1298_v44 = vpack.c.bf16 %v908_v41, %v908_v41  ;;  %v909_v45 = vld [vmem:[#allocation2 + $0x18] sm:$0xff]  ;;  %v910_v46 = vld [vmem:[#allocation2 + $0x20] sm:$0xff]  ;;  %v911_v47 = vld [vmem:[#allocation2 + $0x28] sm:$0xff] }
 0x195   : > { %v1299_v48 = vpack.c.bf16 %v909_v45, %v909_v45  ;;  %v1300_v49 = vpack.c.bf16 %v910_v46, %v910_v46  ;;  %v1301_v50 = vpack.c.bf16 %v911_v47, %v911_v47  ;;  %v912_v51 = vld [vmem:[#allocation2 + $0x30] sm:$0xff]  ;;  %v913_v52 = vld [vmem:[#allocation2 + $0x38] sm:$0xff]  ;;  %v914_v53 = vld [vmem:[#allocation2 + $0x40] sm:$0xff] }
 0x196   : > { %987 = vst.msk [vmem:[%s1802_s16] sm:$0xf] %vm986_vm2, %v1296_v42  ;;  %988 = vst.msk [vmem:[%s1802_s16 + $0x4] sm:$0xf] %vm986_vm2, %v1297_v43  ;;  %v1302_v54 = vpack.c.bf16 %v912_v51, %v912_v51  ;;  %v1303_v55 = vpack.c.bf16 %v913_v52, %v913_v52  ;;  %v1304_v56 = vpack.c.bf16 %v914_v53, %v914_v53  ;;  %v915_v57 = vld [vmem:[#allocation2 + $0x48] sm:$0xff]  ;;  %v916_v58 = vld [vmem:[#allocation2 + $0x50] sm:$0xff] }
 0x197   : > { %989 = vst.msk [vmem:[%s1802_s16 + $0x8] sm:$0xf] %vm986_vm2, %v1298_v44  ;;  %v917_v59 = vld [vmem:[#allocation2 + $0x58] sm:$0xff]  ;;  %990 = vst.msk [vmem:[%s1802_s16 + $0xc] sm:$0xf] %vm986_vm2, %v1299_v48  ;;  %v1305_v60 = vpack.c.bf16 %v915_v57, %v915_v57  ;;  %v1306_v61 = vpack.c.bf16 %v916_v58, %v916_v58  ;;  %v918_v63 = vld [vmem:[#allocation2 + $0x60] sm:$0xff] }
 0x198   : > { %991 = vst.msk [vmem:[%s1802_s16 + $0x10] sm:$0xf] %vm986_vm2, %v1300_v49  ;;  %992 = vst.msk [vmem:[%s1802_s16 + $0x14] sm:$0xf] %vm986_vm2, %v1301_v50  ;;  %v1307_v62 = vpack.c.bf16 %v917_v59, %v917_v59  ;;  %v919_v0 = vld [vmem:[#allocation2 + $0x68] sm:$0xff]  ;;  %v920_v1 = vld [vmem:[#allocation2 + $0x70] sm:$0xff]  ;;  %v1308_v2 = vpack.c.bf16 %v918_v63, %v918_v63 }
 0x199   : > { %993 = vst.msk [vmem:[%s1802_s16 + $0x18] sm:$0xf] %vm986_vm2, %v1302_v54  ;;  %994 = vst.msk [vmem:[%s1802_s16 + $0x1c] sm:$0xf] %vm986_vm2, %v1303_v55  ;;  %v1309_v3 = vpack.c.bf16 %v919_v0, %v919_v0  ;;  %v1310_v4 = vpack.c.bf16 %v920_v1, %v920_v1  ;;  %v921_v5 = vld [vmem:[#allocation2 + $0x78] sm:$0xff]  ;;  %v1003_v6 = vld [vmem:[%s1793_s25] sm:$0xff] }
 0x19a   : > { %995 = vst.msk [vmem:[%s1802_s16 + $0x20] sm:$0xf] %vm986_vm2, %v1304_v56  ;;  %v1004_v7 = vld [vmem:[%s1793_s25 + $0x8] sm:$0xff]  ;;  %996 = vst.msk [vmem:[%s1802_s16 + $0x24] sm:$0xf] %vm986_vm2, %v1305_v60  ;;  %v1311_v8 = vpack.c.bf16 %v921_v5, %v921_v5  ;;  %v1019_v9 = vadd.f32 %v1003_v6, %v906_v39  ;;  %v1005_v11 = vld [vmem:[%s1793_s25 + $0x10] sm:$0xff] }
 0x19b   : > { %997 = vst.msk [vmem:[%s1802_s16 + $0x28] sm:$0xf] %vm986_vm2, %v1306_v61  ;;  %998 = vst.msk [vmem:[%s1802_s16 + $0x2c] sm:$0xf] %vm986_vm2, %v1307_v62  ;;  %v1020_v10 = vadd.f32 %v1004_v7, %v907_v40  ;;  %v1006_v12 = vld [vmem:[%s1793_s25 + $0x18] sm:$0xff]  ;;  %v1007_v13 = vld [vmem:[%s1793_s25 + $0x20] sm:$0xff]  ;;  %v1021_v14 = vadd.f32 %v1005_v11, %v908_v41 }
 0x19c   : > { %999 = vst.msk [vmem:[%s1802_s16 + $0x30] sm:$0xf] %vm986_vm2, %v1308_v2  ;;  %1000 = vst.msk [vmem:[%s1802_s16 + $0x34] sm:$0xf] %vm986_vm2, %v1309_v3  ;;  %v1022_v15 = vadd.f32 %v1006_v12, %v909_v45  ;;  %v1023_v16 = vadd.f32 %v1007_v13, %v910_v46  ;;  %v1008_v17 = vld [vmem:[%s1793_s25 + $0x28] sm:$0xff]  ;;  %v1009_v18 = vld [vmem:[%s1793_s25 + $0x30] sm:$0xff] }
 0x19d   : > { %1001 = vst.msk [vmem:[%s1802_s16 + $0x38] sm:$0xf] %vm986_vm2, %v1310_v4  ;;  %v1010_v19 = vld [vmem:[%s1793_s25 + $0x38] sm:$0xff]  ;;  %1002 = vst.msk [vmem:[%s1802_s16 + $0x3c] sm:$0xf] %vm986_vm2, %v1311_v8  ;;  %v1024_v20 = vadd.f32 %v1008_v17, %v911_v47  ;;  %v1025_v21 = vadd.f32 %v1009_v18, %v912_v51  ;;  %v1011_v23 = vld [vmem:[%s1793_s25 + $0x40] sm:$0xff] }
 0x19e   : > { %1035 = vst.msk [vmem:[%s1798_s8] sm:$0xff] %vm728_vm1, %v1019_v9  ;;  %1036 = vst.msk [vmem:[%s1798_s8 + $0x8] sm:$0xff] %vm728_vm1, %v1020_v10  ;;  %v1026_v22 = vadd.f32 %v1010_v19, %v913_v52  ;;  %v1012_v24 = vld [vmem:[%s1793_s25 + $0x48] sm:$0xff]  ;;  %v1013_v25 = vld [vmem:[%s1793_s25 + $0x50] sm:$0xff]  ;;  %v1027_v26 = vadd.f32 %v1011_v23, %v914_v53 }
 0x19f   : > { %1037 = vst.msk [vmem:[%s1798_s8 + $0x10] sm:$0xff] %vm728_vm1, %v1021_v14  ;;  %1038 = vst.msk [vmem:[%s1798_s8 + $0x18] sm:$0xff] %vm728_vm1, %v1022_v15  ;;  %v1028_v27 = vadd.f32 %v1012_v24, %v915_v57  ;;  %v1029_v28 = vadd.f32 %v1013_v25, %v916_v58  ;;  %v1014_v29 = vld [vmem:[%s1793_s25 + $0x58] sm:$0xff]  ;;  %v1015_v30 = vld [vmem:[%s1793_s25 + $0x60] sm:$0xff] }
 0x1a0   : > { %1039 = vst.msk [vmem:[%s1798_s8 + $0x20] sm:$0xff] %vm728_vm1, %v1023_v16  ;;  %v1016_v31 = vld [vmem:[%s1793_s25 + $0x68] sm:$0xff]  ;;  %1040 = vst.msk [vmem:[%s1798_s8 + $0x28] sm:$0xff] %vm728_vm1, %v1024_v20  ;;  %v1030_v32 = vadd.f32 %v1014_v29, %v917_v59  ;;  %v1031_v33 = vadd.f32 %v1015_v30, %v918_v63  ;;  %v1017_v35 = vld [vmem:[%s1793_s25 + $0x70] sm:$0xff] }
 0x1a1   : > { %1041 = vst.msk [vmem:[%s1798_s8 + $0x30] sm:$0xff] %vm728_vm1, %v1025_v21  ;;  %1042 = vst.msk [vmem:[%s1798_s8 + $0x38] sm:$0xff] %vm728_vm1, %v1026_v22  ;;  %v1032_v34 = vadd.f32 %v1016_v31, %v919_v0  ;;  %v1018_v36 = vld [vmem:[%s1793_s25 + $0x78] sm:$0xff]  ;;  %v1033_v37 = vadd.f32 %v1017_v35, %v920_v1 }
 0x1a2   : > { %1043 = vst.msk [vmem:[%s1798_s8 + $0x40] sm:$0xff] %vm728_vm1, %v1027_v26  ;;  %1044 = vst.msk [vmem:[%s1798_s8 + $0x48] sm:$0xff] %vm728_vm1, %v1028_v27  ;;  %v1034_v38 = vadd.f32 %v1018_v36, %v921_v5 }
 0x1a3   : > { %1045 = vst.msk [vmem:[%s1798_s8 + $0x50] sm:$0xff] %vm728_vm1, %v1029_v28  ;;  %1046 = vst.msk [vmem:[%s1798_s8 + $0x58] sm:$0xff] %vm728_vm1, %v1030_v32 }
 0x1a4   : > { %1047 = vst.msk [vmem:[%s1798_s8 + $0x60] sm:$0xff] %vm728_vm1, %v1031_v33  ;;  %1048 = vst.msk [vmem:[%s1798_s8 + $0x68] sm:$0xff] %vm728_vm1, %v1032_v34 }
 0x1a5   : > { %1049 = vst.msk [vmem:[%s1798_s8 + $0x70] sm:$0xff] %vm728_vm1, %v1033_v37  ;;  %1050 = vst.msk [vmem:[%s1798_s8 + $0x78] sm:$0xff] %vm728_vm1, %v1034_v38 }
 0x1a6 PF: > { %s1312_s25 = sshll.u32 %s1602_s27, 10  ;;  %s1070_s14 = sshll.u32 %s1802_s16, 4  ;;  %s1959_s14 = int_to_ptr.vmem [resolvable:$true] %s1070_s14 }
 0x1a7   : > { %s1956_s12 = scalar_lea.hbm %s2024_s4, %s1312_s25  ;;  %s2047_s11 = sand.u32 1, %s1582_s22  }
 0x1a8   : > { %s1963_s24 = scalar_lea.sflag [#allocation5], %s2047_s11  ;;  %s1506_s9 = scalar_lea.vmem %s1959_s14, 1024 }
 0x1a9   : > { %p1507_p10 = scmp.ne.s32.totalorder %s1959_s14, %s1506_s9  ;;  %s1617_s27 = smov [#allocation4]  }
 0x1aa   : > { %s1510_s8 = sshll.u32 %s1617_s27, 4  ;;  %s1511_s8 = int_to_ptr.vmem [resolvable:$false] %s1510_s8 }
 0x1ab   : > { %p1508_p11 = pnand %p1507_p10, %p1727_p7  ;;  %s1512_s17 = scalar_lea.vmem %s1511_s8, 2048 }
 0x1ac   : > { %p1513_p0 = scmp.lt.s32.totalorder %s1959_s14, %s1511_s8  ;;  %p1514_p1 = scmp.lt.s32.totalorder %s1512_s17, %s1506_s9 }
 0x1ad   : > { %p1509_p13 = pneg %p1508_p11 }
 0x1ae   : > { %p1515_p2 = por %p1514_p1, %p1513_p0 }
 0x1b0   : > { %p1516_p3 = pnand %p1515_p2, %p1509_p13 }
 0x1b2   : > { %1519 = shalt.err (!%p1516_p3)
}
 0x1b3   : > { %s1520_s16 = scalar_lea.hbm %s1956_s12, 1024  ;;  %s1524_s28 = scalar_lea.hbm %s2024_s4, 3072 }
 0x1b4   : > { %p1521_p4 = scmp.ne.s32.totalorder %s1956_s12, %s1520_s16  ;;  %p1525_p8 = scmp.lt.s32.totalorder %s1956_s12, %s2024_s4 }
 0x1b5   : > { %p1526_p9 = scmp.lt.s32.totalorder %s1524_s28, %s1520_s16 }
 0x1b6   : > { %p1522_p5 = pnand %p1521_p4, %p1727_p7 }
 0x1b7   : > { %p1527_p10 = por %p1526_p9, %p1525_p8 }
 0x1b8   : > { %p1523_p6 = pneg %p1522_p5 }
 0x1ba   : > { %p1528_p11 = pnand %p1527_p10, %p1523_p6 }
 0x1bc   : > { %1531 = shalt.err (!%p1528_p11)
}
 0x1bd   : > { %s1618_s20 = smov 64   ;;  %s1619_s10 = smov 4  }
 0x1be   : > { %1392 = dma.vmem_to_hbm [thread:$0]  (%p1727_p7), %s1959_s14, 1024, %s1956_s12, %s1963_s24, %s1618_s20, %s1618_s20, %s1619_s10  }
 0x1bf PF: > { %p1398_p13 = scmp.ge.s32.totalorder %s1614_s30, 2  ;;  %s1095_s13 = sand.u32 1, %s1578_s21  }
 0x1c0   : > { %s1096_s25 = scalar_lea.sflag [#allocation5], %s1095_s13 }
 0x1c1   : > { %p1395_p0 = pnand %p1398_p13, %p1735_p12 }
 0x1c3   : > { %p1396_p1 = pneg %p1395_p0 }
 0x1c5   : > { %1573 = dma.done.wait (%p1396_p1), %s1096_s25, 1024  }
 0x1c6   : > { %1575 = vsyncadd (%p1396_p1), %s1096_s25, 4294966272  ;;  %s20_s30 = sadd.s32 1, %s1614_s30   ;;  %s2048_s26 = sld [smem:[#allocation7_spill]] }
 0x1c7   : > { %p17_p2 = scmp.ge.s32.totalorder %s20_s30, 17   ;;  %s2049_s23 = sld [smem:[#allocation13_spill]] }
 0x1c8   : > { %s2050_s24 = sld [smem:[#allocation8_spill]]  ;;  %s2056_s21 = smov %s1582_s22 }
 0x1c9   : > { %s2051_s25 = sld [smem:[#allocation14_spill]] }
 0x1ca   : > { %s2052_s15 = sld [smem:[#allocation9_spill]] }
 0x1cb   : > { %s2053_s27 = sld [smem:[#allocation10_spill]] }
 0x1cc   : > { %s2054_s28 = sld [smem:[#allocation11_spill]]  ;;  %s2057_s22 = smov %s2048_s26 }
 0x1cd   : > { %s2055_s29 = sld [smem:[#allocation12_spill]]  ;;  %19 = sbr.rel (!%p17_p2) target bundleno = 8 (0x8), region = 164 }
 0x1d0   : > { %s2058_s26 = smov %s2052_s15 }
 0x1d2   :  { %1109 = vsyncpa [#allocation5], 1 }
 0x1d3   :  { %1111 = vsyncpa [#allocation5 + $0x1], 1 }

// kernel: lightgcl_forward.7
= control target key start
LH: loop header
LB: loop body
LE: loop exit
PB: predicated region body
PF: predicated region fallthrough
CT: control target
= control target key end

     0   :  { %s1834_s9 = smov 0   ;;  %s1836_s10 = smov 0   ;;  %s2547_s0 = inlined_call_operand.vmem [shape: f32[256,32], index: 0, kind: input, shape index: {}]   ;;  %s2548_s1 = inlined_call_operand.vmem [shape: bf16[768,32], index: 1, kind: input, shape index: {}]   ;;  %s2549_s2 = inlined_call_operand.vmem [shape: f32[256,1], index: 2, kind: output, shape index: {}]  }
   0x1   :  { %s1838_s11 = smov 0   ;;  %s1840_s12 = smov 0  }
   0x2   :  { %s1842_s13 = smov 0  }
   0x3 LB: > { %s21_s14 = sadd.s32 1, %s1806_s11  ;;  %s24_s15 = sadd.s32 1, %s1810_s12  ;;  %s1814_s13 = sphi %s1842_s13, %s12_s13   ;;  %s1810_s12 = sphi %s1840_s12, %s2614_s12   ;;  %s1806_s11 = sphi %s1838_s11, %s2613_s11   ;;  %s1802_s10 = sphi %s1836_s10, %s2612_s10   ;;  %s1798_s9 = sphi %s1834_s9, %s2611_s9  }
   0x4   : > { %p22_p0 = scmp.ge.s32.totalorder %s21_s14, 3  ;;  %p1391_p1 = scmp.ge.s32.totalorder %s1814_s13, 1 }
   0x5   : > { %p136_p2 = scmp.lt.s32.totalorder %s1814_s13, 7 }
   0x6   : > { %s2616_s14 = smov (%p22_p0, %s21_s14), 0  ;;  %s2618_s15 = smov (!%p22_p0, %s24_s15), %s1810_s12 }
   0x7   : > { %p137_p3 = pnand %p1391_p1, %p136_p2  ;;  %p26_p4 = scmp.ge.s32.totalorder %s2618_s15, 2 }
   0x9   : > { %s2620_s15 = smov (%p26_p4, %s2618_s15), 0  ;;  %140 = sbr.rel (%p137_p3) target bundleno = 877 (0x36d), region = 28 }
   0xe   : > { %s1392_s16 = sshll.u32 %s1802_s10, 4  ;;  %s1394_s17 = sshll.u32 %s1798_s9, 5 }
   0xf   : > { %p164_p5 = scmp.lt.s32.totalorder %s1392_s16, 31  ;;  %p170_p6 = scmp.lt.s32.totalorder %s1394_s17, 95 }
  0x10   : > { %p1398_p7 = scmp.ne.s32.totalorder %s1798_s9, 0 }
  0x11   : > { %s2622_s16 = smov (!%p164_p5, %s1392_s16), 31  ;;  %s2624_s17 = smov (!%p170_p6, %s1394_s17), 95 }
  0x12   : > { %s1393_s18 = sshll.u32 %s2622_s16, 3  ;;  %s1395_s22 = sshll.u32 %s2624_s17, 2 }
  0x13   : > { %s1870_s21 = scalar_lea.vmem %s2547_s0, %s1393_s18  ;;  %s1875_s25 = scalar_lea.vmem %s2548_s1, %s1395_s22 }
  0x14   : > { %s1880_s28 = scalar_lea.vmem %s2549_s2, %s1393_s18  ;;  %185 = sbr.rel (%p1398_p7) target bundleno = 42 (0x2a), region = 32 }
  0x19   : > { %vm186_vm0 = vcmask 7168   ;;  %v1816_v0 = vmov -inf   ;;  %v1817_v1 = vmov 0.0  }
  0x1a   : > { %187 = vst.msk [vmem:[#allocation2] sm:$0xff] %vm186_vm0, %v1816_v0  ;;  %188 = vst.msk [vmem:[#allocation2 + $0x8] sm:$0xff] %vm186_vm0, %v1816_v0 }
  0x1b   : > { %189 = vst.msk [vmem:[#allocation2 + $0x10] sm:$0xff] %vm186_vm0, %v1816_v0  ;;  %190 = vst.msk [vmem:[#allocation2 + $0x18] sm:$0xff] %vm186_vm0, %v1816_v0 }
  0x1c   : > { %191 = vst.msk [vmem:[#allocation2 + $0x20] sm:$0xff] %vm186_vm0, %v1816_v0  ;;  %192 = vst.msk [vmem:[#allocation2 + $0x28] sm:$0xff] %vm186_vm0, %v1816_v0 }
  0x1d   : > { %193 = vst.msk [vmem:[#allocation2 + $0x30] sm:$0xff] %vm186_vm0, %v1816_v0  ;;  %194 = vst.msk [vmem:[#allocation2 + $0x38] sm:$0xff] %vm186_vm0, %v1816_v0 }
  0x1e   : > { %195 = vst.msk [vmem:[#allocation2 + $0x40] sm:$0xff] %vm186_vm0, %v1816_v0  ;;  %196 = vst.msk [vmem:[#allocation2 + $0x48] sm:$0xff] %vm186_vm0, %v1816_v0 }
  0x1f   : > { %197 = vst.msk [vmem:[#allocation2 + $0x50] sm:$0xff] %vm186_vm0, %v1816_v0  ;;  %198 = vst.msk [vmem:[#allocation2 + $0x58] sm:$0xff] %vm186_vm0, %v1816_v0 }
  0x20   : > { %199 = vst.msk [vmem:[#allocation2 + $0x60] sm:$0xff] %vm186_vm0, %v1816_v0  ;;  %200 = vst.msk [vmem:[#allocation2 + $0x68] sm:$0xff] %vm186_vm0, %v1816_v0 }
  0x21   : > { %201 = vst.msk [vmem:[#allocation2 + $0x70] sm:$0xff] %vm186_vm0, %v1816_v0  ;;  %202 = vst.msk [vmem:[#allocation2 + $0x78] sm:$0xff] %vm186_vm0, %v1816_v0 }
  0x22   : > { %203 = vst.msk [vmem:[#allocation3] sm:$0xff] %vm186_vm0, %v1817_v1  ;;  %204 = vst.msk [vmem:[#allocation3 + $0x8] sm:$0xff] %vm186_vm0, %v1817_v1 }
  0x23   : > { %205 = vst.msk [vmem:[#allocation3 + $0x10] sm:$0xff] %vm186_vm0, %v1817_v1  ;;  %206 = vst.msk [vmem:[#allocation3 + $0x18] sm:$0xff] %vm186_vm0, %v1817_v1 }
  0x24   : > { %207 = vst.msk [vmem:[#allocation3 + $0x20] sm:$0xff] %vm186_vm0, %v1817_v1  ;;  %208 = vst.msk [vmem:[#allocation3 + $0x28] sm:$0xff] %vm186_vm0, %v1817_v1 }
  0x25   : > { %209 = vst.msk [vmem:[#allocation3 + $0x30] sm:$0xff] %vm186_vm0, %v1817_v1  ;;  %210 = vst.msk [vmem:[#allocation3 + $0x38] sm:$0xff] %vm186_vm0, %v1817_v1 }
  0x26   : > { %211 = vst.msk [vmem:[#allocation3 + $0x40] sm:$0xff] %vm186_vm0, %v1817_v1  ;;  %212 = vst.msk [vmem:[#allocation3 + $0x48] sm:$0xff] %vm186_vm0, %v1817_v1 }
  0x27   : > { %213 = vst.msk [vmem:[#allocation3 + $0x50] sm:$0xff] %vm186_vm0, %v1817_v1  ;;  %214 = vst.msk [vmem:[#allocation3 + $0x58] sm:$0xff] %vm186_vm0, %v1817_v1 }
  0x28   : > { %215 = vst.msk [vmem:[#allocation3 + $0x60] sm:$0xff] %vm186_vm0, %v1817_v1  ;;  %216 = vst.msk [vmem:[#allocation3 + $0x68] sm:$0xff] %vm186_vm0, %v1817_v1 }
  0x29   : > { %217 = vst.msk [vmem:[#allocation3 + $0x70] sm:$0xff] %vm186_vm0, %v1817_v1  ;;  %218 = vst.msk [vmem:[#allocation3 + $0x78] sm:$0xff] %vm186_vm0, %v1817_v1 }
  0x2a PF: > { %v1536_v2 = vld [vmem:[%s1875_s25 + $0x78] sm:$0xff]   ;;  %vm371_vm1 = vcmask 261120   ;;  %v1538_v4 = vld [vmem:[%s1875_s25 + $0x70] sm:$0xff]   ;;  %v1540_v8 = vld [vmem:[%s1875_s25 + $0x68] sm:$0xff]   ;;  %s1423_s29 = sshll.u32 %s1798_s9, 8  ;;  %vm998_vm4 = vcmask 7168  }
  0x2b   : > { %v1537_v3 = vld [vmem:[%s1875_s25 + $0x38] sm:$0xff]   ;;  %1475 = vmatprep.subr.msk.bf16.mxu0 %vm371_vm1, %v1536_v2  ;;  %1476 = vmatprep.subr.msk.bf16.mxu1 %vm371_vm1, %v1536_v2  ;;  %v1539_v6 = vld [vmem:[%s1875_s25 + $0x30] sm:$0xff]   ;;  %v1541_v9 = vld [vmem:[%s1875_s25 + $0x28] sm:$0xff]   ;;  %v558_v2 = vlaneseq  ;;  %p1424_p8 = scmp.ne.s32.totalorder %s1798_s9, 2 }
  0x2c   : > { %v418_v5 = vsel %vm371_vm1, %v1537_v3, 0  ;;  %v415_v7 = vsel %vm371_vm1, %v1539_v6, 0  ;;  %v219_v10 = vld [vmem:[%s1870_s21] sm:$0xff]  ;;  %v220_v11 = vld [vmem:[%s1870_s21 + $0x8] sm:$0xff]  ;;  %v412_v13 = vsel %vm371_vm1, %v1541_v9, 0  ;;  %v1544_v24 = vld [vmem:[%s1875_s25 + $0x58] sm:$0xff]  }
  0x2d   : > { %1428 = vmatpush3.bf16.xpose.msra.mxu0 %v418_v5  ;;  %1467 = vmatpush3.bf16.xpose.msra.mxu1 %v418_v5  ;;  %v227_v12 = vld [vmem:[%s1870_s21 + $0x40] sm:$0xff]  ;;  %v235_v15 = vmul.f32 2.0, %v219_v10  ;;  %v236_v16 = vmul.f32 2.0, %v220_v11  ;;  %v228_v17 = vld [vmem:[%s1870_s21 + $0x48] sm:$0xff]  ;;  %v1545_v25 = vld [vmem:[%s1875_s25 + $0x18] sm:$0xff]   ;;  %v559_v3 = vand.u32 127, %v558_v2  ;;  %v561_v5 = vstv %s1423_s29 }
  0x2e   : > { %1477 = vmatprep.subr.msk.bf16.mxu0 %vm371_vm1, %v1538_v4  ;;  %1478 = vmatprep.subr.msk.bf16.mxu1 %vm371_vm1, %v1538_v4  ;;  %v1542_v14 = vld [vmem:[%s1875_s25 + $0x60] sm:$0xff]   ;;  %v243_v18 = vmul.f32 2.0, %v227_v12  ;;  %v244_v19 = vmul.f32 2.0, %v228_v17  ;;  %v406_v26 = vsel %vm371_vm1, %v1545_v25, 0  ;;  %v1546_v27 = vld [vmem:[%s1875_s25 + $0x50] sm:$0xff]   ;;  %v1548_v30 = vld [vmem:[%s1875_s25 + $0x48] sm:$0xff]  }
  0x2f   : > { %v251_v20 = vpack.c.bf16 %v236_v16, %v235_v15  ;;  %v1543_v22 = vld [vmem:[%s1875_s25 + $0x20] sm:$0xff]   ;;  %v1547_v28 = vld [vmem:[%s1875_s25 + $0x10] sm:$0xff]   ;;  %v1549_v31 = vld [vmem:[%s1875_s25 + $0x8] sm:$0xff]   ;;  %v560_v4 = vadd.s32 128, %v559_v3  ;;  %v1988_v6 = vadd.s32 %v561_v5, %v559_v3 }
  0x30   : > { %v255_v21 = vpack.c.bf16 %v244_v19, %v243_v18  ;;  %v409_v23 = vsel %vm371_vm1, %v1543_v22, 0  ;;  %v403_v29 = vsel %vm371_vm1, %v1547_v28, 0  ;;  %v400_v32 = vsel %vm371_vm1, %v1549_v31, 0  ;;  %v1550_v33 = vld [vmem:[%s1875_s25 + $0x40] sm:$0xff]   ;;  %v221_v35 = vld [vmem:[%s1870_s21 + $0x10] sm:$0xff]  ;;  %v222_v37 = vld [vmem:[%s1870_s21 + $0x18] sm:$0xff] }
  0x31   : > { %1443 = vmatprep.mubr.msk.bf16.mxu0 %vm371_vm1, %v251_v20  ;;  %v1551_v34 = vld [vmem:[%s1875_s25] sm:$0xff]   ;;  %v229_v38 = vld [vmem:[%s1870_s21 + $0x50] sm:$0xff]  ;;  %v230_v39 = vld [vmem:[%s1870_s21 + $0x58] sm:$0xff]  ;;  %v237_v40 = vmul.f32 2.0, %v221_v35  ;;  %v238_v41 = vmul.f32 2.0, %v222_v37  ;;  %vm564_vm2 = vcmp.lt.s32.totalorder %v1988_v6, 600 }
  0x32   : > { %1451 = vmatprep.mubr.msk.bf16.mxu1 %vm371_vm1, %v255_v21  ;;  %v397_v36 = vsel %vm371_vm1, %v1551_v34, 0  ;;  %v245_v42 = vmul.f32 2.0, %v229_v38  ;;  %v246_v43 = vmul.f32 2.0, %v230_v39  ;;  %v223_v46 = vld [vmem:[%s1870_s21 + $0x20] sm:$0xff]  ;;  %v224_v47 = vld [vmem:[%s1870_s21 + $0x28] sm:$0xff]  ;;  %v225_v56 = vld [vmem:[%s1870_s21 + $0x30] sm:$0xff] }
  0x33   : > { %v252_v44 = vpack.c.bf16 %v238_v41, %v237_v40  ;;  %v231_v48 = vld [vmem:[%s1870_s21 + $0x60] sm:$0xff]  ;;  %v232_v49 = vld [vmem:[%s1870_s21 + $0x68] sm:$0xff]  ;;  %v239_v50 = vmul.f32 2.0, %v223_v46  ;;  %v240_v51 = vmul.f32 2.0, %v224_v47  ;;  %v226_v57 = vld [vmem:[%s1870_s21 + $0x38] sm:$0xff]  ;;  %v241_v60 = vmul.f32 2.0, %v225_v56 }
  0x34   : > { %v256_v45 = vpack.c.bf16 %v246_v43, %v245_v42  ;;  %v247_v52 = vmul.f32 2.0, %v231_v48  ;;  %v248_v53 = vmul.f32 2.0, %v232_v49  ;;  %v233_v58 = vld [vmem:[%s1870_s21 + $0x70] sm:$0xff]  ;;  %v234_v59 = vld [vmem:[%s1870_s21 + $0x78] sm:$0xff]  ;;  %v242_v61 = vmul.f32 2.0, %v226_v57 }
  0x35   : > { %1430 = vmatpush3.bf16.xpose.msra.mxu0 %v415_v7  ;;  %1468 = vmatpush3.bf16.xpose.msra.mxu1 %v415_v7  ;;  %v253_v54 = vpack.c.bf16 %v240_v51, %v239_v50  ;;  %v249_v62 = vmul.f32 2.0, %v233_v58  ;;  %v250_v63 = vmul.f32 2.0, %v234_v59  ;;  %v1990_v7 = vadd.s32 %v561_v5, %v560_v4 }
  0x36   : > { %1479 = vmatprep.subr.msk.bf16.mxu0 %vm371_vm1, %v1540_v8  ;;  %1480 = vmatprep.subr.msk.bf16.mxu1 %vm371_vm1, %v1540_v8  ;;  %v257_v55 = vpack.c.bf16 %v248_v53, %v247_v52  ;;  %v254_v0 = vpack.c.bf16 %v242_v61, %v241_v60  ;;  %v1818_v50 = vmov 0  }
  0x37   : > { %v258_v1 = vpack.c.bf16 %v250_v63, %v249_v62  ;;  %vm565_vm3 = vcmp.lt.s32.totalorder %v1990_v7, 600  ;;  %1534 = vset.pattern.permute.xlu0 %v1818_v50  ;;  %1535 = vset.pattern.permute.xlu1 %v1818_v50  ;;  %v2161_v7 = vld [vmem:[#allocation2 + $0x40] sm:$0xff] }
  0x3d   : > { %1432 = vmatpush3.bf16.xpose.msra.mxu0 %v412_v13  ;;  %1469 = vmatpush3.bf16.xpose.msra.mxu1 %v412_v13 }
  0x3e   : > { %1481 = vmatprep.subr.msk.bf16.mxu0 %vm371_vm1, %v1542_v14  ;;  %1482 = vmatprep.subr.msk.bf16.mxu1 %vm371_vm1, %v1542_v14 }
  0x45   : > { %1434 = vmatpush3.bf16.xpose.msra.mxu0 %v409_v23  ;;  %1470 = vmatpush3.bf16.xpose.msra.mxu1 %v409_v23 }
  0x46   : > { %1483 = vmatprep.subr.msk.bf16.mxu0 %vm371_vm1, %v1544_v24  ;;  %1484 = vmatprep.subr.msk.bf16.mxu1 %vm371_vm1, %v1544_v24 }
  0x4d   : > { %1436 = vmatpush3.bf16.xpose.msra.mxu0 %v406_v26  ;;  %1471 = vmatpush3.bf16.xpose.msra.mxu1 %v406_v26 }
  0x4e   : > { %1485 = vmatprep.subr.msk.bf16.mxu0 %vm371_vm1, %v1546_v27  ;;  %1486 = vmatprep.subr.msk.bf16.mxu1 %vm371_vm1, %v1546_v27 }
  0x55   : > { %1438 = vmatpush3.bf16.xpose.msra.mxu0 %v403_v29  ;;  %1472 = vmatpush3.bf16.xpose.msra.mxu1 %v403_v29 }
  0x56   : > { %1487 = vmatprep.subr.msk.bf16.mxu0 %vm371_vm1, %v1548_v30  ;;  %1488 = vmatprep.subr.msk.bf16.mxu1 %vm371_vm1, %v1548_v30 }
  0x5d   : > { %1440 = vmatpush3.bf16.xpose.msra.mxu0 %v400_v32  ;;  %1473 = vmatpush3.bf16.xpose.msra.mxu1 %v400_v32 }
  0x5e   : > { %1489 = vmatprep.subr.msk.bf16.mxu0 %vm371_vm1, %v1550_v33  ;;  %1490 = vmatprep.subr.msk.bf16.mxu1 %vm371_vm1, %v1550_v33 }
  0x65   : > { %1442 = vmatpush3.bf16.xpose.msra.mxu0 %v397_v36  ;;  %1474 = vmatpush3.bf16.xpose.msra.mxu1 %v397_v36 }
  0x6c   : > { %1444 = vmatmul.mubr.msk.bf16.vlgmr.msra.gmra.mxu0 %vm371_vm1, %v251_v20  ;;  %1452 = vmatmul.mubr.msk.bf16.vlgmr.msra.gmra.mxu1 %vm371_vm1, %v255_v21 }
  0x6d   : > { %1445 = vmatprep.mubr.msk.bf16.mxu0 %vm371_vm1, %v252_v44  ;;  %1453 = vmatprep.mubr.msk.bf16.mxu1 %vm371_vm1, %v256_v45 }
  0x74   : > { %1446 = vmatmul.mubr.msk.bf16.gmra.mxu0 %vm371_vm1, %v252_v44  ;;  %1454 = vmatmul.mubr.msk.bf16.gmra.mxu1 %vm371_vm1, %v256_v45 }
  0x75   : > { %1447 = vmatprep.mubr.msk.bf16.mxu0 %vm371_vm1, %v253_v54  ;;  %1455 = vmatprep.mubr.msk.bf16.mxu1 %vm371_vm1, %v257_v55 }
  0x7c   : > { %1448 = vmatmul.mubr.msk.bf16.gmra.mxu0 %vm371_vm1, %v253_v54  ;;  %1456 = vmatmul.mubr.msk.bf16.gmra.mxu1 %vm371_vm1, %v257_v55 }
  0x7d   : > { %1449 = vmatprep.mubr.msk.bf16.mxu0 %vm371_vm1, %v254_v0  ;;  %1457 = vmatprep.mubr.msk.bf16.mxu1 %vm371_vm1, %v258_v1 }
  0x84   : > { %1450 = vmatmul.mubr.msk.bf16.gmra.mxu0 %vm371_vm1, %v254_v0  ;;  %1458 = vmatmul.mubr.msk.bf16.gmra.mxu1 %vm371_vm1, %v258_v1 }
 0x12c   : > { %v478_v8 = vpop.f32.mrf.mxu0  ;;  %v518_v9 = vpop.f32.mrf.mxu1 }
 0x12d   : > { %v1996_v12 = vsel %vm564_vm2, %v478_v8, -inf  ;;  %v2006_v17 = vsel %vm564_vm2, %v518_v9, -inf }
 0x12e   : > { %v480_v10 = vpop.f32.mrf.mxu0  ;;  %v520_v11 = vpop.f32.mrf.mxu1 }
 0x12f   : > { %v2000_v13 = vsel %vm565_vm3, %v480_v10, -inf  ;;  %v2010_v18 = vsel %vm565_vm3, %v520_v11, -inf }
 0x130   : > { %v482_v14 = vpop.f32.mrf.mxu0  ;;  %v522_v15 = vpop.f32.mrf.mxu1  ;;  %v614_v16 = vmax.f32 %v1996_v12, %v2000_v13  ;;  %v638_v26 = vmax.f32 %v2006_v17, %v2010_v18 }
 0x131   : > { %v2014_v21 = vsel %vm564_vm2, %v522_v15, -inf  ;;  %v2034_v31 = vsel %vm564_vm2, %v482_v14, -inf }
 0x132   : > { %v524_v19 = vpop.f32.mrf.mxu1  ;;  %615 = vmax.xlane.f32.xlu0 %v614_v16  ;;  %v484_v20 = vpop.f32.mrf.mxu0 }
 0x133   : > { %v2018_v22 = vsel %vm565_vm3, %v524_v19, -inf  ;;  %v2026_v27 = vsel %vm565_vm3, %v484_v20, -inf }
 0x134   : > { %v488_v23 = vpop.f32.mrf.mxu0  ;;  %v641_v24 = vmax.f32 %v2014_v21, %v2018_v22  ;;  %v528_v25 = vpop.f32.mrf.mxu1  ;;  %v617_v37 = vmax.f32 %v2034_v31, %v2026_v27 }
 0x135   : > { %v2030_v28 = vsel %vm564_vm2, %v488_v23, -inf  ;;  %v2038_v32 = vsel %vm564_vm2, %v528_v25, -inf }
 0x136   : > { %642 = vmax.xlane.f32.xlu1 %v641_v24  ;;  %639 = vmax.xlane.f32.xlu0 %v638_v26  ;;  %v490_v29 = vpop.f32.mrf.mxu0  ;;  %v530_v30 = vpop.f32.mrf.mxu1 }
 0x137   : > { %v2042_v33 = vsel %vm565_vm3, %v490_v29, -inf  ;;  %v2046_v34 = vsel %vm565_vm3, %v530_v30, -inf }
 0x138   : > { %v492_v35 = vpop.f32.mrf.mxu0  ;;  %v532_v36 = vpop.f32.mrf.mxu1  ;;  %v620_v38 = vmax.f32 %v2030_v28, %v2042_v33  ;;  %v644_v41 = vmax.f32 %v2038_v32, %v2046_v34 }
 0x139   : > { %v2056_v42 = vsel %vm564_vm2, %v492_v35, -inf  ;;  %v2066_v47 = vsel %vm564_vm2, %v532_v36, -inf }
 0x13a   : > { %618 = vmax.xlane.f32.xlu0 %v617_v37  ;;  %621 = vmax.xlane.f32.xlu1 %v620_v38  ;;  %v494_v39 = vpop.f32.mrf.mxu0  ;;  %v534_v40 = vpop.f32.mrf.mxu1 }
 0x13b   : > { %v2060_v43 = vsel %vm565_vm3, %v494_v39, -inf  ;;  %v2074_v49 = vsel %vm565_vm3, %v534_v40, -inf  ;;  %v2154_v39 = vld [vmem:[#allocation2] sm:$0xff] }
 0x13c   : > { %v498_v44 = vpop.f32.mrf.mxu0  ;;  %v623_v45 = vmax.f32 %v2056_v42, %v2060_v43  ;;  %v538_v46 = vpop.f32.mrf.mxu1  ;;  %v647_v57 = vmax.f32 %v2066_v47, %v2074_v49 }
 0x13d   : > { %v2070_v48 = vsel %vm564_vm2, %v498_v44, -inf  ;;  %v2082_v54 = vsel %vm564_vm2, %v538_v46, -inf }
 0x13e   : > { %624 = vmax.xlane.f32.xlu1 %v623_v45  ;;  %v500_v51 = vpop.f32.mrf.mxu0  ;;  %645 = vmax.xlane.f32.xlu0 %v644_v41  ;;  %v540_v52 = vpop.f32.mrf.mxu1  ;;  %v2159_v41 = vld [vmem:[#allocation2 + $0x48] sm:$0xff] }
 0x13f   : > { %v2078_v53 = vsel %vm565_vm3, %v500_v51, -inf  ;;  %v2086_v55 = vsel %vm565_vm3, %v540_v52, -inf  ;;  %v2174_v52 = vld [vmem:[#allocation2 + $0x8] sm:$0xff] }
 0x140   : > { %v502_v56 = vpop.f32.mrf.mxu0  ;;  %v542_v58 = vpop.f32.mrf.mxu1  ;;  %v626_v59 = vmax.f32 %v2070_v48, %v2078_v53  ;;  %v650_v63 = vmax.f32 %v2082_v54, %v2086_v55 }
 0x141   : > { %v2094_v60 = vsel %vm564_vm2, %v502_v56, -inf  ;;  %v2104_v1 = vsel %vm564_vm2, %v542_v58, -inf  ;;  %v2176_v56 = vld [vmem:[#allocation2 + $0x10] sm:$0xff] }
 0x142   : > { %648 = vmax.xlane.f32.xlu1 %v647_v57  ;;  %v504_v61 = vpop.f32.mrf.mxu0  ;;  %v544_v62 = vpop.f32.mrf.mxu1  ;;  %627 = vmax.xlane.f32.xlu0 %v626_v59  ;;  %v2273_v57 = vld [vmem:[#allocation2 + $0x70] sm:$0xff] }
 0x143   : > { %v2100_v0 = vsel %vm565_vm3, %v504_v61, -inf  ;;  %v2108_v2 = vsel %vm565_vm3, %v544_v62, -inf  ;;  %2575 = vst [vmem:[#allocation14_spill] sm:$0xff] %v2273_v57 }
 0x144   : > { %v508_v3 = vpop.f32.mrf.mxu0  ;;  %v629_v4 = vmax.f32 %v2094_v60, %v2100_v0  ;;  %v548_v5 = vpop.f32.mrf.mxu1  ;;  %v653_v11 = vmax.f32 %v2104_v1, %v2108_v2 }
 0x145   : > { %v2114_v8 = vsel %vm564_vm2, %v508_v3, -inf  ;;  %v2124_v15 = vsel %vm564_vm2, %v548_v5, -inf  ;;  %v2194_v3 = vld [vmem:[#allocation2 + $0x18] sm:$0xff] }
 0x146   : > { %630 = vmax.xlane.f32.xlu1 %v629_v4  ;;  %v510_v9 = vpop.f32.mrf.mxu0  ;;  %v550_v10 = vpop.f32.mrf.mxu1  ;;  %651 = vmax.xlane.f32.xlu0 %v650_v63  ;;  %v2196_v4 = vld [vmem:[#allocation2 + $0x50] sm:$0xff] }
 0x147   : > { %v2120_v14 = vsel %vm565_vm3, %v510_v9, -inf  ;;  %v2128_v16 = vsel %vm565_vm3, %v550_v10, -inf  ;;  %v2271_v9 = vld [vmem:[#allocation2 + $0x38] sm:$0xff] }
 0x148   : > { %v512_v19 = vpop.f32.mrf.mxu0  ;;  %v552_v20 = vpop.f32.mrf.mxu1  ;;  %v632_v23 = vmax.f32 %v2114_v8, %v2120_v14  ;;  %v656_v29 = vmax.f32 %v2124_v15, %v2128_v16  ;;  %2574 = vst [vmem:[#allocation13_spill] sm:$0xff] %v2271_v9 }
 0x149   : > { %v2134_v24 = vsel %vm564_vm2, %v512_v19, -inf  ;;  %v2144_v35 = vsel %vm564_vm2, %v552_v20, -inf }
 0x14a   : > { %654 = vmax.xlane.f32.xlu1 %v653_v11  ;;  %v514_v25 = vpop.f32.mrf.mxu0  ;;  %v554_v26 = vpop.f32.mrf.mxu1  ;;  %633 = vmax.xlane.f32.xlu0 %v632_v23  ;;  %v2213_v23 = vld [vmem:[#allocation2 + $0x58] sm:$0xff] }
 0x14b   : > { %v2140_v30 = vsel %vm565_vm3, %v514_v25, -inf  ;;  %v2148_v36 = vsel %vm565_vm3, %v554_v26, -inf  ;;  %v2215_v25 = vld [vmem:[#allocation2 + $0x20] sm:$0xff]  ;;  %v2252_v26 = vld [vmem:[#allocation2 + $0x68] sm:$0xff] }
 0x14c   : > { %v635_v37 = vmax.f32 %v2134_v24, %v2140_v30  ;;  %v659_v38 = vmax.f32 %v2144_v35, %v2148_v36  ;;  %2570 = vst [vmem:[#allocation9_spill] sm:$0xff] %v2252_v26 }
 0x14e   : > { %636 = vmax.xlane.f32.xlu1 %v635_v37  ;;  %657 = vmax.xlane.f32.xlu0 %v656_v29  ;;  %v2254_v29 = vld [vmem:[#allocation2 + $0x30] sm:$0xff] }
 0x14f   : > { %2571 = vst [vmem:[#allocation10_spill] sm:$0xff] %v2254_v29 }
 0x152   : > { %660 = vmax.xlane.f32.xlu1 %v659_v38 }
 0x1bb   : > { %v616_v40 = vpop.xlane.xlu0 %615 }
 0x1bc   : > { %v2157_v6 = vmax.f32 %v2154_v39, %v616_v40 }
 0x1be   : > { %1015 = vst.msk [vmem:[#allocation2] sm:$0xff] %vm998_vm4, %v2157_v6  ;;  %760 = vperm.xlu0 %1534, %v2157_v6  }
 0x1bf   : > { %v643_v45 = vpop.xlane.xlu1 %642  ;;  %v640_v46 = vpop.xlane.xlu0 %639 }
 0x1c0   : > { %v2169_v50 = vmax.f32 %v2159_v41, %v643_v45  ;;  %v2172_v51 = vmax.f32 %v2161_v7, %v640_v46  ;;  %v2232_v46 = vld [vmem:[#allocation2 + $0x28] sm:$0xff] }
 0x1c1   : > { %2566 = vst [vmem:[#allocation5_spill] sm:$0xff] %v2232_v46 }
 0x1c2   : > { %1024 = vst.msk [vmem:[#allocation2 + $0x48] sm:$0xff] %vm998_vm4, %v2169_v50  ;;  %1023 = vst.msk [vmem:[#allocation2 + $0x40] sm:$0xff] %vm998_vm4, %v2172_v51  ;;  %805 = vperm.xlu0 %1534, %v2169_v50   ;;  %800 = vperm.xlu1 %1535, %v2172_v51  }
 0x1c3   : > { %v619_v59 = vpop.xlane.xlu0 %618  ;;  %v622_v61 = vpop.xlane.xlu1 %621 }
 0x1c4   : > { %v2189_v62 = vmax.f32 %v2174_v52, %v619_v59  ;;  %v2192_v63 = vmax.f32 %v2176_v56, %v622_v61  ;;  %v2234_v59 = vld [vmem:[#allocation2 + $0x60] sm:$0xff] }
 0x1c5   : > { %2567 = vst [vmem:[#allocation6_spill] sm:$0xff] %v2234_v59 }
 0x1c6   : > { %1016 = vst.msk [vmem:[#allocation2 + $0x8] sm:$0xff] %vm998_vm4, %v2189_v62  ;;  %1017 = vst.msk [vmem:[#allocation2 + $0x10] sm:$0xff] %vm998_vm4, %v2192_v63  ;;  %765 = vperm.xlu1 %1535, %v2189_v62  }
 0x1c7   : > { %v625_v10 = vpop.xlane.xlu1 %624  ;;  %v646_v11 = vpop.xlane.xlu0 %645 }
 0x1c8   : > { %v2208_v19 = vmax.f32 %v2194_v3, %v625_v10  ;;  %v2211_v20 = vmax.f32 %v2196_v4, %v646_v11 }
 0x1ca   : > { %1018 = vst.msk [vmem:[#allocation2 + $0x18] sm:$0xff] %vm998_vm4, %v2208_v19  ;;  %1025 = vst.msk [vmem:[#allocation2 + $0x50] sm:$0xff] %vm998_vm4, %v2211_v20  ;;  %770 = vperm.xlu1 %1535, %v2192_v63  }
 0x1cb   : > { %v649_v37 = vpop.xlane.xlu1 %648  ;;  %v628_v38 = vpop.xlane.xlu0 %627 }
 0x1cc   : > { %v2227_v40 = vmax.f32 %v2213_v23, %v649_v37  ;;  %v2230_v45 = vmax.f32 %v2215_v25, %v628_v38 }
 0x1ce   : > { %2565 = vst [vmem:[#allocation4_spill] sm:$0xff] %v2230_v45  ;;  %1026 = vst.msk [vmem:[#allocation2 + $0x58] sm:$0xff] %vm998_vm4, %v2227_v40  ;;  %815 = vperm.xlu0 %1534, %v2227_v40   ;;  %810 = vperm.xlu1 %1535, %v2211_v20  }
 0x1cf   : > { %1019 = vst.msk [vmem:[#allocation2 + $0x20] sm:$0xff] %vm998_vm4, %v2230_v45  ;;  %v631_v11 = vpop.xlane.xlu1 %630  ;;  %v652_v37 = vpop.xlane.xlu0 %651 }
 0x1d0   : > { %v2247_v38 = vmax.f32 %v2232_v46, %v631_v11  ;;  %v2250_v61 = vmax.f32 %v2234_v59, %v652_v37 }
 0x1d2   : > { %2568 = vst [vmem:[#allocation7_spill] sm:$0xff] %v2247_v38  ;;  %2569 = vst [vmem:[#allocation8_spill] sm:$0xff] %v2250_v61  ;;  %775 = vperm.xlu1 %1535, %v2208_v19  }
 0x1d3   : > { %1020 = vst.msk [vmem:[#allocation2 + $0x28] sm:$0xff] %vm998_vm4, %v2247_v38  ;;  %1027 = vst.msk [vmem:[#allocation2 + $0x60] sm:$0xff] %vm998_vm4, %v2250_v61  ;;  %v655_v11 = vpop.xlane.xlu1 %654  ;;  %v634_v37 = vpop.xlane.xlu0 %633 }
 0x1d4   : > { %v2266_v5 = vmax.f32 %v2252_v26, %v655_v11  ;;  %v2269_v58 = vmax.f32 %v2254_v29, %v634_v37  ;;  %v2291_v26 = vld [vmem:[#allocation2 + $0x78] sm:$0xff] }
 0x1d5   : > { %2578 = vst [vmem:[#allocation17_spill] sm:$0xff] %v2291_v26 }
 0x1d6   : > { %2572 = vst [vmem:[#allocation11_spill] sm:$0xff] %v2266_v5  ;;  %2573 = vst [vmem:[#allocation12_spill] sm:$0xff] %v2269_v58  ;;  %825 = vperm.xlu0 %1534, %v2266_v5   ;;  %780 = vperm.xlu1 %1535, %v2230_v45  }
 0x1d7   : > { %1028 = vst.msk [vmem:[#allocation2 + $0x68] sm:$0xff] %vm998_vm4, %v2266_v5  ;;  %1021 = vst.msk [vmem:[#allocation2 + $0x30] sm:$0xff] %vm998_vm4, %v2269_v58  ;;  %v637_v37 = vpop.xlane.xlu1 %636  ;;  %v658_v10 = vpop.xlane.xlu0 %657 }
 0x1d8   : > { %v2286_v46 = vmax.f32 %v2271_v9, %v637_v37  ;;  %v2289_v44 = vmax.f32 %v2273_v57, %v658_v10 }
 0x1da   : > { %2576 = vst [vmem:[#allocation15_spill] sm:$0xff] %v2286_v46  ;;  %2577 = vst [vmem:[#allocation16_spill] sm:$0xff] %v2289_v44  ;;  %820 = vperm.xlu1 %1535, %v2250_v61  }
 0x1db   : > { %1022 = vst.msk [vmem:[#allocation2 + $0x38] sm:$0xff] %vm998_vm4, %v2286_v46  ;;  %1029 = vst.msk [vmem:[#allocation2 + $0x70] sm:$0xff] %vm998_vm4, %v2289_v44  ;;  %v661_v37 = vpop.xlane.xlu1 %660 }
 0x1dc   : > { %v2303_v10 = vmax.f32 %v2291_v26, %v661_v37 }
 0x1de   : > { %2579 = vst [vmem:[#allocation18_spill] sm:$0xff] %v2303_v10  ;;  %1030 = vst.msk [vmem:[#allocation2 + $0x78] sm:$0xff] %vm998_vm4, %v2303_v10  ;;  %785 = vperm.xlu1 %1535, %v2247_v38   ;;  %835 = vperm.xlu0 %1534, %v2303_v10  }
 0x1e2   : > { %790 = vperm.xlu1 %1535, %v2269_v58  }
 0x1e6   : > { %795 = vperm.xlu1 %1535, %v2286_v46  }
 0x1ea   : > { %830 = vperm.xlu1 %1535, %v2289_v44  }
 0x239   : > { %v761_v11 = vpop.permute.xlu0 %760 }
 0x23a   : > { %v838_v37 = vsub.f32 %v1996_v12, %v761_v11  ;;  %v839_v5 = vsub.f32 %v2000_v13, %v761_v11 }
 0x23c   : > { %v870_v57 = vmul.f32 1.442695, %v838_v37  ;;  %v872_v29 = vmul.f32 1.442695, %v839_v5 }
 0x23d   : > { %v806_v26 = vpop.permute.xlu0 %805  ;;  %v801_v9 = vpop.permute.xlu1 %800 }
 0x23e   : > { %1552 = vpow2.f32 %v870_v57  ;;  %v856_v38 = vsub.f32 %v2014_v21, %v806_v26  ;;  %v857_v10 = vsub.f32 %v2018_v22, %v806_v26  ;;  %v854_v58 = vsub.f32 %v2006_v17, %v801_v9 }
 0x23f   : > { %1554 = vpow2.f32 %v872_v29  ;;  %v855_v46 = vsub.f32 %v2010_v18, %v801_v9 }
 0x240   : > { %v906_v44 = vmul.f32 1.442695, %v856_v38  ;;  %v908_v61 = vmul.f32 1.442695, %v857_v10  ;;  %v902_v59 = vmul.f32 1.442695, %v854_v58 }
 0x241   : > { %v904_v12 = vmul.f32 1.442695, %v855_v46  ;;  %v766_v45 = vpop.permute.xlu1 %765 }
 0x242   : > { %1556 = vpow2.f32 %v906_v44  ;;  %v840_v13 = vsub.f32 %v2034_v31, %v766_v45  ;;  %v841_v5 = vsub.f32 %v2026_v27, %v766_v45 }
 0x243   : > { %1558 = vpow2.f32 %v908_v61 }
 0x244   : > { %1560 = vpow2.f32 %v902_v59  ;;  %v874_v21 = vmul.f32 1.442695, %v840_v13  ;;  %v876_v57 = vmul.f32 1.442695, %v841_v5 }
 0x245   : > { %1562 = vpow2.f32 %v904_v12  ;;  %v771_v22 = vpop.permute.xlu1 %770 }
 0x246   : > { %1564 = vpow2.f32 %v874_v21  ;;  %v842_v17 = vsub.f32 %v2030_v28, %v771_v22  ;;  %v843_v18 = vsub.f32 %v2042_v33, %v771_v22 }
 0x247   : > { %1566 = vpow2.f32 %v876_v57 }
 0x248   : > { %v878_v58 = vmul.f32 1.442695, %v842_v17  ;;  %v880_v9 = vmul.f32 1.442695, %v843_v18 }
 0x249   : > { %v816_v26 = vpop.permute.xlu0 %815  ;;  %v811_v44 = vpop.permute.xlu1 %810 }
 0x24a   : > { %1568 = vpow2.f32 %v878_v58  ;;  %v858_v31 = vsub.f32 %v2038_v32, %v811_v44  ;;  %v859_v29 = vsub.f32 %v2046_v34, %v811_v44  ;;  %v860_v46 = vsub.f32 %v2066_v47, %v816_v26 }
 0x24b   : > { %v1553_v27 = vpop.eup %1552  ;;  %1570 = vpow2.f32 %v880_v9  ;;  %v861_v28 = vsub.f32 %v2074_v49, %v816_v26 }
 0x24c   : > { %v1555_v45 = vpop.eup %1554  ;;  %v910_v59 = vmul.f32 1.442695, %v858_v31  ;;  %v912_v61 = vmul.f32 1.442695, %v859_v29  ;;  %v914_v12 = vmul.f32 1.442695, %v860_v46 }
 0x24d   : > { %v776_v33 = vpop.permute.xlu1 %775  ;;  %v934_v38 = vadd.f32 %v1555_v45, %v1553_v27  ;;  %v916_v21 = vmul.f32 1.442695, %v861_v28 }
 0x24e   : > { %v844_v11 = vsub.f32 %v2056_v42, %v776_v33  ;;  %v845_v10 = vsub.f32 %v2060_v43, %v776_v33  ;;  %1572 = vpow2.f32 %v910_v59 }
 0x24f   : > { %v1557_v37 = vpop.eup %1556  ;;  %935 = vadd.xlane.f32.xlu1 %v934_v38  ;;  %1574 = vpow2.f32 %v912_v61 }
 0x250   : > { %v1559_v32 = vpop.eup %1558  ;;  %v882_v13 = vmul.f32 1.442695, %v844_v11  ;;  %v884_v34 = vmul.f32 1.442695, %v845_v10 }
 0x251   : > { %v1561_v5 = vpop.eup %1560  ;;  %v781_v47 = vpop.permute.xlu1 %780  ;;  %v961_v57 = vadd.f32 %v1559_v32, %v1557_v37 }
 0x252   : > { %v1563_v49 = vpop.eup %1562  ;;  %1576 = vpow2.f32 %v882_v13  ;;  %v846_v22 = vsub.f32 %v2070_v48, %v781_v47  ;;  %v826_v42 = vpop.permute.xlu0 %825  ;;  %v847_v43 = vsub.f32 %v2078_v53, %v781_v47 }
 0x253   : > { %v1565_v17 = vpop.eup %1564  ;;  %1578 = vpow2.f32 %v884_v34  ;;  %962 = vadd.xlane.f32.xlu1 %v961_v57  ;;  %v958_v18 = vadd.f32 %v1563_v49, %v1561_v5  ;;  %v864_v27 = vsub.f32 %v2104_v1, %v826_v42  ;;  %v865_v46 = vsub.f32 %v2108_v2, %v826_v42 }
 0x254   : > { %v1567_v58 = vpop.eup %1566  ;;  %1580 = vpow2.f32 %v914_v12  ;;  %v886_v9 = vmul.f32 1.442695, %v846_v22  ;;  %v888_v26 = vmul.f32 1.442695, %v847_v43 }
 0x255   : > { %1582 = vpow2.f32 %v916_v21  ;;  %959 = vadd.xlane.f32.xlu0 %v958_v18  ;;  %v821_v44 = vpop.permute.xlu1 %820  ;;  %v937_v31 = vadd.f32 %v1567_v58, %v1565_v17  ;;  %v922_v38 = vmul.f32 1.442695, %v864_v27  ;;  %v924_v1 = vmul.f32 1.442695, %v865_v46 }
 0x256   : > { %v862_v29 = vsub.f32 %v2082_v54, %v821_v44  ;;  %v863_v48 = vsub.f32 %v2086_v55, %v821_v44  ;;  %1584 = vpow2.f32 %v886_v9 }
 0x257   : > { %v1569_v45 = vpop.eup %1568  ;;  %1586 = vpow2.f32 %v888_v26 }
 0x258   : > { %v1571_v53 = vpop.eup %1570  ;;  %v918_v59 = vmul.f32 1.442695, %v862_v29  ;;  %v920_v28 = vmul.f32 1.442695, %v863_v48 }
 0x259   : > { %938 = vadd.xlane.f32.xlu0 %v937_v31  ;;  %v786_v61 = vpop.permute.xlu1 %785  ;;  %v940_v33 = vadd.f32 %v1571_v53, %v1569_v45  ;;  %v836_v37 = vpop.permute.xlu0 %835 }
 0x25a   : > { %1588 = vpow2.f32 %v918_v59  ;;  %v848_v11 = vsub.f32 %v2094_v60, %v786_v61  ;;  %v849_v54 = vsub.f32 %v2100_v0, %v786_v61  ;;  %v868_v47 = vsub.f32 %v2144_v35, %v836_v37 }
 0x25b   : > { %1590 = vpow2.f32 %v920_v28  ;;  %v1573_v10 = vpop.eup %1572  ;;  %v869_v22 = vsub.f32 %v2148_v36, %v836_v37 }
 0x25c   : > { %v890_v55 = vmul.f32 1.442695, %v848_v11  ;;  %v892_v2 = vmul.f32 1.442695, %v849_v54  ;;  %v1575_v12 = vpop.eup %1574  ;;  %1592 = vpow2.f32 %v922_v38  ;;  %v930_v18 = vmul.f32 1.442695, %v868_v47 }
 0x25d   : > { %941 = vadd.xlane.f32.xlu0 %v940_v33  ;;  %v791_v32 = vpop.permute.xlu1 %790  ;;  %1594 = vpow2.f32 %v924_v1  ;;  %v964_v21 = vadd.f32 %v1575_v12, %v1573_v10  ;;  %v932_v26 = vmul.f32 1.442695, %v869_v22 }
 0x25e   : > { %v850_v13 = vsub.f32 %v2114_v8, %v791_v32  ;;  %v851_v34 = vsub.f32 %v2120_v14, %v791_v32  ;;  %1596 = vpow2.f32 %v890_v55 }
 0x25f   : > { %v1577_v5 = vpop.eup %1576  ;;  %1598 = vpow2.f32 %v892_v2 }
 0x260   : > { %v1579_v60 = vpop.eup %1578  ;;  %v894_v0 = vmul.f32 1.442695, %v850_v13  ;;  %v896_v57 = vmul.f32 1.442695, %v851_v34 }
 0x261   : > { %v1581_v49 = vpop.eup %1580  ;;  %965 = vadd.xlane.f32.xlu0 %v964_v21  ;;  %v796_v17 = vpop.permute.xlu1 %795  ;;  %v943_v42 = vadd.f32 %v1579_v60, %v1577_v5  ;;  %v2580_v5 = vsub.f32 %v2154_v39, %v2157_v6  ;;  %v2581_v60 = vsub.f32 %v2159_v41, %v2169_v50  ;;  %v2584_v39 = vsub.f32 %v2176_v56, %v2192_v63  ;;  %v734_v56 = vld [vmem:[#allocation3 + $0x40] sm:$0xff] }
 0x262   : > { %v1583_v43 = vpop.eup %1582  ;;  %1600 = vpow2.f32 %v894_v0  ;;  %v852_v8 = vsub.f32 %v2134_v24, %v796_v17  ;;  %v853_v14 = vsub.f32 %v2140_v30, %v796_v17  ;;  %v2582_v0 = vsub.f32 %v2161_v7, %v2172_v51 }
 0x263   : > { %1602 = vpow2.f32 %v896_v57  ;;  %944 = vadd.xlane.f32.xlu1 %v943_v42  ;;  %v1585_v9 = vpop.eup %1584  ;;  %v967_v31 = vadd.f32 %v1583_v43, %v1581_v49  ;;  %v694_v21 = vmul.f32 1.442695, %v2580_v5  ;;  %v712_v47 = vmul.f32 1.442695, %v2581_v60  ;;  %v726_v42 = vld [vmem:[#allocation3] sm:$0xff] }
 0x264   : > { %v898_v35 = vmul.f32 1.442695, %v852_v8  ;;  %v900_v58 = vmul.f32 1.442695, %v853_v14  ;;  %v1587_v36 = vpop.eup %1586  ;;  %v710_v57 = vmul.f32 1.442695, %v2582_v0  ;;  %v2583_v49 = vsub.f32 %v2174_v52, %v2189_v62 }
 0x265   : > { %v831_v44 = vpop.permute.xlu1 %830  ;;  %v946_v24 = vadd.f32 %v1587_v36, %v1585_v9  ;;  %v698_v6 = vmul.f32 1.442695, %v2584_v39  ;;  %v2585_v41 = vsub.f32 %v2196_v4, %v2211_v20  ;;  %v2586_v7 = vsub.f32 %v2194_v3, %v2208_v19  ;;  %v735_v62 = vld [vmem:[#allocation3 + $0x48] sm:$0xff]  ;;  %v2588_v3 = vld [vmem:[#allocation4_spill] sm:$0xff]  ;;  %v2603_v39 = vld [vmem:[#allocation15_spill] sm:$0xff] }
 0x266   : > { %1604 = vpow2.f32 %v898_v35  ;;  %v866_v27 = vsub.f32 %v2124_v15, %v831_v44  ;;  %v867_v29 = vsub.f32 %v2128_v16, %v831_v44  ;;  %v696_v22 = vmul.f32 1.442695, %v2583_v49  ;;  %v727_v36 = vld [vmem:[#allocation3 + $0x8] sm:$0xff]  ;;  %v737_v49 = vld [vmem:[#allocation3 + $0x58] sm:$0xff] }
 0x267   : > { %v1589_v48 = vpop.eup %1588  ;;  %1606 = vpow2.f32 %v900_v58  ;;  %968 = vadd.xlane.f32.xlu1 %v967_v31  ;;  %947 = vadd.xlane.f32.xlu0 %v946_v24  ;;  %v714_v50 = vmul.f32 1.442695, %v2585_v41  ;;  %v700_v51 = vmul.f32 1.442695, %v2586_v7  ;;  %v2587_v63 = vsub.f32 %v2213_v23, %v2227_v40  ;;  %v2590_v23 = vld [vmem:[#allocation6_spill] sm:$0xff]  ;;  %v2591_v40 = vld [vmem:[#allocation8_spill] sm:$0xff] }
 0x268   : > { %v1591_v30 = vpop.eup %1590  ;;  %1608 = vpow2.f32 %v930_v18  ;;  %v926_v45 = vmul.f32 1.442695, %v866_v27  ;;  %v928_v46 = vmul.f32 1.442695, %v867_v29  ;;  %v2589_v19 = vsub.f32 %v2215_v25, %v2588_v3  ;;  %v2605_v7 = vld [vmem:[#allocation14_spill] sm:$0xff] }
 0x269   : > { %1610 = vpow2.f32 %v932_v26  ;;  %v970_v53 = vadd.f32 %v1591_v30, %v1589_v48  ;;  %v1593_v59 = vpop.eup %1592  ;;  %v716_v35 = vmul.f32 1.442695, %v2587_v63  ;;  %v2592_v29 = vsub.f32 %v2590_v23, %v2591_v40  ;;  %v732_v23 = vld [vmem:[#allocation3 + $0x30] sm:$0xff] }
 0x26a   : > { %1612 = vpow2.f32 %v926_v45  ;;  %v1595_v28 = vpop.eup %1594  ;;  %v702_v58 = vmul.f32 1.442695, %v2589_v19  ;;  %v728_v45 = vld [vmem:[#allocation3 + $0x10] sm:$0xff]  ;;  %v738_v19 = vld [vmem:[#allocation3 + $0x60] sm:$0xff] }
 0x26b   : > { %1614 = vpow2.f32 %v928_v46  ;;  %v1597_v61 = vpop.eup %1596  ;;  %971 = vadd.xlane.f32.xlu0 %v970_v53  ;;  %v973_v54 = vadd.f32 %v1595_v28, %v1593_v59  ;;  %v718_v48 = vmul.f32 1.442695, %v2592_v29  ;;  %v2593_v53 = vld [vmem:[#allocation5_spill] sm:$0xff]  ;;  %v2594_v59 = vld [vmem:[#allocation7_spill] sm:$0xff] }
 0x26c   : > { %v1599_v15 = vpop.eup %1598  ;;  %1616 = vpow2.f32 %v694_v21  ;;  %v2595_v28 = vsub.f32 %v2593_v53, %v2594_v59 }
 0x26d   : > { %v949_v16 = vadd.f32 %v1599_v15, %v1597_v61  ;;  %1618 = vpow2.f32 %v712_v47 }
 0x26e   : > { %1620 = vpow2.f32 %v710_v57  ;;  %v704_v61 = vmul.f32 1.442695, %v2595_v28 }
 0x26f   : > { %v1601_v33 = vpop.eup %1600  ;;  %950 = vadd.xlane.f32.xlu1 %v949_v16  ;;  %1622 = vpow2.f32 %v696_v22  ;;  %v2602_v22 = vld [vmem:[#allocation13_spill] sm:$0xff] }
 0x270   : > { %v1603_v38 = vpop.eup %1602  ;;  %1624 = vpow2.f32 %v698_v6  ;;  %v2604_v6 = vsub.f32 %v2602_v22, %v2603_v39 }
 0x271   : > { %v952_v11 = vadd.f32 %v1603_v38, %v1601_v33  ;;  %1626 = vpow2.f32 %v714_v50  ;;  %v736_v38 = vld [vmem:[#allocation3 + $0x50] sm:$0xff]  ;;  %v730_v50 = vld [vmem:[#allocation3 + $0x20] sm:$0xff] }
 0x272   : > { %1628 = vpow2.f32 %v700_v51  ;;  %v2606_v51 = vld [vmem:[#allocation16_spill] sm:$0xff] }
 0x273   : > { %v1605_v1 = vpop.eup %1604  ;;  %953 = vadd.xlane.f32.xlu0 %v952_v11  ;;  %974 = vadd.xlane.f32.xlu1 %v973_v54  ;;  %1630 = vpow2.f32 %v716_v35  ;;  %v2596_v11 = vld [vmem:[#allocation10_spill] sm:$0xff] }
 0x274   : > { %v1607_v55 = vpop.eup %1606  ;;  %1632 = vpow2.f32 %v702_v58 }
 0x275   : > { %v1609_v10 = vpop.eup %1608  ;;  %v955_v37 = vadd.f32 %v1607_v55, %v1605_v1  ;;  %1634 = vpow2.f32 %v718_v48  ;;  %v2597_v1 = vld [vmem:[#allocation12_spill] sm:$0xff] }
 0x276   : > { %v1611_v2 = vpop.eup %1610  ;;  %v2598_v54 = vsub.f32 %v2596_v11, %v2597_v1  ;;  %1636 = vpow2.f32 %v704_v61  ;;  %v733_v61 = vld [vmem:[#allocation3 + $0x38] sm:$0xff] }
 0x277   : > { %v1613_v32 = vpop.eup %1612  ;;  %956 = vadd.xlane.f32.xlu1 %v955_v37  ;;  %v979_v34 = vadd.f32 %v1611_v2, %v1609_v10  ;;  %v729_v2 = vld [vmem:[#allocation3 + $0x18] sm:$0xff] }
 0x278   : > { %v1615_v12 = vpop.eup %1614  ;;  %v706_v55 = vmul.f32 1.442695, %v2598_v54  ;;  %v741_v54 = vld [vmem:[#allocation3 + $0x78] sm:$0xff] }
 0x279   : > { %v976_v13 = vadd.f32 %v1615_v12, %v1613_v32  ;;  %v1617_v17 = vpop.eup %1616  ;;  %v2599_v32 = vld [vmem:[#allocation9_spill] sm:$0xff]  ;;  %v2600_v12 = vld [vmem:[#allocation11_spill] sm:$0xff] }
 0x27a   : > { %v742_v43 = vmul.f32 %v1617_v17, %v726_v42  ;;  %v1619_v8 = vpop.eup %1618  ;;  %1638 = vpow2.f32 %v706_v55  ;;  %v708_v17 = vmul.f32 1.442695, %v2604_v6 }
 0x27b   : > { %977 = vadd.xlane.f32.xlu0 %v976_v13  ;;  %980 = vadd.xlane.f32.xlu1 %v979_v34  ;;  %v1621_v18 = vpop.eup %1620  ;;  %v751_v4 = vmul.f32 %v1619_v8, %v735_v62  ;;  %v2601_v13 = vsub.f32 %v2599_v32, %v2600_v12 }
 0x27c   : > { %v750_v9 = vmul.f32 %v1621_v18, %v734_v56  ;;  %v1623_v44 = vpop.eup %1622  ;;  %v2609_v18 = vld [vmem:[#allocation18_spill] sm:$0xff] }
 0x27d   : > { %v743_v24 = vmul.f32 %v1623_v44, %v727_v36  ;;  %v1625_v30 = vpop.eup %1624  ;;  %v720_v34 = vmul.f32 1.442695, %v2601_v13 }
 0x27e   : > { %v744_v15 = vmul.f32 %v1625_v30, %v728_v45  ;;  %v1627_v33 = vpop.eup %1626 }
 0x27f   : > { %v1629_v37 = vpop.eup %1628  ;;  %v752_v5 = vmul.f32 %v1627_v33, %v736_v38  ;;  %1640 = vpow2.f32 %v720_v34 }
 0x280   : > { %v745_v47 = vmul.f32 %v1629_v37, %v729_v2  ;;  %v1631_v0 = vpop.eup %1630  ;;  %1642 = vpow2.f32 %v708_v17 }
 0x281   : > { %v1633_v41 = vpop.eup %1632 }
 0x282   : > { %v746_v35 = vmul.f32 %v1633_v41, %v730_v50 }
 0x2d8   : > { %v936_v52 = vpop.xlane.xlu1 %935 }
 0x2d9   : > { %v982_v14 = vadd.f32 %v936_v52, %v742_v43  ;;  %v2607_v43 = vsub.f32 %v2605_v7, %v2606_v51  ;;  %v753_v52 = vmul.f32 %v1631_v0, %v737_v49 }
 0x2db   : > { %999 = vst.msk [vmem:[#allocation3] sm:$0xff] %vm998_vm4, %v982_v14  ;;  %v722_v8 = vmul.f32 1.442695, %v2607_v43  ;;  %v2608_v14 = vld [vmem:[#allocation17_spill] sm:$0xff] }
 0x2dc   : > { %v963_v20 = vpop.xlane.xlu1 %962  ;;  %v2610_v56 = vsub.f32 %v2608_v14, %v2609_v18 }
 0x2dd   : > { %v991_v26 = vadd.f32 %v963_v20, %v751_v4  ;;  %v1635_v20 = vpop.eup %1634  ;;  %1644 = vpow2.f32 %v722_v8 }
 0x2de   : > { %v960_v31 = vpop.xlane.xlu0 %959  ;;  %v724_v63 = vmul.f32 1.442695, %v2610_v56 }
 0x2df   : > { %v990_v27 = vadd.f32 %v960_v31, %v750_v9  ;;  %1008 = vst.msk [vmem:[#allocation3 + $0x48] sm:$0xff] %vm998_vm4, %v991_v26  ;;  %v754_v9 = vmul.f32 %v1635_v20, %v738_v19  ;;  %v1637_v26 = vpop.eup %1636  ;;  %v731_v31 = vld [vmem:[#allocation3 + $0x28] sm:$0xff] }
 0x2e0   : > { %1646 = vpow2.f32 %v724_v63  ;;  %v747_v40 = vmul.f32 %v1637_v26, %v731_v31 }
 0x2e1   : > { %1007 = vst.msk [vmem:[#allocation3 + $0x40] sm:$0xff] %vm998_vm4, %v990_v27  ;;  %v1639_v27 = vpop.eup %1638 }
 0x2e2   : > { %v939_v25 = vpop.xlane.xlu0 %938  ;;  %v1641_v29 = vpop.eup %1640 }
 0x2e3   : > { %v983_v46 = vadd.f32 %v939_v25, %v743_v24  ;;  %v739_v24 = vld [vmem:[#allocation3 + $0x68] sm:$0xff]  ;;  %v748_v25 = vmul.f32 %v1639_v27, %v732_v23  ;;  %v1643_v59 = vpop.eup %1642 }
 0x2e4   : > { %v755_v53 = vmul.f32 %v1641_v29, %v739_v24  ;;  %v749_v38 = vmul.f32 %v1643_v59, %v733_v61 }
 0x2e5   : > { %1000 = vst.msk [vmem:[#allocation3 + $0x8] sm:$0xff] %vm998_vm4, %v983_v46 }
 0x2e6   : > { %v942_v16 = vpop.xlane.xlu0 %941 }
 0x2e7   : > { %v984_v10 = vadd.f32 %v942_v16, %v744_v15  ;;  %v740_v16 = vld [vmem:[#allocation3 + $0x70] sm:$0xff] }
 0x2e9   : > { %1001 = vst.msk [vmem:[#allocation3 + $0x10] sm:$0xff] %vm998_vm4, %v984_v10 }
 0x2ea   : > { %v966_v21 = vpop.xlane.xlu0 %965  ;;  %v1645_v33 = vpop.eup %1644 }
 0x2eb   : > { %v992_v60 = vadd.f32 %v966_v21, %v752_v5  ;;  %v756_v10 = vmul.f32 %v1645_v33, %v740_v16 }
 0x2ec   : > { %v945_v57 = vpop.xlane.xlu1 %944 }
 0x2ed   : > { %1009 = vst.msk [vmem:[#allocation3 + $0x50] sm:$0xff] %vm998_vm4, %v992_v60  ;;  %v985_v42 = vadd.f32 %v945_v57, %v745_v47  ;;  %v1647_v11 = vpop.eup %1646 }
 0x2ee   : > { %v757_v32 = vmul.f32 %v1647_v11, %v741_v54 }
 0x2ef   : > { %1002 = vst.msk [vmem:[#allocation3 + $0x18] sm:$0xff] %vm998_vm4, %v985_v42 }
 0x2f0   : > { %v969_v62 = vpop.xlane.xlu1 %968  ;;  %v948_v3 = vpop.xlane.xlu0 %947 }
 0x2f1   : > { %v993_v4 = vadd.f32 %v969_v62, %v753_v52  ;;  %v986_v58 = vadd.f32 %v948_v3, %v746_v35 }
 0x2f3   : > { %1010 = vst.msk [vmem:[#allocation3 + $0x58] sm:$0xff] %vm998_vm4, %v993_v4  ;;  %1003 = vst.msk [vmem:[#allocation3 + $0x20] sm:$0xff] %vm998_vm4, %v986_v58 }
 0x2f4   : > { %v972_v44 = vpop.xlane.xlu0 %971 }
 0x2f5   : > { %v994_v36 = vadd.f32 %v972_v44, %v754_v9 }
 0x2f7   : > { %1011 = vst.msk [vmem:[#allocation3 + $0x60] sm:$0xff] %vm998_vm4, %v994_v36 }
 0x2f8   : > { %v951_v48 = vpop.xlane.xlu1 %950 }
 0x2f9   : > { %v987_v30 = vadd.f32 %v951_v48, %v747_v40 }
 0x2fb   : > { %1004 = vst.msk [vmem:[#allocation3 + $0x28] sm:$0xff] %vm998_vm4, %v987_v30 }
 0x2fc   : > { %v954_v45 = vpop.xlane.xlu0 %953  ;;  %v975_v28 = vpop.xlane.xlu1 %974 }
 0x2fd   : > { %v988_v46 = vadd.f32 %v954_v45, %v748_v25  ;;  %v995_v15 = vadd.f32 %v975_v28, %v755_v53 }
 0x2ff   : > { %1005 = vst.msk [vmem:[#allocation3 + $0x30] sm:$0xff] %vm998_vm4, %v988_v46  ;;  %1012 = vst.msk [vmem:[#allocation3 + $0x68] sm:$0xff] %vm998_vm4, %v995_v15 }
 0x300   : > { %v957_v1 = vpop.xlane.xlu1 %956 }
 0x301   : > { %v989_v55 = vadd.f32 %v957_v1, %v749_v38 }
 0x303   : > { %1006 = vst.msk [vmem:[#allocation3 + $0x38] sm:$0xff] %vm998_vm4, %v989_v55  ;;  %1034 = sbr.rel (%p1424_p8) target bundleno = 877 (0x36d), region = 36 }
 0x304   : > { %v978_v37 = vpop.xlane.xlu0 %977  ;;  %v981_v12 = vpop.xlane.xlu1 %980 }
 0x305   : > { %v996_v2 = vadd.f32 %v978_v37, %v756_v10  ;;  %v997_v13 = vadd.f32 %v981_v12, %v757_v32 }
 0x307   : > { %1013 = vst.msk [vmem:[#allocation3 + $0x70] sm:$0xff] %vm998_vm4, %v996_v2  ;;  %1014 = vst.msk [vmem:[#allocation3 + $0x78] sm:$0xff] %vm998_vm4, %v997_v13 }
 0x308   : > { %v1051_v34 = vld [vmem:[#allocation3] sm:$0xff]  ;;  %v1052_v5 = vld [vmem:[#allocation3 + $0x8] sm:$0xff]  ;;  %v1053_v21 = vld [vmem:[#allocation3 + $0x10] sm:$0xff] }
 0x309   : > { %1648 = vlog2.f32 %v1051_v34  ;;  %v1054_v60 = vld [vmem:[#allocation3 + $0x18] sm:$0xff]  ;;  %v1055_v47 = vld [vmem:[#allocation3 + $0x20] sm:$0xff]  ;;  %v1056_v0 = vld [vmem:[#allocation3 + $0x28] sm:$0xff] }
 0x30a   : > { %1650 = vlog2.f32 %v1052_v5  ;;  %v1057_v57 = vld [vmem:[#allocation3 + $0x30] sm:$0xff]  ;;  %v1058_v49 = vld [vmem:[#allocation3 + $0x38] sm:$0xff]  ;;  %v1059_v22 = vld [vmem:[#allocation3 + $0x40] sm:$0xff] }
 0x30b   : > { %1652 = vlog2.f32 %v1053_v21  ;;  %v1060_v39 = vld [vmem:[#allocation3 + $0x48] sm:$0xff]  ;;  %v1061_v6 = vld [vmem:[#allocation3 + $0x50] sm:$0xff]  ;;  %v1062_v17 = vld [vmem:[#allocation3 + $0x58] sm:$0xff] }
 0x30c   : > { %1654 = vlog2.f32 %v1054_v60  ;;  %v1035_v41 = vld [vmem:[#allocation2] sm:$0xff]  ;;  %v1036_v43 = vld [vmem:[#allocation2 + $0x8] sm:$0xff]  ;;  %v1037_v14 = vld [vmem:[#allocation2 + $0x10] sm:$0xff] }
 0x30d   : > { %1656 = vlog2.f32 %v1055_v47  ;;  %v1063_v50 = vld [vmem:[#allocation3 + $0x60] sm:$0xff]  ;;  %v1064_v8 = vld [vmem:[#allocation3 + $0x68] sm:$0xff]  ;;  %v1038_v4 = vld [vmem:[#allocation2 + $0x18] sm:$0xff] }
 0x30e   : > { %1658 = vlog2.f32 %v1056_v0  ;;  %v1065_v18 = vld [vmem:[#allocation3 + $0x70] sm:$0xff]  ;;  %v1066_v20 = vld [vmem:[#allocation3 + $0x78] sm:$0xff]  ;;  %v1039_v9 = vld [vmem:[#allocation2 + $0x20] sm:$0xff] }
 0x30f   : > { %1660 = vlog2.f32 %v1057_v57  ;;  %v1040_v27 = vld [vmem:[#allocation2 + $0x28] sm:$0xff]  ;;  %v1041_v55 = vld [vmem:[#allocation2 + $0x30] sm:$0xff]  ;;  %v1042_v57 = vld [vmem:[#allocation2 + $0x38] sm:$0xff] }
 0x310   : > { %1662 = vlog2.f32 %v1058_v49 }
 0x311   : > { %1664 = vlog2.f32 %v1059_v22 }
 0x312   : > { %1666 = vlog2.f32 %v1060_v39 }
 0x313   : > { %1668 = vlog2.f32 %v1061_v6 }
 0x314   : > { %1670 = vlog2.f32 %v1062_v17 }
 0x315   : > { %1672 = vlog2.f32 %v1063_v50 }
 0x316   : > { %v1649_v42 = vpop.eup %1648  ;;  %1674 = vlog2.f32 %v1064_v8 }
 0x317   : > { %v1651_v7 = vpop.eup %1650  ;;  %v1068_v51 = vmul.f32 0.6931472, %v1649_v42  ;;  %1676 = vlog2.f32 %v1065_v18 }
 0x318   : > { %v1653_v52 = vpop.eup %1652  ;;  %v1070_v62 = vmul.f32 0.6931472, %v1651_v7  ;;  %1678 = vlog2.f32 %v1066_v20 }
 0x319   : > { %v1655_v56 = vpop.eup %1654  ;;  %v1099_v63 = vadd.f32 %v1068_v51, %v1035_v41  ;;  %v1072_v35 = vmul.f32 0.6931472, %v1653_v52  ;;  %v1043_v52 = vld [vmem:[#allocation2 + $0x40] sm:$0xff] }
 0x31a   : > { %v1657_v3 = vpop.eup %1656  ;;  %v1100_v19 = vadd.f32 %v1070_v62, %v1036_v43  ;;  %v1074_v58 = vmul.f32 0.6931472, %v1655_v56  ;;  %v1044_v62 = vld [vmem:[#allocation2 + $0x48] sm:$0xff] }
 0x31b   : > { %v1659_v26 = vpop.eup %1658  ;;  %v2411_v44 = vmax.f32 %v1099_v63, -18.420681  ;;  %v1101_v31 = vadd.f32 %v1072_v35, %v1037_v14  ;;  %v1076_v36 = vmul.f32 0.6931472, %v1657_v3 }
 0x31c   : > { %v2413_v23 = vmax.f32 %v1100_v19, -18.420681  ;;  %v1102_v40 = vadd.f32 %v1074_v58, %v1038_v4  ;;  %v1078_v29 = vmul.f32 0.6931472, %v1659_v26  ;;  %v1661_v16 = vpop.eup %1660 }
 0x31d   : > { %v1131_v48 = vsub.f32 %v1099_v63, %v2411_v44  ;;  %v1179_v24 = vsub.f32 -18.420681, %v2411_v44  ;;  %v2417_v30 = vmax.f32 %v1101_v31, -18.420681  ;;  %v1103_v25 = vadd.f32 %v1076_v36, %v1039_v9  ;;  %v1663_v10 = vpop.eup %1662 }
 0x31e   : > { %v1132_v45 = vsub.f32 %v1100_v19, %v2413_v23  ;;  %v1180_v46 = vsub.f32 -18.420681, %v2413_v23  ;;  %v2421_v53 = vmax.f32 %v1102_v40, -18.420681  ;;  %v1104_v59 = vadd.f32 %v1078_v29, %v1040_v27  ;;  %v1665_v12 = vpop.eup %1664  ;;  %v1046_v29 = vld [vmem:[#allocation2 + $0x58] sm:$0xff] }
 0x31f   : > { %v1147_v28 = vmul.f32 1.442695, %v1131_v48  ;;  %v1195_v61 = vmul.f32 1.442695, %v1179_v24  ;;  %v1133_v15 = vsub.f32 %v1101_v31, %v2417_v30  ;;  %v1181_v33 = vsub.f32 -18.420681, %v2417_v30  ;;  %v1667_v21 = vpop.eup %1666 }
 0x320   : > { %v1149_v38 = vmul.f32 1.442695, %v1132_v45  ;;  %v1197_v11 = vmul.f32 1.442695, %v1180_v46  ;;  %v1134_v1 = vsub.f32 %v1102_v40, %v2421_v53  ;;  %v1182_v54 = vsub.f32 -18.420681, %v2421_v53  ;;  %v1669_v49 = vpop.eup %1668 }
 0x321   : > { %1680 = vpow2.f32 %v1147_v28  ;;  %v1151_v37 = vmul.f32 1.442695, %v1133_v15  ;;  %v1199_v2 = vmul.f32 1.442695, %v1181_v33  ;;  %v2427_v32 = vmax.f32 %v1103_v25, -18.420681  ;;  %v1671_v17 = vpop.eup %1670 }
 0x322   : > { %1682 = vpow2.f32 %v1195_v61  ;;  %v1153_v13 = vmul.f32 1.442695, %v1134_v1  ;;  %v1201_v34 = vmul.f32 1.442695, %v1182_v54  ;;  %v2429_v5 = vmax.f32 %v1104_v59, -18.420681  ;;  %v2435_v7 = vpop.eup %1672 }
 0x323   : > { %1684 = vpow2.f32 %v1149_v38  ;;  %v1135_v60 = vsub.f32 %v1103_v25, %v2427_v32  ;;  %v1183_v47 = vsub.f32 -18.420681, %v2427_v32  ;;  %v1080_v0 = vmul.f32 0.6931472, %v1661_v16  ;;  %v1675_v14 = vpop.eup %1674  ;;  %v1045_v40 = vld [vmem:[#allocation2 + $0x50] sm:$0xff] }
 0x324   : > { %1686 = vpow2.f32 %v1197_v11  ;;  %v1136_v22 = vsub.f32 %v1104_v59, %v2429_v5  ;;  %v1184_v39 = vsub.f32 -18.420681, %v2429_v5  ;;  %v1082_v6 = vmul.f32 0.6931472, %v1663_v10  ;;  %v2439_v35 = vpop.eup %1676 }
 0x325   : > { %1688 = vpow2.f32 %v1151_v37  ;;  %v1155_v42 = vmul.f32 1.442695, %v1135_v60  ;;  %v1203_v41 = vmul.f32 1.442695, %v1183_v47  ;;  %v1105_v50 = vadd.f32 %v1080_v0, %v1041_v55  ;;  %v2443_v19 = vpop.eup %1678  ;;  %v1047_v47 = vld [vmem:[#allocation2 + $0x60] sm:$0xff] }
 0x326   : > { %1690 = vpow2.f32 %v1199_v2  ;;  %v1157_v51 = vmul.f32 1.442695, %v1136_v22  ;;  %v1205_v43 = vmul.f32 1.442695, %v1184_v39  ;;  %v1106_v8 = vadd.f32 %v1082_v6, %v1042_v57  ;;  %v1048_v22 = vld [vmem:[#allocation2 + $0x68] sm:$0xff] }
 0x327   : > { %1692 = vpow2.f32 %v1153_v13  ;;  %v2437_v18 = vmax.f32 %v1105_v50, -18.420681  ;;  %v1084_v56 = vmul.f32 0.6931472, %v1665_v12  ;;  %v1086_v63 = vmul.f32 0.6931472, %v1667_v21 }
 0x328   : > { %1694 = vpow2.f32 %v1201_v34  ;;  %v2441_v4 = vmax.f32 %v1106_v8, -18.420681  ;;  %v1088_v20 = vmul.f32 0.6931472, %v1669_v49  ;;  %v1090_v3 = vmul.f32 0.6931472, %v1671_v17 }
 0x329   : > { %1696 = vpow2.f32 %v1155_v42  ;;  %v1137_v58 = vsub.f32 %v1105_v50, %v2437_v18  ;;  %v1185_v9 = vsub.f32 -18.420681, %v2437_v18  ;;  %v1107_v26 = vadd.f32 %v1084_v56, %v1043_v52 }
 0x32a   : > { %1698 = vpow2.f32 %v1203_v41  ;;  %v1138_v31 = vsub.f32 %v1106_v8, %v2441_v4  ;;  %v1186_v36 = vsub.f32 -18.420681, %v2441_v4  ;;  %v1108_v27 = vadd.f32 %v1086_v63, %v1044_v62 }
 0x32b   : > { %1700 = vpow2.f32 %v1157_v51  ;;  %v1159_v48 = vmul.f32 1.442695, %v1137_v58  ;;  %v1207_v24 = vmul.f32 1.442695, %v1185_v9  ;;  %v2449_v25 = vmax.f32 %v1107_v26, -18.420681 }
 0x32c   : > { %1702 = vpow2.f32 %v1205_v43  ;;  %v1161_v45 = vmul.f32 1.442695, %v1138_v31  ;;  %v1209_v46 = vmul.f32 1.442695, %v1186_v36  ;;  %v2451_v59 = vmax.f32 %v1108_v27, -18.420681 }
 0x32d   : > { %1704 = vpow2.f32 %v1159_v48  ;;  %v1139_v28 = vsub.f32 %v1107_v26, %v2449_v25  ;;  %v1187_v61 = vsub.f32 -18.420681, %v2449_v25  ;;  %v1109_v15 = vadd.f32 %v1088_v20, %v1045_v40  ;;  %v1049_v43 = vld [vmem:[#allocation2 + $0x70] sm:$0xff] }
 0x32e   : > { %v1681_v33 = vpop.eup %1680  ;;  %1706 = vpow2.f32 %v1207_v24  ;;  %v1140_v16 = vsub.f32 %v1108_v27, %v2451_v59  ;;  %v1188_v38 = vsub.f32 -18.420681, %v2451_v59  ;;  %v1110_v11 = vadd.f32 %v1090_v3, %v1046_v29  ;;  %v1050_v24 = vld [vmem:[#allocation2 + $0x78] sm:$0xff] }
 0x32f   : > { %v1683_v1 = vpop.eup %1682  ;;  %1708 = vpow2.f32 %v1161_v45  ;;  %v1163_v54 = vmul.f32 1.442695, %v1139_v28  ;;  %v1211_v55 = vmul.f32 1.442695, %v1187_v61  ;;  %v2457_v10 = vmax.f32 %v1109_v15, -18.420681 }
 0x330   : > { %v1685_v37 = vpop.eup %1684  ;;  %v1227_v2 = vadd.f32 %v1683_v1, %v1681_v33  ;;  %1710 = vpow2.f32 %v1209_v46  ;;  %v1165_v12 = vmul.f32 1.442695, %v1140_v16  ;;  %v2461_v60 = vmax.f32 %v1110_v11, -18.420681 }
 0x331   : > { %v1687_v13 = vpop.eup %1686  ;;  %1712 = vpow2.f32 %v1163_v54  ;;  %v1141_v34 = vsub.f32 %v1109_v15, %v2457_v10  ;;  %v1189_v21 = vsub.f32 -18.420681, %v2457_v10  ;;  %v1092_v49 = vmul.f32 0.6931472, %v2435_v7 }
 0x332   : > { %v1689_v0 = vpop.eup %1688  ;;  %1714 = vlog2.f32 %v1227_v2  ;;  %v1228_v57 = vadd.f32 %v1687_v13, %v1685_v37  ;;  %v1094_v39 = vmul.f32 0.6931472, %v1675_v14  ;;  %v1213_v17 = vmul.f32 1.442695, %v1188_v38 }
 0x333   : > { %v1691_v6 = vpop.eup %1690  ;;  %1716 = vpow2.f32 %v1211_v55  ;;  %v1167_v50 = vmul.f32 1.442695, %v1141_v34  ;;  %v1111_v51 = vadd.f32 %v1092_v49, %v1047_v47  ;;  %v1142_v52 = vsub.f32 %v1110_v11, %v2461_v60 }
 0x334   : > { %v1693_v42 = vpop.eup %1692  ;;  %1718 = vlog2.f32 %v1228_v57  ;;  %v1229_v41 = vadd.f32 %v1691_v6, %v1689_v0  ;;  %v1112_v62 = vadd.f32 %v1094_v39, %v1048_v22  ;;  %v1096_v56 = vmul.f32 0.6931472, %v2439_v35 }
 0x335   : > { %v1695_v8 = vpop.eup %1694  ;;  %1720 = vpow2.f32 %v1165_v12  ;;  %v1215_v14 = vmul.f32 1.442695, %v1189_v21  ;;  %v2466_v20 = vmax.f32 %v1111_v51, -18.420681  ;;  %v1190_v58 = vsub.f32 -18.420681, %v2461_v60 }
 0x336   : > { %v1697_v63 = vpop.eup %1696  ;;  %1722 = vlog2.f32 %v1229_v41  ;;  %v1230_v7 = vadd.f32 %v1695_v8, %v1693_v42  ;;  %v2469_v9 = vmax.f32 %v1112_v62, -18.420681  ;;  %v1113_v26 = vadd.f32 %v1096_v56, %v1049_v43 }
 0x337   : > { %v1699_v3 = vpop.eup %1698  ;;  %1724 = vpow2.f32 %v1213_v17  ;;  %v1098_v27 = vmul.f32 0.6931472, %v2443_v19  ;;  %v1169_v35 = vmul.f32 1.442695, %v1142_v52  ;;  %v1143_v29 = vsub.f32 %v1111_v51, %v2466_v20 }
 0x338   : > { %v1701_v31 = vpop.eup %1700  ;;  %1726 = vlog2.f32 %v1230_v7  ;;  %v1231_v36 = vadd.f32 %v1699_v3, %v1697_v63  ;;  %v2473_v48 = vmax.f32 %v1113_v26, -18.420681  ;;  %v1191_v28 = vsub.f32 -18.420681, %v2466_v20 }
 0x339   : > { %v1703_v40 = vpop.eup %1702  ;;  %1728 = vpow2.f32 %v1167_v50  ;;  %v1217_v15 = vmul.f32 1.442695, %v1190_v58  ;;  %v1144_v33 = vsub.f32 %v1112_v62, %v2469_v9  ;;  %v1192_v38 = vsub.f32 -18.420681, %v2469_v9 }
 0x33a   : > { %v1705_v45 = vpop.eup %1704  ;;  %1730 = vlog2.f32 %v1231_v36  ;;  %v1232_v46 = vadd.f32 %v1703_v40, %v1701_v31  ;;  %v1114_v11 = vadd.f32 %v1098_v27, %v1050_v24  ;;  %v1171_v54 = vmul.f32 1.442695, %v1143_v29 }
 0x33b   : > { %v1707_v61 = vpop.eup %1706  ;;  %1732 = vpow2.f32 %v1215_v14  ;;  %v1145_v55 = vsub.f32 %v1113_v26, %v2473_v48  ;;  %v1219_v12 = vmul.f32 1.442695, %v1191_v28  ;;  %v1173_v21 = vmul.f32 1.442695, %v1144_v33 }
 0x33c   : > { %v1709_v16 = vpop.eup %1708  ;;  %1734 = vlog2.f32 %v1232_v46  ;;  %v1233_v19 = vadd.f32 %v1707_v61, %v1705_v45  ;;  %v2479_v13 = vmax.f32 %v1114_v11, -18.420681  ;;  %v1221_v57 = vmul.f32 1.442695, %v1192_v38 }
 0x33d   : > { %v1711_v1 = vpop.eup %1710  ;;  %1736 = vpow2.f32 %v1169_v35  ;;  %v1193_v49 = vsub.f32 -18.420681, %v2473_v48  ;;  %v1175_v6 = vmul.f32 1.442695, %v1145_v55 }
 0x33e   : > { %v1713_v37 = vpop.eup %1712  ;;  %1738 = vlog2.f32 %v1233_v19  ;;  %v1234_v2 = vadd.f32 %v1711_v1, %v1709_v16  ;;  %v1146_v17 = vsub.f32 %v1114_v11, %v2479_v13  ;;  %v1194_v51 = vsub.f32 -18.420681, %v2479_v13 }
 0x33f   : > { %v1715_v34 = vpop.eup %1714  ;;  %1740 = vpow2.f32 %v1217_v15  ;;  %v1223_v56 = vmul.f32 1.442695, %v1193_v49 }
 0x340   : > { %v1717_v47 = vpop.eup %1716  ;;  %v1244_v0 = vmul.f32 0.6931472, %v1715_v34  ;;  %1742 = vlog2.f32 %v1234_v2  ;;  %v1225_v26 = vmul.f32 1.442695, %v1194_v51 }
 0x341   : > { %v1719_v22 = vpop.eup %1718  ;;  %v1235_v39 = vadd.f32 %v1717_v47, %v1713_v37  ;;  %1744 = vpow2.f32 %v1171_v54 }
 0x342   : > { %v1721_v42 = vpop.eup %1720  ;;  %v1275_v41 = vadd.f32 %v1244_v0, %v2411_v44  ;;  %v1246_v50 = vmul.f32 0.6931472, %v1719_v22  ;;  %1746 = vpow2.f32 %v1219_v12  ;;  %v1177_v44 = vmul.f32 1.442695, %v1146_v17 }
 0x343   : > { %v1723_v43 = vpop.eup %1722  ;;  %1748 = vlog2.f32 %v1235_v39 }
 0x344   : > { %v1725_v8 = vpop.eup %1724  ;;  %1291 = vst.msk [vmem:[%s1880_s28] sm:$0xff] %vm998_vm4, %v1275_v41  ;;  %v1276_v52 = vadd.f32 %v1246_v50, %v2413_v23  ;;  %v1248_v62 = vmul.f32 0.6931472, %v1723_v43  ;;  %1750 = vpow2.f32 %v1173_v21 }
 0x345   : > { %v1727_v63 = vpop.eup %1726  ;;  %v1236_v7 = vadd.f32 %v1725_v8, %v1721_v42  ;;  %1752 = vpow2.f32 %v1221_v57 }
 0x346   : > { %v1729_v14 = vpop.eup %1728  ;;  %1292 = vst.msk [vmem:[%s1880_s28 + $0x8] sm:$0xff] %vm998_vm4, %v1276_v52  ;;  %v1277_v3 = vadd.f32 %v1248_v62, %v2417_v30  ;;  %v1250_v58 = vmul.f32 0.6931472, %v1727_v63  ;;  %1754 = vpow2.f32 %v1175_v6 }
 0x347   : > { %v1731_v31 = vpop.eup %1730  ;;  %1756 = vlog2.f32 %v1236_v7 }
 0x348   : > { %v1733_v23 = vpop.eup %1732  ;;  %1293 = vst.msk [vmem:[%s1880_s28 + $0x10] sm:$0xff] %vm998_vm4, %v1277_v3  ;;  %v1278_v36 = vadd.f32 %v1250_v58, %v2421_v53  ;;  %v1252_v27 = vmul.f32 0.6931472, %v1731_v31  ;;  %1758 = vpow2.f32 %v1223_v56 }
 0x349   : > { %v1735_v40 = vpop.eup %1734  ;;  %v1237_v35 = vadd.f32 %v1733_v23, %v1729_v14  ;;  %1760 = vpow2.f32 %v1177_v44 }
 0x34a   : > { %v1737_v29 = vpop.eup %1736  ;;  %1294 = vst.msk [vmem:[%s1880_s28 + $0x18] sm:$0xff] %vm998_vm4, %v1278_v36  ;;  %v1279_v30 = vadd.f32 %v1252_v27, %v2427_v32  ;;  %v1254_v24 = vmul.f32 0.6931472, %v1735_v40  ;;  %1762 = vpow2.f32 %v1225_v26 }
 0x34b   : > { %v1739_v45 = vpop.eup %1738  ;;  %1764 = vlog2.f32 %v1237_v35 }
 0x34c   : > { %v1741_v46 = vpop.eup %1740  ;;  %1295 = vst.msk [vmem:[%s1880_s28 + $0x20] sm:$0xff] %vm998_vm4, %v1279_v30  ;;  %v1280_v53 = vadd.f32 %v1254_v24, %v2429_v5  ;;  %v1256_v28 = vmul.f32 0.6931472, %v1739_v45 }
 0x34d   : > { %v1743_v61 = vpop.eup %1742  ;;  %v1238_v15 = vadd.f32 %v1741_v46, %v1737_v29 }
 0x34e   : > { %v1745_v33 = vpop.eup %1744  ;;  %1296 = vst.msk [vmem:[%s1880_s28 + $0x28] sm:$0xff] %vm998_vm4, %v1280_v53  ;;  %v1281_v16 = vadd.f32 %v1256_v28, %v2437_v18  ;;  %v1258_v32 = vmul.f32 0.6931472, %v1743_v61 }
 0x34f   : > { %v1747_v19 = vpop.eup %1746  ;;  %1766 = vlog2.f32 %v1238_v15 }
 0x350   : > { %v1749_v38 = vpop.eup %1748  ;;  %1297 = vst.msk [vmem:[%s1880_s28 + $0x30] sm:$0xff] %vm998_vm4, %v1281_v16  ;;  %v1282_v11 = vadd.f32 %v1258_v32, %v2441_v4  ;;  %v1239_v1 = vadd.f32 %v1747_v19, %v1745_v33 }
 0x351   : > { %v1751_v5 = vpop.eup %1750  ;;  %v1260_v54 = vmul.f32 0.6931472, %v1749_v38 }
 0x352   : > { %v1753_v55 = vpop.eup %1752  ;;  %1298 = vst.msk [vmem:[%s1880_s28 + $0x38] sm:$0xff] %vm998_vm4, %v1282_v11  ;;  %1768 = vlog2.f32 %v1239_v1 }
 0x353   : > { %v1755_v37 = vpop.eup %1754  ;;  %v1283_v18 = vadd.f32 %v1260_v54, %v2449_v25  ;;  %v1240_v2 = vadd.f32 %v1753_v55, %v1751_v5 }
 0x354   : > { %v1757_v12 = vpop.eup %1756 }
 0x355   : > { %v1759_v34 = vpop.eup %1758  ;;  %1299 = vst.msk [vmem:[%s1880_s28 + $0x40] sm:$0xff] %vm998_vm4, %v1283_v18  ;;  %v1262_v21 = vmul.f32 0.6931472, %v1757_v12  ;;  %1770 = vlog2.f32 %v1240_v2 }
 0x356   : > { %v1761_v4 = vpop.eup %1760  ;;  %v1241_v47 = vadd.f32 %v1759_v34, %v1755_v37 }
 0x357   : > { %v1763_v0 = vpop.eup %1762  ;;  %v1284_v57 = vadd.f32 %v1262_v21, %v2451_v59 }
 0x358   : > { %v1765_v49 = vpop.eup %1764  ;;  %1772 = vlog2.f32 %v1241_v47  ;;  %v1242_v22 = vadd.f32 %v1763_v0, %v1761_v4 }
 0x359   : > { %1300 = vst.msk [vmem:[%s1880_s28 + $0x48] sm:$0xff] %vm998_vm4, %v1284_v57  ;;  %v1264_v25 = vmul.f32 0.6931472, %v1765_v49 }
 0x35a   : > { %1774 = vlog2.f32 %v1242_v22 }
 0x35b   : > { %v1285_v39 = vadd.f32 %v1264_v25, %v2457_v10 }
 0x35c   : > { %v1767_v6 = vpop.eup %1766 }
 0x35d   : > { %1301 = vst.msk [vmem:[%s1880_s28 + $0x50] sm:$0xff] %vm998_vm4, %v1285_v39  ;;  %v1266_v17 = vmul.f32 0.6931472, %v1767_v6 }
 0x35f   : > { %v1769_v42 = vpop.eup %1768  ;;  %v1286_v41 = vadd.f32 %v1266_v17, %v2461_v60 }
 0x360   : > { %v1268_v59 = vmul.f32 0.6931472, %v1769_v42 }
 0x361   : > { %1302 = vst.msk [vmem:[%s1880_s28 + $0x58] sm:$0xff] %vm998_vm4, %v1286_v41 }
 0x362   : > { %v1771_v50 = vpop.eup %1770  ;;  %v1287_v51 = vadd.f32 %v1268_v59, %v2466_v20 }
 0x363   : > { %v1270_v43 = vmul.f32 0.6931472, %v1771_v50 }
 0x364   : > { %1303 = vst.msk [vmem:[%s1880_s28 + $0x60] sm:$0xff] %vm998_vm4, %v1287_v51 }
 0x365   : > { %v1773_v10 = vpop.eup %1772  ;;  %v1288_v8 = vadd.f32 %v1270_v43, %v2469_v9 }
 0x366   : > { %v1272_v52 = vmul.f32 0.6931472, %v1773_v10 }
 0x367   : > { %v1775_v62 = vpop.eup %1774  ;;  %1304 = vst.msk [vmem:[%s1880_s28 + $0x68] sm:$0xff] %vm998_vm4, %v1288_v8 }
 0x368   : > { %v1289_v56 = vadd.f32 %v1272_v52, %v2473_v48  ;;  %v1274_v60 = vmul.f32 0.6931472, %v1775_v62 }
 0x36a   : > { %1305 = vst.msk [vmem:[%s1880_s28 + $0x70] sm:$0xff] %vm998_vm4, %v1289_v56  ;;  %v1290_v63 = vadd.f32 %v1274_v60, %v2479_v13 }
 0x36c   : > { %1306 = vst.msk [vmem:[%s1880_s28 + $0x78] sm:$0xff] %vm998_vm4, %v1290_v63 }
 0x36d PF: > { %s12_s13 = sadd.s32 1, %s1814_s13   ;;  %s2611_s9 = smov %s1806_s11 }
 0x36e   : > { %p9_p9 = scmp.ge.s32.totalorder %s12_s13, 8   ;;  %s2612_s10 = smov %s1810_s12 }
 0x36f   : > { %s2613_s11 = smov %s2616_s14  ;;  %s2614_s12 = smov %s2620_s15 }
 0x370   :  { %11 = sbr.rel (!%p9_p9) target bundleno = 3 (0x3), region = 69 }

// kernel: lightgcl_forward.6
= control target key start
LH: loop header
LB: loop body
LE: loop exit
PB: predicated region body
PF: predicated region fallthrough
CT: control target
= control target key end

     0   :  { %s1834_s9 = smov 0   ;;  %s1836_s10 = smov 0   ;;  %s2547_s0 = inlined_call_operand.vmem [shape: f32[256,32], index: 0, kind: input, shape index: {}]   ;;  %s2548_s1 = inlined_call_operand.vmem [shape: bf16[512,32], index: 1, kind: input, shape index: {}]   ;;  %s2549_s2 = inlined_call_operand.vmem [shape: f32[256,1], index: 2, kind: output, shape index: {}]  }
   0x1   :  { %s1838_s11 = smov 0   ;;  %s1840_s12 = smov 0  }
   0x2   :  { %s1842_s13 = smov 0  }
   0x3 LB: > { %s21_s14 = sadd.s32 1, %s1806_s11  ;;  %s24_s15 = sadd.s32 1, %s1810_s12  ;;  %s1814_s13 = sphi %s1842_s13, %s12_s13   ;;  %s1810_s12 = sphi %s1840_s12, %s2614_s12   ;;  %s1806_s11 = sphi %s1838_s11, %s2613_s11   ;;  %s1802_s10 = sphi %s1836_s10, %s2612_s10   ;;  %s1798_s9 = sphi %s1834_s9, %s2611_s9  }
   0x4   : > { %p22_p0 = scmp.ge.s32.totalorder %s21_s14, 2  ;;  %p1391_p1 = scmp.ge.s32.totalorder %s1814_s13, 1 }
   0x5   : > { %p136_p2 = scmp.lt.s32.totalorder %s1814_s13, 5 }
   0x6   : > { %s2616_s14 = smov (%p22_p0, %s21_s14), 0  ;;  %s2618_s15 = smov (!%p22_p0, %s24_s15), %s1810_s12 }
   0x7   : > { %p137_p3 = pnand %p1391_p1, %p136_p2  ;;  %p26_p4 = scmp.ge.s32.totalorder %s2618_s15, 2 }
   0x9   : > { %s2620_s15 = smov (%p26_p4, %s2618_s15), 0  ;;  %140 = sbr.rel (%p137_p3) target bundleno = 877 (0x36d), region = 28 }
   0xe   : > { %s1392_s16 = sshll.u32 %s1802_s10, 4  ;;  %s1394_s17 = sshll.u32 %s1798_s9, 5 }
   0xf   : > { %p164_p5 = scmp.lt.s32.totalorder %s1392_s16, 31  ;;  %p170_p6 = scmp.lt.s32.totalorder %s1394_s17, 63 }
  0x10   : > { %p1398_p7 = scmp.ne.s32.totalorder %s1798_s9, 0 }
  0x11   : > { %s2622_s16 = smov (!%p164_p5, %s1392_s16), 31  ;;  %s2624_s17 = smov (!%p170_p6, %s1394_s17), 63 }
  0x12   : > { %s1393_s18 = sshll.u32 %s2622_s16, 3  ;;  %s1395_s22 = sshll.u32 %s2624_s17, 2 }
  0x13   : > { %s1870_s21 = scalar_lea.vmem %s2547_s0, %s1393_s18  ;;  %s1875_s25 = scalar_lea.vmem %s2548_s1, %s1395_s22 }
  0x14   : > { %s1880_s28 = scalar_lea.vmem %s2549_s2, %s1393_s18  ;;  %185 = sbr.rel (%p1398_p7) target bundleno = 42 (0x2a), region = 32 }
  0x19   : > { %vm186_vm0 = vcmask 7168   ;;  %v1816_v0 = vmov -inf   ;;  %v1817_v1 = vmov 0.0  }
  0x1a   : > { %187 = vst.msk [vmem:[#allocation2] sm:$0xff] %vm186_vm0, %v1816_v0  ;;  %188 = vst.msk [vmem:[#allocation2 + $0x8] sm:$0xff] %vm186_vm0, %v1816_v0 }
  0x1b   : > { %189 = vst.msk [vmem:[#allocation2 + $0x10] sm:$0xff] %vm186_vm0, %v1816_v0  ;;  %190 = vst.msk [vmem:[#allocation2 + $0x18] sm:$0xff] %vm186_vm0, %v1816_v0 }
  0x1c   : > { %191 = vst.msk [vmem:[#allocation2 + $0x20] sm:$0xff] %vm186_vm0, %v1816_v0  ;;  %192 = vst.msk [vmem:[#allocation2 + $0x28] sm:$0xff] %vm186_vm0, %v1816_v0 }
  0x1d   : > { %193 = vst.msk [vmem:[#allocation2 + $0x30] sm:$0xff] %vm186_vm0, %v1816_v0  ;;  %194 = vst.msk [vmem:[#allocation2 + $0x38] sm:$0xff] %vm186_vm0, %v1816_v0 }
  0x1e   : > { %195 = vst.msk [vmem:[#allocation2 + $0x40] sm:$0xff] %vm186_vm0, %v1816_v0  ;;  %196 = vst.msk [vmem:[#allocation2 + $0x48] sm:$0xff] %vm186_vm0, %v1816_v0 }
  0x1f   : > { %197 = vst.msk [vmem:[#allocation2 + $0x50] sm:$0xff] %vm186_vm0, %v1816_v0  ;;  %198 = vst.msk [vmem:[#allocation2 + $0x58] sm:$0xff] %vm186_vm0, %v1816_v0 }
  0x20   : > { %199 = vst.msk [vmem:[#allocation2 + $0x60] sm:$0xff] %vm186_vm0, %v1816_v0  ;;  %200 = vst.msk [vmem:[#allocation2 + $0x68] sm:$0xff] %vm186_vm0, %v1816_v0 }
  0x21   : > { %201 = vst.msk [vmem:[#allocation2 + $0x70] sm:$0xff] %vm186_vm0, %v1816_v0  ;;  %202 = vst.msk [vmem:[#allocation2 + $0x78] sm:$0xff] %vm186_vm0, %v1816_v0 }
  0x22   : > { %203 = vst.msk [vmem:[#allocation3] sm:$0xff] %vm186_vm0, %v1817_v1  ;;  %204 = vst.msk [vmem:[#allocation3 + $0x8] sm:$0xff] %vm186_vm0, %v1817_v1 }
  0x23   : > { %205 = vst.msk [vmem:[#allocation3 + $0x10] sm:$0xff] %vm186_vm0, %v1817_v1  ;;  %206 = vst.msk [vmem:[#allocation3 + $0x18] sm:$0xff] %vm186_vm0, %v1817_v1 }
  0x24   : > { %207 = vst.msk [vmem:[#allocation3 + $0x20] sm:$0xff] %vm186_vm0, %v1817_v1  ;;  %208 = vst.msk [vmem:[#allocation3 + $0x28] sm:$0xff] %vm186_vm0, %v1817_v1 }
  0x25   : > { %209 = vst.msk [vmem:[#allocation3 + $0x30] sm:$0xff] %vm186_vm0, %v1817_v1  ;;  %210 = vst.msk [vmem:[#allocation3 + $0x38] sm:$0xff] %vm186_vm0, %v1817_v1 }
  0x26   : > { %211 = vst.msk [vmem:[#allocation3 + $0x40] sm:$0xff] %vm186_vm0, %v1817_v1  ;;  %212 = vst.msk [vmem:[#allocation3 + $0x48] sm:$0xff] %vm186_vm0, %v1817_v1 }
  0x27   : > { %213 = vst.msk [vmem:[#allocation3 + $0x50] sm:$0xff] %vm186_vm0, %v1817_v1  ;;  %214 = vst.msk [vmem:[#allocation3 + $0x58] sm:$0xff] %vm186_vm0, %v1817_v1 }
  0x28   : > { %215 = vst.msk [vmem:[#allocation3 + $0x60] sm:$0xff] %vm186_vm0, %v1817_v1  ;;  %216 = vst.msk [vmem:[#allocation3 + $0x68] sm:$0xff] %vm186_vm0, %v1817_v1 }
  0x29   : > { %217 = vst.msk [vmem:[#allocation3 + $0x70] sm:$0xff] %vm186_vm0, %v1817_v1  ;;  %218 = vst.msk [vmem:[#allocation3 + $0x78] sm:$0xff] %vm186_vm0, %v1817_v1 }
  0x2a PF: > { %v1536_v2 = vld [vmem:[%s1875_s25 + $0x78] sm:$0xff]   ;;  %vm371_vm1 = vcmask 261120   ;;  %v1538_v4 = vld [vmem:[%s1875_s25 + $0x70] sm:$0xff]   ;;  %v1540_v8 = vld [vmem:[%s1875_s25 + $0x68] sm:$0xff]   ;;  %s1423_s29 = sshll.u32 %s1798_s9, 8  ;;  %vm998_vm4 = vcmask 7168  }
  0x2b   : > { %v1537_v3 = vld [vmem:[%s1875_s25 + $0x38] sm:$0xff]   ;;  %1475 = vmatprep.subr.msk.bf16.mxu0 %vm371_vm1, %v1536_v2  ;;  %1476 = vmatprep.subr.msk.bf16.mxu1 %vm371_vm1, %v1536_v2  ;;  %v1539_v6 = vld [vmem:[%s1875_s25 + $0x30] sm:$0xff]   ;;  %v1541_v9 = vld [vmem:[%s1875_s25 + $0x28] sm:$0xff]   ;;  %v558_v2 = vlaneseq  ;;  %p1424_p8 = scmp.ne.s32.totalorder %s1798_s9, 1 }
  0x2c   : > { %v418_v5 = vsel %vm371_vm1, %v1537_v3, 0  ;;  %v415_v7 = vsel %vm371_vm1, %v1539_v6, 0  ;;  %v219_v10 = vld [vmem:[%s1870_s21] sm:$0xff]  ;;  %v220_v11 = vld [vmem:[%s1870_s21 + $0x8] sm:$0xff]  ;;  %v412_v13 = vsel %vm371_vm1, %v1541_v9, 0  ;;  %v1544_v24 = vld [vmem:[%s1875_s25 + $0x58] sm:$0xff]  }
  0x2d   : > { %1428 = vmatpush3.bf16.xpose.msra.mxu0 %v418_v5  ;;  %1467 = vmatpush3.bf16.xpose.msra.mxu1 %v418_v5  ;;  %v227_v12 = vld [vmem:[%s1870_s21 + $0x40] sm:$0xff]  ;;  %v235_v15 = vmul.f32 2.0, %v219_v10  ;;  %v236_v16 = vmul.f32 2.0, %v220_v11  ;;  %v228_v17 = vld [vmem:[%s1870_s21 + $0x48] sm:$0xff]  ;;  %v1545_v25 = vld [vmem:[%s1875_s25 + $0x18] sm:$0xff]   ;;  %v559_v3 = vand.u32 127, %v558_v2  ;;  %v561_v5 = vstv %s1423_s29 }
  0x2e   : > { %1477 = vmatprep.subr.msk.bf16.mxu0 %vm371_vm1, %v1538_v4  ;;  %1478 = vmatprep.subr.msk.bf16.mxu1 %vm371_vm1, %v1538_v4  ;;  %v1542_v14 = vld [vmem:[%s1875_s25 + $0x60] sm:$0xff]   ;;  %v243_v18 = vmul.f32 2.0, %v227_v12  ;;  %v244_v19 = vmul.f32 2.0, %v228_v17  ;;  %v406_v26 = vsel %vm371_vm1, %v1545_v25, 0  ;;  %v1546_v27 = vld [vmem:[%s1875_s25 + $0x50] sm:$0xff]   ;;  %v1548_v30 = vld [vmem:[%s1875_s25 + $0x48] sm:$0xff]  }
  0x2f   : > { %v251_v20 = vpack.c.bf16 %v236_v16, %v235_v15  ;;  %v1543_v22 = vld [vmem:[%s1875_s25 + $0x20] sm:$0xff]   ;;  %v1547_v28 = vld [vmem:[%s1875_s25 + $0x10] sm:$0xff]   ;;  %v1549_v31 = vld [vmem:[%s1875_s25 + $0x8] sm:$0xff]   ;;  %v560_v4 = vadd.s32 128, %v559_v3  ;;  %v1988_v6 = vadd.s32 %v561_v5, %v559_v3 }
  0x30   : > { %v255_v21 = vpack.c.bf16 %v244_v19, %v243_v18  ;;  %v409_v23 = vsel %vm371_vm1, %v1543_v22, 0  ;;  %v403_v29 = vsel %vm371_vm1, %v1547_v28, 0  ;;  %v400_v32 = vsel %vm371_vm1, %v1549_v31, 0  ;;  %v1550_v33 = vld [vmem:[%s1875_s25 + $0x40] sm:$0xff]   ;;  %v221_v35 = vld [vmem:[%s1870_s21 + $0x10] sm:$0xff]  ;;  %v222_v37 = vld [vmem:[%s1870_s21 + $0x18] sm:$0xff] }
  0x31   : > { %1443 = vmatprep.mubr.msk.bf16.mxu0 %vm371_vm1, %v251_v20  ;;  %v1551_v34 = vld [vmem:[%s1875_s25] sm:$0xff]   ;;  %v229_v38 = vld [vmem:[%s1870_s21 + $0x50] sm:$0xff]  ;;  %v230_v39 = vld [vmem:[%s1870_s21 + $0x58] sm:$0xff]  ;;  %v237_v40 = vmul.f32 2.0, %v221_v35  ;;  %v238_v41 = vmul.f32 2.0, %v222_v37  ;;  %vm564_vm2 = vcmp.lt.s32.totalorder %v1988_v6, 384 }
  0x32   : > { %1451 = vmatprep.mubr.msk.bf16.mxu1 %vm371_vm1, %v255_v21  ;;  %v397_v36 = vsel %vm371_vm1, %v1551_v34, 0  ;;  %v245_v42 = vmul.f32 2.0, %v229_v38  ;;  %v246_v43 = vmul.f32 2.0, %v230_v39  ;;  %v223_v46 = vld [vmem:[%s1870_s21 + $0x20] sm:$0xff]  ;;  %v224_v47 = vld [vmem:[%s1870_s21 + $0x28] sm:$0xff]  ;;  %v225_v56 = vld [vmem:[%s1870_s21 + $0x30] sm:$0xff] }
  0x33   : > { %v252_v44 = vpack.c.bf16 %v238_v41, %v237_v40  ;;  %v231_v48 = vld [vmem:[%s1870_s21 + $0x60] sm:$0xff]  ;;  %v232_v49 = vld [vmem:[%s1870_s21 + $0x68] sm:$0xff]  ;;  %v239_v50 = vmul.f32 2.0, %v223_v46  ;;  %v240_v51 = vmul.f32 2.0, %v224_v47  ;;  %v226_v57 = vld [vmem:[%s1870_s21 + $0x38] sm:$0xff]  ;;  %v241_v60 = vmul.f32 2.0, %v225_v56 }
  0x34   : > { %v256_v45 = vpack.c.bf16 %v246_v43, %v245_v42  ;;  %v247_v52 = vmul.f32 2.0, %v231_v48  ;;  %v248_v53 = vmul.f32 2.0, %v232_v49  ;;  %v233_v58 = vld [vmem:[%s1870_s21 + $0x70] sm:$0xff]  ;;  %v234_v59 = vld [vmem:[%s1870_s21 + $0x78] sm:$0xff]  ;;  %v242_v61 = vmul.f32 2.0, %v226_v57 }
  0x35   : > { %1430 = vmatpush3.bf16.xpose.msra.mxu0 %v415_v7  ;;  %1468 = vmatpush3.bf16.xpose.msra.mxu1 %v415_v7  ;;  %v253_v54 = vpack.c.bf16 %v240_v51, %v239_v50  ;;  %v249_v62 = vmul.f32 2.0, %v233_v58  ;;  %v250_v63 = vmul.f32 2.0, %v234_v59  ;;  %v1990_v7 = vadd.s32 %v561_v5, %v560_v4 }
  0x36   : > { %1479 = vmatprep.subr.msk.bf16.mxu0 %vm371_vm1, %v1540_v8  ;;  %1480 = vmatprep.subr.msk.bf16.mxu1 %vm371_vm1, %v1540_v8  ;;  %v257_v55 = vpack.c.bf16 %v248_v53, %v247_v52  ;;  %v254_v0 = vpack.c.bf16 %v242_v61, %v241_v60  ;;  %v1818_v50 = vmov 0  }
  0x37   : > { %v258_v1 = vpack.c.bf16 %v250_v63, %v249_v62  ;;  %vm565_vm3 = vcmp.lt.s32.totalorder %v1990_v7, 384  ;;  %1534 = vset.pattern.permute.xlu0 %v1818_v50  ;;  %1535 = vset.pattern.permute.xlu1 %v1818_v50  ;;  %v2161_v7 = vld [vmem:[#allocation2 + $0x40] sm:$0xff] }
  0x3d   : > { %1432 = vmatpush3.bf16.xpose.msra.mxu0 %v412_v13  ;;  %1469 = vmatpush3.bf16.xpose.msra.mxu1 %v412_v13 }
  0x3e   : > { %1481 = vmatprep.subr.msk.bf16.mxu0 %vm371_vm1, %v1542_v14  ;;  %1482 = vmatprep.subr.msk.bf16.mxu1 %vm371_vm1, %v1542_v14 }
  0x45   : > { %1434 = vmatpush3.bf16.xpose.msra.mxu0 %v409_v23  ;;  %1470 = vmatpush3.bf16.xpose.msra.mxu1 %v409_v23 }
  0x46   : > { %1483 = vmatprep.subr.msk.bf16.mxu0 %vm371_vm1, %v1544_v24  ;;  %1484 = vmatprep.subr.msk.bf16.mxu1 %vm371_vm1, %v1544_v24 }
  0x4d   : > { %1436 = vmatpush3.bf16.xpose.msra.mxu0 %v406_v26  ;;  %1471 = vmatpush3.bf16.xpose.msra.mxu1 %v406_v26 }
  0x4e   : > { %1485 = vmatprep.subr.msk.bf16.mxu0 %vm371_vm1, %v1546_v27  ;;  %1486 = vmatprep.subr.msk.bf16.mxu1 %vm371_vm1, %v1546_v27 }
  0x55   : > { %1438 = vmatpush3.bf16.xpose.msra.mxu0 %v403_v29  ;;  %1472 = vmatpush3.bf16.xpose.msra.mxu1 %v403_v29 }
  0x56   : > { %1487 = vmatprep.subr.msk.bf16.mxu0 %vm371_vm1, %v1548_v30  ;;  %1488 = vmatprep.subr.msk.bf16.mxu1 %vm371_vm1, %v1548_v30 }
  0x5d   : > { %1440 = vmatpush3.bf16.xpose.msra.mxu0 %v400_v32  ;;  %1473 = vmatpush3.bf16.xpose.msra.mxu1 %v400_v32 }
  0x5e   : > { %1489 = vmatprep.subr.msk.bf16.mxu0 %vm371_vm1, %v1550_v33  ;;  %1490 = vmatprep.subr.msk.bf16.mxu1 %vm371_vm1, %v1550_v33 }
  0x65   : > { %1442 = vmatpush3.bf16.xpose.msra.mxu0 %v397_v36  ;;  %1474 = vmatpush3.bf16.xpose.msra.mxu1 %v397_v36 }
  0x6c   : > { %1444 = vmatmul.mubr.msk.bf16.vlgmr.msra.gmra.mxu0 %vm371_vm1, %v251_v20  ;;  %1452 = vmatmul.mubr.msk.bf16.vlgmr.msra.gmra.mxu1 %vm371_vm1, %v255_v21 }
  0x6d   : > { %1445 = vmatprep.mubr.msk.bf16.mxu0 %vm371_vm1, %v252_v44  ;;  %1453 = vmatprep.mubr.msk.bf16.mxu1 %vm371_vm1, %v256_v45 }
  0x74   : > { %1446 = vmatmul.mubr.msk.bf16.gmra.mxu0 %vm371_vm1, %v252_v44  ;;  %1454 = vmatmul.mubr.msk.bf16.gmra.mxu1 %vm371_vm1, %v256_v45 }
  0x75   : > { %1447 = vmatprep.mubr.msk.bf16.mxu0 %vm371_vm1, %v253_v54  ;;  %1455 = vmatprep.mubr.msk.bf16.mxu1 %vm371_vm1, %v257_v55 }
  0x7c   : > { %1448 = vmatmul.mubr.msk.bf16.gmra.mxu0 %vm371_vm1, %v253_v54  ;;  %1456 = vmatmul.mubr.msk.bf16.gmra.mxu1 %vm371_vm1, %v257_v55 }
  0x7d   : > { %1449 = vmatprep.mubr.msk.bf16.mxu0 %vm371_vm1, %v254_v0  ;;  %1457 = vmatprep.mubr.msk.bf16.mxu1 %vm371_vm1, %v258_v1 }
  0x84   : > { %1450 = vmatmul.mubr.msk.bf16.gmra.mxu0 %vm371_vm1, %v254_v0  ;;  %1458 = vmatmul.mubr.msk.bf16.gmra.mxu1 %vm371_vm1, %v258_v1 }
 0x12c   : > { %v478_v8 = vpop.f32.mrf.mxu0  ;;  %v518_v9 = vpop.f32.mrf.mxu1 }
 0x12d   : > { %v1996_v12 = vsel %vm564_vm2, %v478_v8, -inf  ;;  %v2006_v17 = vsel %vm564_vm2, %v518_v9, -inf }
 0x12e   : > { %v480_v10 = vpop.f32.mrf.mxu0  ;;  %v520_v11 = vpop.f32.mrf.mxu1 }
 0x12f   : > { %v2000_v13 = vsel %vm565_vm3, %v480_v10, -inf  ;;  %v2010_v18 = vsel %vm565_vm3, %v520_v11, -inf }
 0x130   : > { %v482_v14 = vpop.f32.mrf.mxu0  ;;  %v522_v15 = vpop.f32.mrf.mxu1  ;;  %v614_v16 = vmax.f32 %v1996_v12, %v2000_v13  ;;  %v638_v26 = vmax.f32 %v2006_v17, %v2010_v18 }
 0x131   : > { %v2014_v21 = vsel %vm564_vm2, %v522_v15, -inf  ;;  %v2034_v31 = vsel %vm564_vm2, %v482_v14, -inf }
 0x132   : > { %v524_v19 = vpop.f32.mrf.mxu1  ;;  %615 = vmax.xlane.f32.xlu0 %v614_v16  ;;  %v484_v20 = vpop.f32.mrf.mxu0 }
 0x133   : > { %v2018_v22 = vsel %vm565_vm3, %v524_v19, -inf  ;;  %v2026_v27 = vsel %vm565_vm3, %v484_v20, -inf }
 0x134   : > { %v488_v23 = vpop.f32.mrf.mxu0  ;;  %v641_v24 = vmax.f32 %v2014_v21, %v2018_v22  ;;  %v528_v25 = vpop.f32.mrf.mxu1  ;;  %v617_v37 = vmax.f32 %v2034_v31, %v2026_v27 }
 0x135   : > { %v2030_v28 = vsel %vm564_vm2, %v488_v23, -inf  ;;  %v2038_v32 = vsel %vm564_vm2, %v528_v25, -inf }
 0x136   : > { %642 = vmax.xlane.f32.xlu1 %v641_v24  ;;  %639 = vmax.xlane.f32.xlu0 %v638_v26  ;;  %v490_v29 = vpop.f32.mrf.mxu0  ;;  %v530_v30 = vpop.f32.mrf.mxu1 }
 0x137   : > { %v2042_v33 = vsel %vm565_vm3, %v490_v29, -inf  ;;  %v2046_v34 = vsel %vm565_vm3, %v530_v30, -inf }
 0x138   : > { %v492_v35 = vpop.f32.mrf.mxu0  ;;  %v532_v36 = vpop.f32.mrf.mxu1  ;;  %v620_v38 = vmax.f32 %v2030_v28, %v2042_v33  ;;  %v644_v41 = vmax.f32 %v2038_v32, %v2046_v34 }
 0x139   : > { %v2056_v42 = vsel %vm564_vm2, %v492_v35, -inf  ;;  %v2066_v47 = vsel %vm564_vm2, %v532_v36, -inf }
 0x13a   : > { %618 = vmax.xlane.f32.xlu0 %v617_v37  ;;  %621 = vmax.xlane.f32.xlu1 %v620_v38  ;;  %v494_v39 = vpop.f32.mrf.mxu0  ;;  %v534_v40 = vpop.f32.mrf.mxu1 }
 0x13b   : > { %v2060_v43 = vsel %vm565_vm3, %v494_v39, -inf  ;;  %v2074_v49 = vsel %vm565_vm3, %v534_v40, -inf  ;;  %v2154_v39 = vld [vmem:[#allocation2] sm:$0xff] }
 0x13c   : > { %v498_v44 = vpop.f32.mrf.mxu0  ;;  %v623_v45 = vmax.f32 %v2056_v42, %v2060_v43  ;;  %v538_v46 = vpop.f32.mrf.mxu1  ;;  %v647_v57 = vmax.f32 %v2066_v47, %v2074_v49 }
 0x13d   : > { %v2070_v48 = vsel %vm564_vm2, %v498_v44, -inf  ;;  %v2082_v54 = vsel %vm564_vm2, %v538_v46, -inf }
 0x13e   : > { %624 = vmax.xlane.f32.xlu1 %v623_v45  ;;  %v500_v51 = vpop.f32.mrf.mxu0  ;;  %645 = vmax.xlane.f32.xlu0 %v644_v41  ;;  %v540_v52 = vpop.f32.mrf.mxu1  ;;  %v2159_v41 = vld [vmem:[#allocation2 + $0x48] sm:$0xff] }
 0x13f   : > { %v2078_v53 = vsel %vm565_vm3, %v500_v51, -inf  ;;  %v2086_v55 = vsel %vm565_vm3, %v540_v52, -inf  ;;  %v2174_v52 = vld [vmem:[#allocation2 + $0x8] sm:$0xff] }
 0x140   : > { %v502_v56 = vpop.f32.mrf.mxu0  ;;  %v542_v58 = vpop.f32.mrf.mxu1  ;;  %v626_v59 = vmax.f32 %v2070_v48, %v2078_v53  ;;  %v650_v63 = vmax.f32 %v2082_v54, %v2086_v55 }
 0x141   : > { %v2094_v60 = vsel %vm564_vm2, %v502_v56, -inf  ;;  %v2104_v1 = vsel %vm564_vm2, %v542_v58, -inf  ;;  %v2176_v56 = vld [vmem:[#allocation2 + $0x10] sm:$0xff] }
 0x142   : > { %648 = vmax.xlane.f32.xlu1 %v647_v57  ;;  %v504_v61 = vpop.f32.mrf.mxu0  ;;  %v544_v62 = vpop.f32.mrf.mxu1  ;;  %627 = vmax.xlane.f32.xlu0 %v626_v59  ;;  %v2273_v57 = vld [vmem:[#allocation2 + $0x70] sm:$0xff] }
 0x143   : > { %v2100_v0 = vsel %vm565_vm3, %v504_v61, -inf  ;;  %v2108_v2 = vsel %vm565_vm3, %v544_v62, -inf  ;;  %2575 = vst [vmem:[#allocation14_spill] sm:$0xff] %v2273_v57 }
 0x144   : > { %v508_v3 = vpop.f32.mrf.mxu0  ;;  %v629_v4 = vmax.f32 %v2094_v60, %v2100_v0  ;;  %v548_v5 = vpop.f32.mrf.mxu1  ;;  %v653_v11 = vmax.f32 %v2104_v1, %v2108_v2 }
 0x145   : > { %v2114_v8 = vsel %vm564_vm2, %v508_v3, -inf  ;;  %v2124_v15 = vsel %vm564_vm2, %v548_v5, -inf  ;;  %v2194_v3 = vld [vmem:[#allocation2 + $0x18] sm:$0xff] }
 0x146   : > { %630 = vmax.xlane.f32.xlu1 %v629_v4  ;;  %v510_v9 = vpop.f32.mrf.mxu0  ;;  %v550_v10 = vpop.f32.mrf.mxu1  ;;  %651 = vmax.xlane.f32.xlu0 %v650_v63  ;;  %v2196_v4 = vld [vmem:[#allocation2 + $0x50] sm:$0xff] }
 0x147   : > { %v2120_v14 = vsel %vm565_vm3, %v510_v9, -inf  ;;  %v2128_v16 = vsel %vm565_vm3, %v550_v10, -inf  ;;  %v2271_v9 = vld [vmem:[#allocation2 + $0x38] sm:$0xff] }
 0x148   : > { %v512_v19 = vpop.f32.mrf.mxu0  ;;  %v552_v20 = vpop.f32.mrf.mxu1  ;;  %v632_v23 = vmax.f32 %v2114_v8, %v2120_v14  ;;  %v656_v29 = vmax.f32 %v2124_v15, %v2128_v16  ;;  %2574 = vst [vmem:[#allocation13_spill] sm:$0xff] %v2271_v9 }
 0x149   : > { %v2134_v24 = vsel %vm564_vm2, %v512_v19, -inf  ;;  %v2144_v35 = vsel %vm564_vm2, %v552_v20, -inf }
 0x14a   : > { %654 = vmax.xlane.f32.xlu1 %v653_v11  ;;  %v514_v25 = vpop.f32.mrf.mxu0  ;;  %v554_v26 = vpop.f32.mrf.mxu1  ;;  %633 = vmax.xlane.f32.xlu0 %v632_v23  ;;  %v2213_v23 = vld [vmem:[#allocation2 + $0x58] sm:$0xff] }
 0x14b   : > { %v2140_v30 = vsel %vm565_vm3, %v514_v25, -inf  ;;  %v2148_v36 = vsel %vm565_vm3, %v554_v26, -inf  ;;  %v2215_v25 = vld [vmem:[#allocation2 + $0x20] sm:$0xff]  ;;  %v2252_v26 = vld [vmem:[#allocation2 + $0x68] sm:$0xff] }
 0x14c   : > { %v635_v37 = vmax.f32 %v2134_v24, %v2140_v30  ;;  %v659_v38 = vmax.f32 %v2144_v35, %v2148_v36  ;;  %2570 = vst [vmem:[#allocation9_spill] sm:$0xff] %v2252_v26 }
 0x14e   : > { %636 = vmax.xlane.f32.xlu1 %v635_v37  ;;  %657 = vmax.xlane.f32.xlu0 %v656_v29  ;;  %v2254_v29 = vld [vmem:[#allocation2 + $0x30] sm:$0xff] }
 0x14f   : > { %2571 = vst [vmem:[#allocation10_spill] sm:$0xff] %v2254_v29 }
 0x152   : > { %660 = vmax.xlane.f32.xlu1 %v659_v38 }
 0x1bb   : > { %v616_v40 = vpop.xlane.xlu0 %615 }
 0x1bc   : > { %v2157_v6 = vmax.f32 %v2154_v39, %v616_v40 }
 0x1be   : > { %1015 = vst.msk [vmem:[#allocation2] sm:$0xff] %vm998_vm4, %v2157_v6  ;;  %760 = vperm.xlu0 %1534, %v2157_v6  }
 0x1bf   : > { %v643_v45 = vpop.xlane.xlu1 %642  ;;  %v640_v46 = vpop.xlane.xlu0 %639 }
 0x1c0   : > { %v2169_v50 = vmax.f32 %v2159_v41, %v643_v45  ;;  %v2172_v51 = vmax.f32 %v2161_v7, %v640_v46  ;;  %v2232_v46 = vld [vmem:[#allocation2 + $0x28] sm:$0xff] }
 0x1c1   : > { %2566 = vst [vmem:[#allocation5_spill] sm:$0xff] %v2232_v46 }
 0x1c2   : > { %1024 = vst.msk [vmem:[#allocation2 + $0x48] sm:$0xff] %vm998_vm4, %v2169_v50  ;;  %1023 = vst.msk [vmem:[#allocation2 + $0x40] sm:$0xff] %vm998_vm4, %v2172_v51  ;;  %805 = vperm.xlu0 %1534, %v2169_v50   ;;  %800 = vperm.xlu1 %1535, %v2172_v51  }
 0x1c3   : > { %v619_v59 = vpop.xlane.xlu0 %618  ;;  %v622_v61 = vpop.xlane.xlu1 %621 }
 0x1c4   : > { %v2189_v62 = vmax.f32 %v2174_v52, %v619_v59  ;;  %v2192_v63 = vmax.f32 %v2176_v56, %v622_v61  ;;  %v2234_v59 = vld [vmem:[#allocation2 + $0x60] sm:$0xff] }
 0x1c5   : > { %2567 = vst [vmem:[#allocation6_spill] sm:$0xff] %v2234_v59 }
 0x1c6   : > { %1016 = vst.msk [vmem:[#allocation2 + $0x8] sm:$0xff] %vm998_vm4, %v2189_v62  ;;  %1017 = vst.msk [vmem:[#allocation2 + $0x10] sm:$0xff] %vm998_vm4, %v2192_v63  ;;  %765 = vperm.xlu1 %1535, %v2189_v62  }
 0x1c7   : > { %v625_v10 = vpop.xlane.xlu1 %624  ;;  %v646_v11 = vpop.xlane.xlu0 %645 }
 0x1c8   : > { %v2208_v19 = vmax.f32 %v2194_v3, %v625_v10  ;;  %v2211_v20 = vmax.f32 %v2196_v4, %v646_v11 }
 0x1ca   : > { %1018 = vst.msk [vmem:[#allocation2 + $0x18] sm:$0xff] %vm998_vm4, %v2208_v19  ;;  %1025 = vst.msk [vmem:[#allocation2 + $0x50] sm:$0xff] %vm998_vm4, %v2211_v20  ;;  %770 = vperm.xlu1 %1535, %v2192_v63  }
 0x1cb   : > { %v649_v37 = vpop.xlane.xlu1 %648  ;;  %v628_v38 = vpop.xlane.xlu0 %627 }
 0x1cc   : > { %v2227_v40 = vmax.f32 %v2213_v23, %v649_v37  ;;  %v2230_v45 = vmax.f32 %v2215_v25, %v628_v38 }
 0x1ce   : > { %2565 = vst [vmem:[#allocation4_spill] sm:$0xff] %v2230_v45  ;;  %1026 = vst.msk [vmem:[#allocation2 + $0x58] sm:$0xff] %vm998_vm4, %v2227_v40  ;;  %815 = vperm.xlu0 %1534, %v2227_v40   ;;  %810 = vperm.xlu1 %1535, %v2211_v20  }
 0x1cf   : > { %1019 = vst.msk [vmem:[#allocation2 + $0x20] sm:$0xff] %vm998_vm4, %v2230_v45  ;;  %v631_v11 = vpop.xlane.xlu1 %630  ;;  %v652_v37 = vpop.xlane.xlu0 %651 }
 0x1d0   : > { %v2247_v38 = vmax.f32 %v2232_v46, %v631_v11  ;;  %v2250_v61 = vmax.f32 %v2234_v59, %v652_v37 }
 0x1d2   : > { %2568 = vst [vmem:[#allocation7_spill] sm:$0xff] %v2247_v38  ;;  %2569 = vst [vmem:[#allocation8_spill] sm:$0xff] %v2250_v61  ;;  %775 = vperm.xlu1 %1535, %v2208_v19  }
 0x1d3   : > { %1020 = vst.msk [vmem:[#allocation2 + $0x28] sm:$0xff] %vm998_vm4, %v2247_v38  ;;  %1027 = vst.msk [vmem:[#allocation2 + $0x60] sm:$0xff] %vm998_vm4, %v2250_v61  ;;  %v655_v11 = vpop.xlane.xlu1 %654  ;;  %v634_v37 = vpop.xlane.xlu0 %633 }
 0x1d4   : > { %v2266_v5 = vmax.f32 %v2252_v26, %v655_v11  ;;  %v2269_v58 = vmax.f32 %v2254_v29, %v634_v37  ;;  %v2291_v26 = vld [vmem:[#allocation2 + $0x78] sm:$0xff] }
 0x1d5   : > { %2578 = vst [vmem:[#allocation17_spill] sm:$0xff] %v2291_v26 }
 0x1d6   : > { %2572 = vst [vmem:[#allocation11_spill] sm:$0xff] %v2266_v5  ;;  %2573 = vst [vmem:[#allocation12_spill] sm:$0xff] %v2269_v58  ;;  %825 = vperm.xlu0 %1534, %v2266_v5   ;;  %780 = vperm.xlu1 %1535, %v2230_v45  }
 0x1d7   : > { %1028 = vst.msk [vmem:[#allocation2 + $0x68] sm:$0xff] %vm998_vm4, %v2266_v5  ;;  %1021 = vst.msk [vmem:[#allocation2 + $0x30] sm:$0xff] %vm998_vm4, %v2269_v58  ;;  %v637_v37 = vpop.xlane.xlu1 %636  ;;  %v658_v10 = vpop.xlane.xlu0 %657 }
 0x1d8   : > { %v2286_v46 = vmax.f32 %v2271_v9, %v637_v37  ;;  %v2289_v44 = vmax.f32 %v2273_v57, %v658_v10 }
 0x1da   : > { %2576 = vst [vmem:[#allocation15_spill] sm:$0xff] %v2286_v46  ;;  %2577 = vst [vmem:[#allocation16_spill] sm:$0xff] %v2289_v44  ;;  %820 = vperm.xlu1 %1535, %v2250_v61  }
 0x1db   : > { %1022 = vst.msk [vmem:[#allocation2 + $0x38] sm:$0xff] %vm998_vm4, %v2286_v46  ;;  %1029 = vst.msk [vmem:[#allocation2 + $0x70] sm:$0xff] %vm998_vm4, %v2289_v44  ;;  %v661_v37 = vpop.xlane.xlu1 %660 }
 0x1dc   : > { %v2303_v10 = vmax.f32 %v2291_v26, %v661_v37 }
 0x1de   : > { %2579 = vst [vmem:[#allocation18_spill] sm:$0xff] %v2303_v10  ;;  %1030 = vst.msk [vmem:[#allocation2 + $0x78] sm:$0xff] %vm998_vm4, %v2303_v10  ;;  %785 = vperm.xlu1 %1535, %v2247_v38   ;;  %835 = vperm.xlu0 %1534, %v2303_v10  }
 0x1e2   : > { %790 = vperm.xlu1 %1535, %v2269_v58  }
 0x1e6   : > { %795 = vperm.xlu1 %1535, %v2286_v46  }
 0x1ea   : > { %830 = vperm.xlu1 %1535, %v2289_v44  }
 0x239   : > { %v761_v11 = vpop.permute.xlu0 %760 }
 0x23a   : > { %v838_v37 = vsub.f32 %v1996_v12, %v761_v11  ;;  %v839_v5 = vsub.f32 %v2000_v13, %v761_v11 }
 0x23c   : > { %v870_v57 = vmul.f32 1.442695, %v838_v37  ;;  %v872_v29 = vmul.f32 1.442695, %v839_v5 }
 0x23d   : > { %v806_v26 = vpop.permute.xlu0 %805  ;;  %v801_v9 = vpop.permute.xlu1 %800 }
 0x23e   : > { %1552 = vpow2.f32 %v870_v57  ;;  %v856_v38 = vsub.f32 %v2014_v21, %v806_v26  ;;  %v857_v10 = vsub.f32 %v2018_v22, %v806_v26  ;;  %v854_v58 = vsub.f32 %v2006_v17, %v801_v9 }
 0x23f   : > { %1554 = vpow2.f32 %v872_v29  ;;  %v855_v46 = vsub.f32 %v2010_v18, %v801_v9 }
 0x240   : > { %v906_v44 = vmul.f32 1.442695, %v856_v38  ;;  %v908_v61 = vmul.f32 1.442695, %v857_v10  ;;  %v902_v59 = vmul.f32 1.442695, %v854_v58 }
 0x241   : > { %v904_v12 = vmul.f32 1.442695, %v855_v46  ;;  %v766_v45 = vpop.permute.xlu1 %765 }
 0x242   : > { %1556 = vpow2.f32 %v906_v44  ;;  %v840_v13 = vsub.f32 %v2034_v31, %v766_v45  ;;  %v841_v5 = vsub.f32 %v2026_v27, %v766_v45 }
 0x243   : > { %1558 = vpow2.f32 %v908_v61 }
 0x244   : > { %1560 = vpow2.f32 %v902_v59  ;;  %v874_v21 = vmul.f32 1.442695, %v840_v13  ;;  %v876_v57 = vmul.f32 1.442695, %v841_v5 }
 0x245   : > { %1562 = vpow2.f32 %v904_v12  ;;  %v771_v22 = vpop.permute.xlu1 %770 }
 0x246   : > { %1564 = vpow2.f32 %v874_v21  ;;  %v842_v17 = vsub.f32 %v2030_v28, %v771_v22  ;;  %v843_v18 = vsub.f32 %v2042_v33, %v771_v22 }
 0x247   : > { %1566 = vpow2.f32 %v876_v57 }
 0x248   : > { %v878_v58 = vmul.f32 1.442695, %v842_v17  ;;  %v880_v9 = vmul.f32 1.442695, %v843_v18 }
 0x249   : > { %v816_v26 = vpop.permute.xlu0 %815  ;;  %v811_v44 = vpop.permute.xlu1 %810 }
 0x24a   : > { %1568 = vpow2.f32 %v878_v58  ;;  %v858_v31 = vsub.f32 %v2038_v32, %v811_v44  ;;  %v859_v29 = vsub.f32 %v2046_v34, %v811_v44  ;;  %v860_v46 = vsub.f32 %v2066_v47, %v816_v26 }
 0x24b   : > { %v1553_v27 = vpop.eup %1552  ;;  %1570 = vpow2.f32 %v880_v9  ;;  %v861_v28 = vsub.f32 %v2074_v49, %v816_v26 }
 0x24c   : > { %v1555_v45 = vpop.eup %1554  ;;  %v910_v59 = vmul.f32 1.442695, %v858_v31  ;;  %v912_v61 = vmul.f32 1.442695, %v859_v29  ;;  %v914_v12 = vmul.f32 1.442695, %v860_v46 }
 0x24d   : > { %v776_v33 = vpop.permute.xlu1 %775  ;;  %v934_v38 = vadd.f32 %v1555_v45, %v1553_v27  ;;  %v916_v21 = vmul.f32 1.442695, %v861_v28 }
 0x24e   : > { %v844_v11 = vsub.f32 %v2056_v42, %v776_v33  ;;  %v845_v10 = vsub.f32 %v2060_v43, %v776_v33  ;;  %1572 = vpow2.f32 %v910_v59 }
 0x24f   : > { %v1557_v37 = vpop.eup %1556  ;;  %935 = vadd.xlane.f32.xlu1 %v934_v38  ;;  %1574 = vpow2.f32 %v912_v61 }
 0x250   : > { %v1559_v32 = vpop.eup %1558  ;;  %v882_v13 = vmul.f32 1.442695, %v844_v11  ;;  %v884_v34 = vmul.f32 1.442695, %v845_v10 }
 0x251   : > { %v1561_v5 = vpop.eup %1560  ;;  %v781_v47 = vpop.permute.xlu1 %780  ;;  %v961_v57 = vadd.f32 %v1559_v32, %v1557_v37 }
 0x252   : > { %v1563_v49 = vpop.eup %1562  ;;  %1576 = vpow2.f32 %v882_v13  ;;  %v846_v22 = vsub.f32 %v2070_v48, %v781_v47  ;;  %v826_v42 = vpop.permute.xlu0 %825  ;;  %v847_v43 = vsub.f32 %v2078_v53, %v781_v47 }
 0x253   : > { %v1565_v17 = vpop.eup %1564  ;;  %1578 = vpow2.f32 %v884_v34  ;;  %962 = vadd.xlane.f32.xlu1 %v961_v57  ;;  %v958_v18 = vadd.f32 %v1563_v49, %v1561_v5  ;;  %v864_v27 = vsub.f32 %v2104_v1, %v826_v42  ;;  %v865_v46 = vsub.f32 %v2108_v2, %v826_v42 }
 0x254   : > { %v1567_v58 = vpop.eup %1566  ;;  %1580 = vpow2.f32 %v914_v12  ;;  %v886_v9 = vmul.f32 1.442695, %v846_v22  ;;  %v888_v26 = vmul.f32 1.442695, %v847_v43 }
 0x255   : > { %1582 = vpow2.f32 %v916_v21  ;;  %959 = vadd.xlane.f32.xlu0 %v958_v18  ;;  %v821_v44 = vpop.permute.xlu1 %820  ;;  %v937_v31 = vadd.f32 %v1567_v58, %v1565_v17  ;;  %v922_v38 = vmul.f32 1.442695, %v864_v27  ;;  %v924_v1 = vmul.f32 1.442695, %v865_v46 }
 0x256   : > { %v862_v29 = vsub.f32 %v2082_v54, %v821_v44  ;;  %v863_v48 = vsub.f32 %v2086_v55, %v821_v44  ;;  %1584 = vpow2.f32 %v886_v9 }
 0x257   : > { %v1569_v45 = vpop.eup %1568  ;;  %1586 = vpow2.f32 %v888_v26 }
 0x258   : > { %v1571_v53 = vpop.eup %1570  ;;  %v918_v59 = vmul.f32 1.442695, %v862_v29  ;;  %v920_v28 = vmul.f32 1.442695, %v863_v48 }
 0x259   : > { %938 = vadd.xlane.f32.xlu0 %v937_v31  ;;  %v786_v61 = vpop.permute.xlu1 %785  ;;  %v940_v33 = vadd.f32 %v1571_v53, %v1569_v45  ;;  %v836_v37 = vpop.permute.xlu0 %835 }
 0x25a   : > { %1588 = vpow2.f32 %v918_v59  ;;  %v848_v11 = vsub.f32 %v2094_v60, %v786_v61  ;;  %v849_v54 = vsub.f32 %v2100_v0, %v786_v61  ;;  %v868_v47 = vsub.f32 %v2144_v35, %v836_v37 }
 0x25b   : > { %1590 = vpow2.f32 %v920_v28  ;;  %v1573_v10 = vpop.eup %1572  ;;  %v869_v22 = vsub.f32 %v2148_v36, %v836_v37 }
 0x25c   : > { %v890_v55 = vmul.f32 1.442695, %v848_v11  ;;  %v892_v2 = vmul.f32 1.442695, %v849_v54  ;;  %v1575_v12 = vpop.eup %1574  ;;  %1592 = vpow2.f32 %v922_v38  ;;  %v930_v18 = vmul.f32 1.442695, %v868_v47 }
 0x25d   : > { %941 = vadd.xlane.f32.xlu0 %v940_v33  ;;  %v791_v32 = vpop.permute.xlu1 %790  ;;  %1594 = vpow2.f32 %v924_v1  ;;  %v964_v21 = vadd.f32 %v1575_v12, %v1573_v10  ;;  %v932_v26 = vmul.f32 1.442695, %v869_v22 }
 0x25e   : > { %v850_v13 = vsub.f32 %v2114_v8, %v791_v32  ;;  %v851_v34 = vsub.f32 %v2120_v14, %v791_v32  ;;  %1596 = vpow2.f32 %v890_v55 }
 0x25f   : > { %v1577_v5 = vpop.eup %1576  ;;  %1598 = vpow2.f32 %v892_v2 }
 0x260   : > { %v1579_v60 = vpop.eup %1578  ;;  %v894_v0 = vmul.f32 1.442695, %v850_v13  ;;  %v896_v57 = vmul.f32 1.442695, %v851_v34 }
 0x261   : > { %v1581_v49 = vpop.eup %1580  ;;  %965 = vadd.xlane.f32.xlu0 %v964_v21  ;;  %v796_v17 = vpop.permute.xlu1 %795  ;;  %v943_v42 = vadd.f32 %v1579_v60, %v1577_v5  ;;  %v2580_v5 = vsub.f32 %v2154_v39, %v2157_v6  ;;  %v2581_v60 = vsub.f32 %v2159_v41, %v2169_v50  ;;  %v2584_v39 = vsub.f32 %v2176_v56, %v2192_v63  ;;  %v734_v56 = vld [vmem:[#allocation3 + $0x40] sm:$0xff] }
 0x262   : > { %v1583_v43 = vpop.eup %1582  ;;  %1600 = vpow2.f32 %v894_v0  ;;  %v852_v8 = vsub.f32 %v2134_v24, %v796_v17  ;;  %v853_v14 = vsub.f32 %v2140_v30, %v796_v17  ;;  %v2582_v0 = vsub.f32 %v2161_v7, %v2172_v51 }
 0x263   : > { %1602 = vpow2.f32 %v896_v57  ;;  %944 = vadd.xlane.f32.xlu1 %v943_v42  ;;  %v1585_v9 = vpop.eup %1584  ;;  %v967_v31 = vadd.f32 %v1583_v43, %v1581_v49  ;;  %v694_v21 = vmul.f32 1.442695, %v2580_v5  ;;  %v712_v47 = vmul.f32 1.442695, %v2581_v60  ;;  %v726_v42 = vld [vmem:[#allocation3] sm:$0xff] }
 0x264   : > { %v898_v35 = vmul.f32 1.442695, %v852_v8  ;;  %v900_v58 = vmul.f32 1.442695, %v853_v14  ;;  %v1587_v36 = vpop.eup %1586  ;;  %v710_v57 = vmul.f32 1.442695, %v2582_v0  ;;  %v2583_v49 = vsub.f32 %v2174_v52, %v2189_v62 }
 0x265   : > { %v831_v44 = vpop.permute.xlu1 %830  ;;  %v946_v24 = vadd.f32 %v1587_v36, %v1585_v9  ;;  %v698_v6 = vmul.f32 1.442695, %v2584_v39  ;;  %v2585_v41 = vsub.f32 %v2196_v4, %v2211_v20  ;;  %v2586_v7 = vsub.f32 %v2194_v3, %v2208_v19  ;;  %v735_v62 = vld [vmem:[#allocation3 + $0x48] sm:$0xff]  ;;  %v2588_v3 = vld [vmem:[#allocation4_spill] sm:$0xff]  ;;  %v2603_v39 = vld [vmem:[#allocation15_spill] sm:$0xff] }
 0x266   : > { %1604 = vpow2.f32 %v898_v35  ;;  %v866_v27 = vsub.f32 %v2124_v15, %v831_v44  ;;  %v867_v29 = vsub.f32 %v2128_v16, %v831_v44  ;;  %v696_v22 = vmul.f32 1.442695, %v2583_v49  ;;  %v727_v36 = vld [vmem:[#allocation3 + $0x8] sm:$0xff]  ;;  %v737_v49 = vld [vmem:[#allocation3 + $0x58] sm:$0xff] }
 0x267   : > { %v1589_v48 = vpop.eup %1588  ;;  %1606 = vpow2.f32 %v900_v58  ;;  %968 = vadd.xlane.f32.xlu1 %v967_v31  ;;  %947 = vadd.xlane.f32.xlu0 %v946_v24  ;;  %v714_v50 = vmul.f32 1.442695, %v2585_v41  ;;  %v700_v51 = vmul.f32 1.442695, %v2586_v7  ;;  %v2587_v63 = vsub.f32 %v2213_v23, %v2227_v40  ;;  %v2590_v23 = vld [vmem:[#allocation6_spill] sm:$0xff]  ;;  %v2591_v40 = vld [vmem:[#allocation8_spill] sm:$0xff] }
 0x268   : > { %v1591_v30 = vpop.eup %1590  ;;  %1608 = vpow2.f32 %v930_v18  ;;  %v926_v45 = vmul.f32 1.442695, %v866_v27  ;;  %v928_v46 = vmul.f32 1.442695, %v867_v29  ;;  %v2589_v19 = vsub.f32 %v2215_v25, %v2588_v3  ;;  %v2605_v7 = vld [vmem:[#allocation14_spill] sm:$0xff] }
 0x269   : > { %1610 = vpow2.f32 %v932_v26  ;;  %v970_v53 = vadd.f32 %v1591_v30, %v1589_v48  ;;  %v1593_v59 = vpop.eup %1592  ;;  %v716_v35 = vmul.f32 1.442695, %v2587_v63  ;;  %v2592_v29 = vsub.f32 %v2590_v23, %v2591_v40  ;;  %v732_v23 = vld [vmem:[#allocation3 + $0x30] sm:$0xff] }
 0x26a   : > { %1612 = vpow2.f32 %v926_v45  ;;  %v1595_v28 = vpop.eup %1594  ;;  %v702_v58 = vmul.f32 1.442695, %v2589_v19  ;;  %v728_v45 = vld [vmem:[#allocation3 + $0x10] sm:$0xff]  ;;  %v738_v19 = vld [vmem:[#allocation3 + $0x60] sm:$0xff] }
 0x26b   : > { %1614 = vpow2.f32 %v928_v46  ;;  %v1597_v61 = vpop.eup %1596  ;;  %971 = vadd.xlane.f32.xlu0 %v970_v53  ;;  %v973_v54 = vadd.f32 %v1595_v28, %v1593_v59  ;;  %v718_v48 = vmul.f32 1.442695, %v2592_v29  ;;  %v2593_v53 = vld [vmem:[#allocation5_spill] sm:$0xff]  ;;  %v2594_v59 = vld [vmem:[#allocation7_spill] sm:$0xff] }
 0x26c   : > { %v1599_v15 = vpop.eup %1598  ;;  %1616 = vpow2.f32 %v694_v21  ;;  %v2595_v28 = vsub.f32 %v2593_v53, %v2594_v59 }
 0x26d   : > { %v949_v16 = vadd.f32 %v1599_v15, %v1597_v61  ;;  %1618 = vpow2.f32 %v712_v47 }
 0x26e   : > { %1620 = vpow2.f32 %v710_v57  ;;  %v704_v61 = vmul.f32 1.442695, %v2595_v28 }
 0x26f   : > { %v1601_v33 = vpop.eup %1600  ;;  %950 = vadd.xlane.f32.xlu1 %v949_v16  ;;  %1622 = vpow2.f32 %v696_v22  ;;  %v2602_v22 = vld [vmem:[#allocation13_spill] sm:$0xff] }
 0x270   : > { %v1603_v38 = vpop.eup %1602  ;;  %1624 = vpow2.f32 %v698_v6  ;;  %v2604_v6 = vsub.f32 %v2602_v22, %v2603_v39 }
 0x271   : > { %v952_v11 = vadd.f32 %v1603_v38, %v1601_v33  ;;  %1626 = vpow2.f32 %v714_v50  ;;  %v736_v38 = vld [vmem:[#allocation3 + $0x50] sm:$0xff]  ;;  %v730_v50 = vld [vmem:[#allocation3 + $0x20] sm:$0xff] }
 0x272   : > { %1628 = vpow2.f32 %v700_v51  ;;  %v2606_v51 = vld [vmem:[#allocation16_spill] sm:$0xff] }
 0x273   : > { %v1605_v1 = vpop.eup %1604  ;;  %953 = vadd.xlane.f32.xlu0 %v952_v11  ;;  %974 = vadd.xlane.f32.xlu1 %v973_v54  ;;  %1630 = vpow2.f32 %v716_v35  ;;  %v2596_v11 = vld [vmem:[#allocation10_spill] sm:$0xff] }
 0x274   : > { %v1607_v55 = vpop.eup %1606  ;;  %1632 = vpow2.f32 %v702_v58 }
 0x275   : > { %v1609_v10 = vpop.eup %1608  ;;  %v955_v37 = vadd.f32 %v1607_v55, %v1605_v1  ;;  %1634 = vpow2.f32 %v718_v48  ;;  %v2597_v1 = vld [vmem:[#allocation12_spill] sm:$0xff] }
 0x276   : > { %v1611_v2 = vpop.eup %1610  ;;  %v2598_v54 = vsub.f32 %v2596_v11, %v2597_v1  ;;  %1636 = vpow2.f32 %v704_v61  ;;  %v733_v61 = vld [vmem:[#allocation3 + $0x38] sm:$0xff] }
 0x277   : > { %v1613_v32 = vpop.eup %1612  ;;  %956 = vadd.xlane.f32.xlu1 %v955_v37  ;;  %v979_v34 = vadd.f32 %v1611_v2, %v1609_v10  ;;  %v729_v2 = vld [vmem:[#allocation3 + $0x18] sm:$0xff] }
 0x278   : > { %v1615_v12 = vpop.eup %1614  ;;  %v706_v55 = vmul.f32 1.442695, %v2598_v54  ;;  %v741_v54 = vld [vmem:[#allocation3 + $0x78] sm:$0xff] }
 0x279   : > { %v976_v13 = vadd.f32 %v1615_v12, %v1613_v32  ;;  %v1617_v17 = vpop.eup %1616  ;;  %v2599_v32 = vld [vmem:[#allocation9_spill] sm:$0xff]  ;;  %v2600_v12 = vld [vmem:[#allocation11_spill] sm:$0xff] }
 0x27a   : > { %v742_v43 = vmul.f32 %v1617_v17, %v726_v42  ;;  %v1619_v8 = vpop.eup %1618  ;;  %1638 = vpow2.f32 %v706_v55  ;;  %v708_v17 = vmul.f32 1.442695, %v2604_v6 }
 0x27b   : > { %977 = vadd.xlane.f32.xlu0 %v976_v13  ;;  %980 = vadd.xlane.f32.xlu1 %v979_v34  ;;  %v1621_v18 = vpop.eup %1620  ;;  %v751_v4 = vmul.f32 %v1619_v8, %v735_v62  ;;  %v2601_v13 = vsub.f32 %v2599_v32, %v2600_v12 }
 0x27c   : > { %v750_v9 = vmul.f32 %v1621_v18, %v734_v56  ;;  %v1623_v44 = vpop.eup %1622  ;;  %v2609_v18 = vld [vmem:[#allocation18_spill] sm:$0xff] }
 0x27d   : > { %v743_v24 = vmul.f32 %v1623_v44, %v727_v36  ;;  %v1625_v30 = vpop.eup %1624  ;;  %v720_v34 = vmul.f32 1.442695, %v2601_v13 }
 0x27e   : > { %v744_v15 = vmul.f32 %v1625_v30, %v728_v45  ;;  %v1627_v33 = vpop.eup %1626 }
 0x27f   : > { %v1629_v37 = vpop.eup %1628  ;;  %v752_v5 = vmul.f32 %v1627_v33, %v736_v38  ;;  %1640 = vpow2.f32 %v720_v34 }
 0x280   : > { %v745_v47 = vmul.f32 %v1629_v37, %v729_v2  ;;  %v1631_v0 = vpop.eup %1630  ;;  %1642 = vpow2.f32 %v708_v17 }
 0x281   : > { %v1633_v41 = vpop.eup %1632 }
 0x282   : > { %v746_v35 = vmul.f32 %v1633_v41, %v730_v50 }
 0x2d8   : > { %v936_v52 = vpop.xlane.xlu1 %935 }
 0x2d9   : > { %v982_v14 = vadd.f32 %v936_v52, %v742_v43  ;;  %v2607_v43 = vsub.f32 %v2605_v7, %v2606_v51  ;;  %v753_v52 = vmul.f32 %v1631_v0, %v737_v49 }
 0x2db   : > { %999 = vst.msk [vmem:[#allocation3] sm:$0xff] %vm998_vm4, %v982_v14  ;;  %v722_v8 = vmul.f32 1.442695, %v2607_v43  ;;  %v2608_v14 = vld [vmem:[#allocation17_spill] sm:$0xff] }
 0x2dc   : > { %v963_v20 = vpop.xlane.xlu1 %962  ;;  %v2610_v56 = vsub.f32 %v2608_v14, %v2609_v18 }
 0x2dd   : > { %v991_v26 = vadd.f32 %v963_v20, %v751_v4  ;;  %v1635_v20 = vpop.eup %1634  ;;  %1644 = vpow2.f32 %v722_v8 }
 0x2de   : > { %v960_v31 = vpop.xlane.xlu0 %959  ;;  %v724_v63 = vmul.f32 1.442695, %v2610_v56 }
 0x2df   : > { %v990_v27 = vadd.f32 %v960_v31, %v750_v9  ;;  %1008 = vst.msk [vmem:[#allocation3 + $0x48] sm:$0xff] %vm998_vm4, %v991_v26  ;;  %v754_v9 = vmul.f32 %v1635_v20, %v738_v19  ;;  %v1637_v26 = vpop.eup %1636  ;;  %v731_v31 = vld [vmem:[#allocation3 + $0x28] sm:$0xff] }
 0x2e0   : > { %1646 = vpow2.f32 %v724_v63  ;;  %v747_v40 = vmul.f32 %v1637_v26, %v731_v31 }
 0x2e1   : > { %1007 = vst.msk [vmem:[#allocation3 + $0x40] sm:$0xff] %vm998_vm4, %v990_v27  ;;  %v1639_v27 = vpop.eup %1638 }
 0x2e2   : > { %v939_v25 = vpop.xlane.xlu0 %938  ;;  %v1641_v29 = vpop.eup %1640 }
 0x2e3   : > { %v983_v46 = vadd.f32 %v939_v25, %v743_v24  ;;  %v739_v24 = vld [vmem:[#allocation3 + $0x68] sm:$0xff]  ;;  %v748_v25 = vmul.f32 %v1639_v27, %v732_v23  ;;  %v1643_v59 = vpop.eup %1642 }
 0x2e4   : > { %v755_v53 = vmul.f32 %v1641_v29, %v739_v24  ;;  %v749_v38 = vmul.f32 %v1643_v59, %v733_v61 }
 0x2e5   : > { %1000 = vst.msk [vmem:[#allocation3 + $0x8] sm:$0xff] %vm998_vm4, %v983_v46 }
 0x2e6   : > { %v942_v16 = vpop.xlane.xlu0 %941 }
 0x2e7   : > { %v984_v10 = vadd.f32 %v942_v16, %v744_v15  ;;  %v740_v16 = vld [vmem:[#allocation3 + $0x70] sm:$0xff] }
 0x2e9   : > { %1001 = vst.msk [vmem:[#allocation3 + $0x10] sm:$0xff] %vm998_vm4, %v984_v10 }
 0x2ea   : > { %v966_v21 = vpop.xlane.xlu0 %965  ;;  %v1645_v33 = vpop.eup %1644 }
 0x2eb   : > { %v992_v60 = vadd.f32 %v966_v21, %v752_v5  ;;  %v756_v10 = vmul.f32 %v1645_v33, %v740_v16 }
 0x2ec   : > { %v945_v57 = vpop.xlane.xlu1 %944 }
 0x2ed   : > { %1009 = vst.msk [vmem:[#allocation3 + $0x50] sm:$0xff] %vm998_vm4, %v992_v60  ;;  %v985_v42 = vadd.f32 %v945_v57, %v745_v47  ;;  %v1647_v11 = vpop.eup %1646 }
 0x2ee   : > { %v757_v32 = vmul.f32 %v1647_v11, %v741_v54 }
 0x2ef   : > { %1002 = vst.msk [vmem:[#allocation3 + $0x18] sm:$0xff] %vm998_vm4, %v985_v42 }
 0x2f0   : > { %v969_v62 = vpop.xlane.xlu1 %968  ;;  %v948_v3 = vpop.xlane.xlu0 %947 }
 0x2f1   : > { %v993_v4 = vadd.f32 %v969_v62, %v753_v52  ;;  %v986_v58 = vadd.f32 %v948_v3, %v746_v35 }
 0x2f3   : > { %1010 = vst.msk [vmem:[#allocation3 + $0x58] sm:$0xff] %vm998_vm4, %v993_v4  ;;  %1003 = vst.msk [vmem:[#allocation3 + $0x20] sm:$0xff] %vm998_vm4, %v986_v58 }
 0x2f4   : > { %v972_v44 = vpop.xlane.xlu0 %971 }
 0x2f5   : > { %v994_v36 = vadd.f32 %v972_v44, %v754_v9 }
 0x2f7   : > { %1011 = vst.msk [vmem:[#allocation3 + $0x60] sm:$0xff] %vm998_vm4, %v994_v36 }
 0x2f8   : > { %v951_v48 = vpop.xlane.xlu1 %950 }
 0x2f9   : > { %v987_v30 = vadd.f32 %v951_v48, %v747_v40 }
 0x2fb   : > { %1004 = vst.msk [vmem:[#allocation3 + $0x28] sm:$0xff] %vm998_vm4, %v987_v30 }
 0x2fc   : > { %v954_v45 = vpop.xlane.xlu0 %953  ;;  %v975_v28 = vpop.xlane.xlu1 %974 }
 0x2fd   : > { %v988_v46 = vadd.f32 %v954_v45, %v748_v25  ;;  %v995_v15 = vadd.f32 %v975_v28, %v755_v53 }
 0x2ff   : > { %1005 = vst.msk [vmem:[#allocation3 + $0x30] sm:$0xff] %vm998_vm4, %v988_v46  ;;  %1012 = vst.msk [vmem:[#allocation3 + $0x68] sm:$0xff] %vm998_vm4, %v995_v15 }
 0x300   : > { %v957_v1 = vpop.xlane.xlu1 %956 }
 0x301   : > { %v989_v55 = vadd.f32 %v957_v1, %v749_v38 }
 0x303   : > { %1006 = vst.msk [vmem:[#allocation3 + $0x38] sm:$0xff] %vm998_vm4, %v989_v55  ;;  %1034 = sbr.rel (%p1424_p8) target bundleno = 877 (0x36d), region = 36 }
 0x304   : > { %v978_v37 = vpop.xlane.xlu0 %977  ;;  %v981_v12 = vpop.xlane.xlu1 %980 }
 0x305   : > { %v996_v2 = vadd.f32 %v978_v37, %v756_v10  ;;  %v997_v13 = vadd.f32 %v981_v12, %v757_v32 }
 0x307   : > { %1013 = vst.msk [vmem:[#allocation3 + $0x70] sm:$0xff] %vm998_vm4, %v996_v2  ;;  %1014 = vst.msk [vmem:[#allocation3 + $0x78] sm:$0xff] %vm998_vm4, %v997_v13 }
 0x308   : > { %v1051_v34 = vld [vmem:[#allocation3] sm:$0xff]  ;;  %v1052_v5 = vld [vmem:[#allocation3 + $0x8] sm:$0xff]  ;;  %v1053_v21 = vld [vmem:[#allocation3 + $0x10] sm:$0xff] }
 0x309   : > { %1648 = vlog2.f32 %v1051_v34  ;;  %v1054_v60 = vld [vmem:[#allocation3 + $0x18] sm:$0xff]  ;;  %v1055_v47 = vld [vmem:[#allocation3 + $0x20] sm:$0xff]  ;;  %v1056_v0 = vld [vmem:[#allocation3 + $0x28] sm:$0xff] }
 0x30a   : > { %1650 = vlog2.f32 %v1052_v5  ;;  %v1057_v57 = vld [vmem:[#allocation3 + $0x30] sm:$0xff]  ;;  %v1058_v49 = vld [vmem:[#allocation3 + $0x38] sm:$0xff]  ;;  %v1059_v22 = vld [vmem:[#allocation3 + $0x40] sm:$0xff] }
 0x30b   : > { %1652 = vlog2.f32 %v1053_v21  ;;  %v1060_v39 = vld [vmem:[#allocation3 + $0x48] sm:$0xff]  ;;  %v1061_v6 = vld [vmem:[#allocation3 + $0x50] sm:$0xff]  ;;  %v1062_v17 = vld [vmem:[#allocation3 + $0x58] sm:$0xff] }
 0x30c   : > { %1654 = vlog2.f32 %v1054_v60  ;;  %v1035_v41 = vld [vmem:[#allocation2] sm:$0xff]  ;;  %v1036_v43 = vld [vmem:[#allocation2 + $0x8] sm:$0xff]  ;;  %v1037_v14 = vld [vmem:[#allocation2 + $0x10] sm:$0xff] }
 0x30d   : > { %1656 = vlog2.f32 %v1055_v47  ;;  %v1063_v50 = vld [vmem:[#allocation3 + $0x60] sm:$0xff]  ;;  %v1064_v8 = vld [vmem:[#allocation3 + $0x68] sm:$0xff]  ;;  %v1038_v4 = vld [vmem:[#allocation2 + $0x18] sm:$0xff] }
 0x30e   : > { %1658 = vlog2.f32 %v1056_v0  ;;  %v1065_v18 = vld [vmem:[#allocation3 + $0x70] sm:$0xff]  ;;  %v1066_v20 = vld [vmem:[#allocation3 + $0x78] sm:$0xff]  ;;  %v1039_v9 = vld [vmem:[#allocation2 + $0x20] sm:$0xff] }
 0x30f   : > { %1660 = vlog2.f32 %v1057_v57  ;;  %v1040_v27 = vld [vmem:[#allocation2 + $0x28] sm:$0xff]  ;;  %v1041_v55 = vld [vmem:[#allocation2 + $0x30] sm:$0xff]  ;;  %v1042_v57 = vld [vmem:[#allocation2 + $0x38] sm:$0xff] }
 0x310   : > { %1662 = vlog2.f32 %v1058_v49 }
 0x311   : > { %1664 = vlog2.f32 %v1059_v22 }
 0x312   : > { %1666 = vlog2.f32 %v1060_v39 }
 0x313   : > { %1668 = vlog2.f32 %v1061_v6 }
 0x314   : > { %1670 = vlog2.f32 %v1062_v17 }
 0x315   : > { %1672 = vlog2.f32 %v1063_v50 }
 0x316   : > { %v1649_v42 = vpop.eup %1648  ;;  %1674 = vlog2.f32 %v1064_v8 }
 0x317   : > { %v1651_v7 = vpop.eup %1650  ;;  %v1068_v51 = vmul.f32 0.6931472, %v1649_v42  ;;  %1676 = vlog2.f32 %v1065_v18 }
 0x318   : > { %v1653_v52 = vpop.eup %1652  ;;  %v1070_v62 = vmul.f32 0.6931472, %v1651_v7  ;;  %1678 = vlog2.f32 %v1066_v20 }
 0x319   : > { %v1655_v56 = vpop.eup %1654  ;;  %v1099_v63 = vadd.f32 %v1068_v51, %v1035_v41  ;;  %v1072_v35 = vmul.f32 0.6931472, %v1653_v52  ;;  %v1043_v52 = vld [vmem:[#allocation2 + $0x40] sm:$0xff] }
 0x31a   : > { %v1657_v3 = vpop.eup %1656  ;;  %v1100_v19 = vadd.f32 %v1070_v62, %v1036_v43  ;;  %v1074_v58 = vmul.f32 0.6931472, %v1655_v56  ;;  %v1044_v62 = vld [vmem:[#allocation2 + $0x48] sm:$0xff] }
 0x31b   : > { %v1659_v26 = vpop.eup %1658  ;;  %v2411_v44 = vmax.f32 %v1099_v63, -18.420681  ;;  %v1101_v31 = vadd.f32 %v1072_v35, %v1037_v14  ;;  %v1076_v36 = vmul.f32 0.6931472, %v1657_v3 }
 0x31c   : > { %v2413_v23 = vmax.f32 %v1100_v19, -18.420681  ;;  %v1102_v40 = vadd.f32 %v1074_v58, %v1038_v4  ;;  %v1078_v29 = vmul.f32 0.6931472, %v1659_v26  ;;  %v1661_v16 = vpop.eup %1660 }
 0x31d   : > { %v1131_v48 = vsub.f32 %v1099_v63, %v2411_v44  ;;  %v1179_v24 = vsub.f32 -18.420681, %v2411_v44  ;;  %v2417_v30 = vmax.f32 %v1101_v31, -18.420681  ;;  %v1103_v25 = vadd.f32 %v1076_v36, %v1039_v9  ;;  %v1663_v10 = vpop.eup %1662 }
 0x31e   : > { %v1132_v45 = vsub.f32 %v1100_v19, %v2413_v23  ;;  %v1180_v46 = vsub.f32 -18.420681, %v2413_v23  ;;  %v2421_v53 = vmax.f32 %v1102_v40, -18.420681  ;;  %v1104_v59 = vadd.f32 %v1078_v29, %v1040_v27  ;;  %v1665_v12 = vpop.eup %1664  ;;  %v1046_v29 = vld [vmem:[#allocation2 + $0x58] sm:$0xff] }
 0x31f   : > { %v1147_v28 = vmul.f32 1.442695, %v1131_v48  ;;  %v1195_v61 = vmul.f32 1.442695, %v1179_v24  ;;  %v1133_v15 = vsub.f32 %v1101_v31, %v2417_v30  ;;  %v1181_v33 = vsub.f32 -18.420681, %v2417_v30  ;;  %v1667_v21 = vpop.eup %1666 }
 0x320   : > { %v1149_v38 = vmul.f32 1.442695, %v1132_v45  ;;  %v1197_v11 = vmul.f32 1.442695, %v1180_v46  ;;  %v1134_v1 = vsub.f32 %v1102_v40, %v2421_v53  ;;  %v1182_v54 = vsub.f32 -18.420681, %v2421_v53  ;;  %v1669_v49 = vpop.eup %1668 }
 0x321   : > { %1680 = vpow2.f32 %v1147_v28  ;;  %v1151_v37 = vmul.f32 1.442695, %v1133_v15  ;;  %v1199_v2 = vmul.f32 1.442695, %v1181_v33  ;;  %v2427_v32 = vmax.f32 %v1103_v25, -18.420681  ;;  %v1671_v17 = vpop.eup %1670 }
 0x322   : > { %1682 = vpow2.f32 %v1195_v61  ;;  %v1153_v13 = vmul.f32 1.442695, %v1134_v1  ;;  %v1201_v34 = vmul.f32 1.442695, %v1182_v54  ;;  %v2429_v5 = vmax.f32 %v1104_v59, -18.420681  ;;  %v2435_v7 = vpop.eup %1672 }
 0x323   : > { %1684 = vpow2.f32 %v1149_v38  ;;  %v1135_v60 = vsub.f32 %v1103_v25, %v2427_v32  ;;  %v1183_v47 = vsub.f32 -18.420681, %v2427_v32  ;;  %v1080_v0 = vmul.f32 0.6931472, %v1661_v16  ;;  %v1675_v14 = vpop.eup %1674  ;;  %v1045_v40 = vld [vmem:[#allocation2 + $0x50] sm:$0xff] }
 0x324   : > { %1686 = vpow2.f32 %v1197_v11  ;;  %v1136_v22 = vsub.f32 %v1104_v59, %v2429_v5  ;;  %v1184_v39 = vsub.f32 -18.420681, %v2429_v5  ;;  %v1082_v6 = vmul.f32 0.6931472, %v1663_v10  ;;  %v2439_v35 = vpop.eup %1676 }
 0x325   : > { %1688 = vpow2.f32 %v1151_v37  ;;  %v1155_v42 = vmul.f32 1.442695, %v1135_v60  ;;  %v1203_v41 = vmul.f32 1.442695, %v1183_v47  ;;  %v1105_v50 = vadd.f32 %v1080_v0, %v1041_v55  ;;  %v2443_v19 = vpop.eup %1678  ;;  %v1047_v47 = vld [vmem:[#allocation2 + $0x60] sm:$0xff] }
 0x326   : > { %1690 = vpow2.f32 %v1199_v2  ;;  %v1157_v51 = vmul.f32 1.442695, %v1136_v22  ;;  %v1205_v43 = vmul.f32 1.442695, %v1184_v39  ;;  %v1106_v8 = vadd.f32 %v1082_v6, %v1042_v57  ;;  %v1048_v22 = vld [vmem:[#allocation2 + $0x68] sm:$0xff] }
 0x327   : > { %1692 = vpow2.f32 %v1153_v13  ;;  %v2437_v18 = vmax.f32 %v1105_v50, -18.420681  ;;  %v1084_v56 = vmul.f32 0.6931472, %v1665_v12  ;;  %v1086_v63 = vmul.f32 0.6931472, %v1667_v21 }
 0x328   : > { %1694 = vpow2.f32 %v1201_v34  ;;  %v2441_v4 = vmax.f32 %v1106_v8, -18.420681  ;;  %v1088_v20 = vmul.f32 0.6931472, %v1669_v49  ;;  %v1090_v3 = vmul.f32 0.6931472, %v1671_v17 }
 0x329   : > { %1696 = vpow2.f32 %v1155_v42  ;;  %v1137_v58 = vsub.f32 %v1105_v50, %v2437_v18  ;;  %v1185_v9 = vsub.f32 -18.420681, %v2437_v18  ;;  %v1107_v26 = vadd.f32 %v1084_v56, %v1043_v52 }
 0x32a   : > { %1698 = vpow2.f32 %v1203_v41  ;;  %v1138_v31 = vsub.f32 %v1106_v8, %v2441_v4  ;;  %v1186_v36 = vsub.f32 -18.420681, %v2441_v4  ;;  %v1108_v27 = vadd.f32 %v1086_v63, %v1044_v62 }
 0x32b   : > { %1700 = vpow2.f32 %v1157_v51  ;;  %v1159_v48 = vmul.f32 1.442695, %v1137_v58  ;;  %v1207_v24 = vmul.f32 1.442695, %v1185_v9  ;;  %v2449_v25 = vmax.f32 %v1107_v26, -18.420681 }
 0x32c   : > { %1702 = vpow2.f32 %v1205_v43  ;;  %v1161_v45 = vmul.f32 1.442695, %v1138_v31  ;;  %v1209_v46 = vmul.f32 1.442695, %v1186_v36  ;;  %v2451_v59 = vmax.f32 %v1108_v27, -18.420681 }
 0x32d   : > { %1704 = vpow2.f32 %v1159_v48  ;;  %v1139_v28 = vsub.f32 %v1107_v26, %v2449_v25  ;;  %v1187_v61 = vsub.f32 -18.420681, %v2449_v25  ;;  %v1109_v15 = vadd.f32 %v1088_v20, %v1045_v40  ;;  %v1049_v43 = vld [vmem:[#allocation2 + $0x70] sm:$0xff] }
 0x32e   : > { %v1681_v33 = vpop.eup %1680  ;;  %1706 = vpow2.f32 %v1207_v24  ;;  %v1140_v16 = vsub.f32 %v1108_v27, %v2451_v59  ;;  %v1188_v38 = vsub.f32 -18.420681, %v2451_v59  ;;  %v1110_v11 = vadd.f32 %v1090_v3, %v1046_v29  ;;  %v1050_v24 = vld [vmem:[#allocation2 + $0x78] sm:$0xff] }
 0x32f   : > { %v1683_v1 = vpop.eup %1682  ;;  %1708 = vpow2.f32 %v1161_v45  ;;  %v1163_v54 = vmul.f32 1.442695, %v1139_v28  ;;  %v1211_v55 = vmul.f32 1.442695, %v1187_v61  ;;  %v2457_v10 = vmax.f32 %v1109_v15, -18.420681 }
 0x330   : > { %v1685_v37 = vpop.eup %1684  ;;  %v1227_v2 = vadd.f32 %v1683_v1, %v1681_v33  ;;  %1710 = vpow2.f32 %v1209_v46  ;;  %v1165_v12 = vmul.f32 1.442695, %v1140_v16  ;;  %v2461_v60 = vmax.f32 %v1110_v11, -18.420681 }
 0x331   : > { %v1687_v13 = vpop.eup %1686  ;;  %1712 = vpow2.f32 %v1163_v54  ;;  %v1141_v34 = vsub.f32 %v1109_v15, %v2457_v10  ;;  %v1189_v21 = vsub.f32 -18.420681, %v2457_v10  ;;  %v1092_v49 = vmul.f32 0.6931472, %v2435_v7 }
 0x332   : > { %v1689_v0 = vpop.eup %1688  ;;  %1714 = vlog2.f32 %v1227_v2  ;;  %v1228_v57 = vadd.f32 %v1687_v13, %v1685_v37  ;;  %v1094_v39 = vmul.f32 0.6931472, %v1675_v14  ;;  %v1213_v17 = vmul.f32 1.442695, %v1188_v38 }
 0x333   : > { %v1691_v6 = vpop.eup %1690  ;;  %1716 = vpow2.f32 %v1211_v55  ;;  %v1167_v50 = vmul.f32 1.442695, %v1141_v34  ;;  %v1111_v51 = vadd.f32 %v1092_v49, %v1047_v47  ;;  %v1142_v52 = vsub.f32 %v1110_v11, %v2461_v60 }
 0x334   : > { %v1693_v42 = vpop.eup %1692  ;;  %1718 = vlog2.f32 %v1228_v57  ;;  %v1229_v41 = vadd.f32 %v1691_v6, %v1689_v0  ;;  %v1112_v62 = vadd.f32 %v1094_v39, %v1048_v22  ;;  %v1096_v56 = vmul.f32 0.6931472, %v2439_v35 }
 0x335   : > { %v1695_v8 = vpop.eup %1694  ;;  %1720 = vpow2.f32 %v1165_v12  ;;  %v1215_v14 = vmul.f32 1.442695, %v1189_v21  ;;  %v2466_v20 = vmax.f32 %v1111_v51, -18.420681  ;;  %v1190_v58 = vsub.f32 -18.420681, %v2461_v60 }
 0x336   : > { %v1697_v63 = vpop.eup %1696  ;;  %1722 = vlog2.f32 %v1229_v41  ;;  %v1230_v7 = vadd.f32 %v1695_v8, %v1693_v42  ;;  %v2469_v9 = vmax.f32 %v1112_v62, -18.420681  ;;  %v1113_v26 = vadd.f32 %v1096_v56, %v1049_v43 }
 0x337   : > { %v1699_v3 = vpop.eup %1698  ;;  %1724 = vpow2.f32 %v1213_v17  ;;  %v1098_v27 = vmul.f32 0.6931472, %v2443_v19  ;;  %v1169_v35 = vmul.f32 1.442695, %v1142_v52  ;;  %v1143_v29 = vsub.f32 %v1111_v51, %v2466_v20 }
 0x338   : > { %v1701_v31 = vpop.eup %1700  ;;  %1726 = vlog2.f32 %v1230_v7  ;;  %v1231_v36 = vadd.f32 %v1699_v3, %v1697_v63  ;;  %v2473_v48 = vmax.f32 %v1113_v26, -18.420681  ;;  %v1191_v28 = vsub.f32 -18.420681, %v2466_v20 }
 0x339   : > { %v1703_v40 = vpop.eup %1702  ;;  %1728 = vpow2.f32 %v1167_v50  ;;  %v1217_v15 = vmul.f32 1.442695, %v1190_v58  ;;  %v1144_v33 = vsub.f32 %v1112_v62, %v2469_v9  ;;  %v1192_v38 = vsub.f32 -18.420681, %v2469_v9 }
 0x33a   : > { %v1705_v45 = vpop.eup %1704  ;;  %1730 = vlog2.f32 %v1231_v36  ;;  %v1232_v46 = vadd.f32 %v1703_v40, %v1701_v31  ;;  %v1114_v11 = vadd.f32 %v1098_v27, %v1050_v24  ;;  %v1171_v54 = vmul.f32 1.442695, %v1143_v29 }
 0x33b   : > { %v1707_v61 = vpop.eup %1706  ;;  %1732 = vpow2.f32 %v1215_v14  ;;  %v1145_v55 = vsub.f32 %v1113_v26, %v2473_v48  ;;  %v1219_v12 = vmul.f32 1.442695, %v1191_v28  ;;  %v1173_v21 = vmul.f32 1.442695, %v1144_v33 }
 0x33c   : > { %v1709_v16 = vpop.eup %1708  ;;  %1734 = vlog2.f32 %v1232_v46  ;;  %v1233_v19 = vadd.f32 %v1707_v61, %v1705_v45  ;;  %v2479_v13 = vmax.f32 %v1114_v11, -18.420681  ;;  %v1221_v57 = vmul.f32 1.442695, %v1192_v38 }
 0x33d   : > { %v1711_v1 = vpop.eup %1710  ;;  %1736 = vpow2.f32 %v1169_v35  ;;  %v1193_v49 = vsub.f32 -18.420681, %v2473_v48  ;;  %v1175_v6 = vmul.f32 1.442695, %v1145_v55 }
 0x33e   : > { %v1713_v37 = vpop.eup %1712  ;;  %1738 = vlog2.f32 %v1233_v19  ;;  %v1234_v2 = vadd.f32 %v1711_v1, %v1709_v16  ;;  %v1146_v17 = vsub.f32 %v1114_v11, %v2479_v13  ;;  %v1194_v51 = vsub.f32 -18.420681, %v2479_v13 }
 0x33f   : > { %v1715_v34 = vpop.eup %1714  ;;  %1740 = vpow2.f32 %v1217_v15  ;;  %v1223_v56 = vmul.f32 1.442695, %v1193_v49 }
 0x340   : > { %v1717_v47 = vpop.eup %1716  ;;  %v1244_v0 = vmul.f32 0.6931472, %v1715_v34  ;;  %1742 = vlog2.f32 %v1234_v2  ;;  %v1225_v26 = vmul.f32 1.442695, %v1194_v51 }
 0x341   : > { %v1719_v22 = vpop.eup %1718  ;;  %v1235_v39 = vadd.f32 %v1717_v47, %v1713_v37  ;;  %1744 = vpow2.f32 %v1171_v54 }
 0x342   : > { %v1721_v42 = vpop.eup %1720  ;;  %v1275_v41 = vadd.f32 %v1244_v0, %v2411_v44  ;;  %v1246_v50 = vmul.f32 0.6931472, %v1719_v22  ;;  %1746 = vpow2.f32 %v1219_v12  ;;  %v1177_v44 = vmul.f32 1.442695, %v1146_v17 }
 0x343   : > { %v1723_v43 = vpop.eup %1722  ;;  %1748 = vlog2.f32 %v1235_v39 }
 0x344   : > { %v1725_v8 = vpop.eup %1724  ;;  %1291 = vst.msk [vmem:[%s1880_s28] sm:$0xff] %vm998_vm4, %v1275_v41  ;;  %v1276_v52 = vadd.f32 %v1246_v50, %v2413_v23  ;;  %v1248_v62 = vmul.f32 0.6931472, %v1723_v43  ;;  %1750 = vpow2.f32 %v1173_v21 }
 0x345   : > { %v1727_v63 = vpop.eup %1726  ;;  %v1236_v7 = vadd.f32 %v1725_v8, %v1721_v42  ;;  %1752 = vpow2.f32 %v1221_v57 }
 0x346   : > { %v1729_v14 = vpop.eup %1728  ;;  %1292 = vst.msk [vmem:[%s1880_s28 + $0x8] sm:$0xff] %vm998_vm4, %v1276_v52  ;;  %v1277_v3 = vadd.f32 %v1248_v62, %v2417_v30  ;;  %v1250_v58 = vmul.f32 0.6931472, %v1727_v63  ;;  %1754 = vpow2.f32 %v1175_v6 }
 0x347   : > { %v1731_v31 = vpop.eup %1730  ;;  %1756 = vlog2.f32 %v1236_v7 }
 0x348   : > { %v1733_v23 = vpop.eup %1732  ;;  %1293 = vst.msk [vmem:[%s1880_s28 + $0x10] sm:$0xff] %vm998_vm4, %v1277_v3  ;;  %v1278_v36 = vadd.f32 %v1250_v58, %v2421_v53  ;;  %v1252_v27 = vmul.f32 0.6931472, %v1731_v31  ;;  %1758 = vpow2.f32 %v1223_v56 }
 0x349   : > { %v1735_v40 = vpop.eup %1734  ;;  %v1237_v35 = vadd.f32 %v1733_v23, %v1729_v14  ;;  %1760 = vpow2.f32 %v1177_v44 }
 0x34a   : > { %v1737_v29 = vpop.eup %1736  ;;  %1294 = vst.msk [vmem:[%s1880_s28 + $0x18] sm:$0xff] %vm998_vm4, %v1278_v36  ;;  %v1279_v30 = vadd.f32 %v1252_v27, %v2427_v32  ;;  %v1254_v24 = vmul.f32 0.6931472, %v1735_v40  ;;  %1762 = vpow2.f32 %v1225_v26 }
 0x34b   : > { %v1739_v45 = vpop.eup %1738  ;;  %1764 = vlog2.f32 %v1237_v35 }
 0x34c   : > { %v1741_v46 = vpop.eup %1740  ;;  %1295 = vst.msk [vmem:[%s1880_s28 + $0x20] sm:$0xff] %vm998_vm4, %v1279_v30  ;;  %v1280_v53 = vadd.f32 %v1254_v24, %v2429_v5  ;;  %v1256_v28 = vmul.f32 0.6931472, %v1739_v45 }
 0x34d   : > { %v1743_v61 = vpop.eup %1742  ;;  %v1238_v15 = vadd.f32 %v1741_v46, %v1737_v29 }
 0x34e   : > { %v1745_v33 = vpop.eup %1744  ;;  %1296 = vst.msk [vmem:[%s1880_s28 + $0x28] sm:$0xff] %vm998_vm4, %v1280_v53  ;;  %v1281_v16 = vadd.f32 %v1256_v28, %v2437_v18  ;;  %v1258_v32 = vmul.f32 0.6931472, %v1743_v61 }
 0x34f   : > { %v1747_v19 = vpop.eup %1746  ;;  %1766 = vlog2.f32 %v1238_v15 }
 0x350   : > { %v1749_v38 = vpop.eup %1748  ;;  %1297 = vst.msk [vmem:[%s1880_s28 + $0x30] sm:$0xff] %vm998_vm4, %v1281_v16  ;;  %v1282_v11 = vadd.f32 %v1258_v32, %v2441_v4  ;;  %v1239_v1 = vadd.f32 %v1747_v19, %v1745_v33 }
 0x351   : > { %v1751_v5 = vpop.eup %1750  ;;  %v1260_v54 = vmul.f32 0.6931472, %v1749_v38 }
 0x352   : > { %v1753_v55 = vpop.eup %1752  ;;  %1298 = vst.msk [vmem:[%s1880_s28 + $0x38] sm:$0xff] %vm998_vm4, %v1282_v11  ;;  %1768 = vlog2.f32 %v1239_v1 }
 0x353   : > { %v1755_v37 = vpop.eup %1754  ;;  %v1283_v18 = vadd.f32 %v1260_v54, %v2449_v25  ;;  %v1240_v2 = vadd.f32 %v1753_v55, %v1751_v5 }
 0x354   : > { %v1757_v12 = vpop.eup %1756 }
 0x355   : > { %v1759_v34 = vpop.eup %1758  ;;  %1299 = vst.msk [vmem:[%s1880_s28 + $0x40] sm:$0xff] %vm998_vm4, %v1283_v18  ;;  %v1262_v21 = vmul.f32 0.6931472, %v1757_v12  ;;  %1770 = vlog2.f32 %v1240_v2 }
 0x356   : > { %v1761_v4 = vpop.eup %1760  ;;  %v1241_v47 = vadd.f32 %v1759_v34, %v1755_v37 }
 0x357   : > { %v1763_v0 = vpop.eup %1762  ;;  %v1284_v57 = vadd.f32 %v1262_v21, %v2451_v59 }
 0x358   : > { %v1765_v49 = vpop.eup %1764  ;;  %1772 = vlog2.f32 %v1241_v47  ;;  %v1242_v22 = vadd.f32 %v1763_v0, %v1761_v4 }
 0x359   : > { %1300 = vst.msk [vmem:[%s1880_s28 + $0x48] sm:$0xff] %vm998_vm4, %v1284_v57  ;;  %v1264_v25 = vmul.f32 0.6931472, %v1765_v49 }
 0x35a   : > { %1774 = vlog2.f32 %v1242_v22 }
 0x35b   : > { %v1285_v39 = vadd.f32 %v1264_v25, %v2457_v10 }
 0x35c   : > { %v1767_v6 = vpop.eup %1766 }
 0x35d   : > { %1301 = vst.msk [vmem:[%s1880_s28 + $0x50] sm:$0xff] %vm998_vm4, %v1285_v39  ;;  %v1266_v17 = vmul.f32 0.6931472, %v1767_v6 }
 0x35f   : > { %v1769_v42 = vpop.eup %1768  ;;  %v1286_v41 = vadd.f32 %v1266_v17, %v2461_v60 }
 0x360   : > { %v1268_v59 = vmul.f32 0.6931472, %v1769_v42 }
 0x361   : > { %1302 = vst.msk [vmem:[%s1880_s28 + $0x58] sm:$0xff] %vm998_vm4, %v1286_v41 }
 0x362   : > { %v1771_v50 = vpop.eup %1770  ;;  %v1287_v51 = vadd.f32 %v1268_v59, %v2466_v20 }
 0x363   : > { %v1270_v43 = vmul.f32 0.6931472, %v1771_v50 }
 0x364   : > { %1303 = vst.msk [vmem:[%s1880_s28 + $0x60] sm:$0xff] %vm998_vm4, %v1287_v51 }
 0x365   : > { %v1773_v10 = vpop.eup %1772  ;;  %v1288_v8 = vadd.f32 %v1270_v43, %v2469_v9 }
 0x366   : > { %v1272_v52 = vmul.f32 0.6931472, %v1773_v10 }
 0x367   : > { %v1775_v62 = vpop.eup %1774  ;;  %1304 = vst.msk [vmem:[%s1880_s28 + $0x68] sm:$0xff] %vm998_vm4, %v1288_v8 }
 0x368   : > { %v1289_v56 = vadd.f32 %v1272_v52, %v2473_v48  ;;  %v1274_v60 = vmul.f32 0.6931472, %v1775_v62 }
 0x36a   : > { %1305 = vst.msk [vmem:[%s1880_s28 + $0x70] sm:$0xff] %vm998_vm4, %v1289_v56  ;;  %v1290_v63 = vadd.f32 %v1274_v60, %v2479_v13 }
 0x36c   : > { %1306 = vst.msk [vmem:[%s1880_s28 + $0x78] sm:$0xff] %vm998_vm4, %v1290_v63 }
 0x36d PF: > { %s12_s13 = sadd.s32 1, %s1814_s13   ;;  %s2611_s9 = smov %s1806_s11 }
 0x36e   : > { %p9_p9 = scmp.ge.s32.totalorder %s12_s13, 6   ;;  %s2612_s10 = smov %s1810_s12 }
 0x36f   : > { %s2613_s11 = smov %s2616_s14  ;;  %s2614_s12 = smov %s2620_s15 }
 0x370   :  { %11 = sbr.rel (!%p9_p9) target bundleno = 3 (0x3), region = 69 }

</bundles_post_ra>
